<compile_context>
chip_gen: v7x
topology: tpu7x:2x2x1
jax: 0.10.0
libtpu: 0.0.40
codegen_flags: <defaults>
</compile_context>

<pallas_src>
import math

import jax
import jax.numpy as jnp
from jax.experimental import pallas as pl
from jax.experimental.pallas import tpu as pltpu

LN_EPS = 1e-5        # PyTorch nn.LayerNorm default
LEAKY_SLOPE = 0.01   # PyTorch nn.LeakyReLU default


def _round_up(x, m):
    return ((x + m - 1) // m) * m


# ---------------------------------------------------------------------------
# Packed layout for all 1-D parameters (biases, LN gamma/beta, fused head bias)
# Every segment size is a multiple of 128 -> every static slice is lane-aligned.
# ---------------------------------------------------------------------------
def _vec_layout(head_pad):
    sizes = [
        ("b1", 256), ("g1", 256), ("be1", 256),
        ("b2", 512), ("g2", 512), ("be2", 512),
        ("r1b1", 512), ("r1g1", 512), ("r1be1", 512),
        ("r1b2", 512), ("r1g2", 512), ("r1be2", 512),
        ("b3", 256), ("g3", 256), ("be3", 256),
        ("r2b1", 256), ("r2g1", 256), ("r2be1", 256),
        ("r2b2", 256), ("r2g2", 256), ("r2be2", 256),
        ("bh", head_pad),
    ]
    layout, off = {}, 0
    for name, sz in sizes:
        layout[name] = (off, sz)
        off += sz
    return layout, off


# ---------------------------------------------------------------------------
# In-kernel math helpers (pure jnp / pl, traced inside the Pallas body)
# ---------------------------------------------------------------------------
def _sigmoid(h):
    # numerically stable logistic; reciprocal routed to the EUP (approx=True).
    # clamp r <= 1 so both branches stay in [0, 1] even with the approximate rcp.
    e = jnp.exp(-jnp.abs(h))
    r = jnp.minimum(pl.reciprocal(1.0 + e, approx=True), 1.0)
    return jnp.where(h >= 0, r, 1.0 - r)


def _silu(h):
    return h * _sigmoid(h)


def _leaky_relu(h):
    return jnp.where(h > 0, h, LEAKY_SLOPE * h)


# ---------------------------------------------------------------------------
# Kernel factory (closes over static layout / sizes)
# ---------------------------------------------------------------------------
def make_kernel(layout, total_cells):
    TC = total_cells

    def kernel(x_ref,
               w1, w2, r1w1, r1w2, w3, r2w1, r2w2, wh,   # bf16 weights (VMEM-resident)
               vec_ref,                                  # packed [1, P] f32 vector params
               out_ref):                                 # [TB, HEAD_PAD] fused output slab

        def vp(name):
            off, sz = layout[name]
            return vec_ref[:, off:off + sz]              # static, 128-aligned slice

        def linear(h, w_ref, bias):
            return jnp.dot(h.astype(jnp.bfloat16), w_ref[...],
                           preferred_element_type=jnp.float32) + bias

        def layernorm(h, g, b):
            # single pass: mean + mean of squares; gamma folded into the rsqrt scale.
            # (E[x^2]-E[x]^2 in f32 is adequate for post-linear activations here.)
            mu = jnp.mean(h, axis=-1, keepdims=True)
            ms = jnp.mean(h * h, axis=-1, keepdims=True)
            var = ms - mu * mu
            return (h - mu) * (jax.lax.rsqrt(var + LN_EPS) * g) + b

        x = x_ref[...]

        # shared trunk
        h = _silu(layernorm(linear(x, w1, vp("b1")), vp("g1"), vp("be1")))
        h = _silu(layernorm(linear(h, w2, vp("b2")), vp("g2"), vp("be2")))

        # ResidualBlock(512)
        r = layernorm(linear(h, r1w1, vp("r1b1")), vp("r1g1"), vp("r1be1"))
        r = _leaky_relu(r)
        r = layernorm(linear(r, r1w2, vp("r1b2")), vp("r1g2"), vp("r1be2"))
        h = h + r

        h = _silu(layernorm(linear(h, w3, vp("b3")), vp("g3"), vp("be3")))

        # ResidualBlock(256)
        r = layernorm(linear(h, r2w1, vp("r2b1")), vp("r2g1"), vp("r2be1"))
        r = _leaky_relu(r)
        r = layernorm(linear(r, r2w2, vp("r2b2")), vp("r2g2"), vp("r2be2"))
        h = h + r

        # fused heads: single matmul, one lane-dense output slab
        head = linear(h, wh, vp("bh"))                   # [TB, HEAD_PAD]
        out_ref[:, : 2 * TC] = _sigmoid(head[:, : 2 * TC])   # water_mean | fertilizer_mean
        out_ref[:, 2 * TC:] = head[:, 2 * TC:]               # masks | crop_type logits | pad

    return kernel


# ---------------------------------------------------------------------------
# Parameter construction (deterministic, synthetic — mirrors PyTorch shapes/init)
# ---------------------------------------------------------------------------
def init_params(key, input_dim, total_cells, n_crops):
    head_pad = _round_up(4 * total_cells + n_crops, 128)
    keys = iter(jax.random.split(key, 64))

    def lin(in_d, out_d):
        bound = 1.0 / math.sqrt(in_d)
        w = jax.random.uniform(next(keys), (in_d, out_d), jnp.float32, -bound, bound)
        b = jax.random.uniform(next(keys), (out_d,), jnp.float32, -bound, bound)
        return w, b

    # trunk
    w1, b1 = lin(input_dim, 256)
    w2, b2 = lin(256, 512)
    r1w1, r1b1 = lin(512, 512)
    r1w2, r1b2 = lin(512, 512)
    w3, b3 = lin(512, 256)
    r2w1, r2b1 = lin(256, 256)
    r2w2, r2b2 = lin(256, 256)

    # heads (fused + padded to HEAD_PAD columns)
    ww, wb = lin(256, total_cells)
    fw, fb = lin(256, total_cells)
    cmw, cmb = lin(256, total_cells)
    hmw, hmb = lin(256, total_cells)
    ctw, ctb = lin(256, n_crops)
    wh = jnp.concatenate([ww, fw, cmw, hmw, ctw], axis=1)
    bh = jnp.concatenate([wb, fb, cmb, hmb, ctb])
    pad = head_pad - wh.shape[1]
    wh = jnp.pad(wh, ((0, 0), (0, pad)))
    bh = jnp.pad(bh, (0, pad))

    weights = tuple(w.astype(jnp.bfloat16)
                    for w in (w1, w2, r1w1, r1w2, w3, r2w1, r2w2, wh))

    ones = lambda d: jnp.ones((d,), jnp.float32)
    zeros = lambda d: jnp.zeros((d,), jnp.float32)
    vec_vals = {
        "b1": b1, "g1": ones(256), "be1": zeros(256),
        "b2": b2, "g2": ones(512), "be2": zeros(512),
        "r1b1": r1b1, "r1g1": ones(512), "r1be1": zeros(512),
        "r1b2": r1b2, "r1g2": ones(512), "r1be2": zeros(512),
        "b3": b3, "g3": ones(256), "be3": zeros(256),
        "r2b1": r2b1, "r2g1": ones(256), "r2be1": zeros(256),
        "r2b2": r2b2, "r2g2": ones(256), "r2be2": zeros(256),
        "bh": bh,
    }
    layout, total = _vec_layout(head_pad)
    vec = jnp.zeros((1, total), jnp.float32)
    for name, (off, sz) in layout.items():
        vec = vec.at[0, off:off + sz].set(vec_vals[name])

    # log-std parameters (nn.Parameter(torch.zeros(total_cells)))
    water_log_std = jnp.zeros((total_cells,), jnp.float32)
    fert_log_std = jnp.zeros((total_cells,), jnp.float32)
    return weights, vec, layout, water_log_std, fert_log_std, head_pad


# ---------------------------------------------------------------------------
# Wrapper
# ---------------------------------------------------------------------------
def _select_batch_tile(B, batch_tile=None):
    """TB policy from the perf review: single step for small B, 128/256 for large B."""
    if batch_tile is not None:
        return batch_tile
    if B <= 128:
        return _round_up(max(B, 8), 8)       # one grid step, no pipeline overhead
    if B >= 512:
        return 256                           # v6e/v7x 2x256 MXU-friendly
    return 128                               # matches v5e 128-wide MXU tiles


def _const_block_spec(shape):
    """Constant-index block (weights / packed vec): single-buffered, VMEM-resident."""
    try:
        return pl.BlockSpec(shape, lambda i: (0, 0), pipeline_mode=pl.Buffered(1))
    except TypeError:  # older jax without pipeline_mode kwarg
        return pl.BlockSpec(shape, lambda i: (0, 0))


def hybrid_policy_forward(x, weights, vec, layout, water_log_std, fert_log_std,
                          total_cells, n_crops, batch_tile=None):
    B, input_dim = x.shape
    TC = total_cells
    head_pad = weights[-1].shape[1]

    TB = _select_batch_tile(B, batch_tile)
    Bp = _round_up(B, TB)
    if Bp != B:
        x = jnp.pad(x, ((0, Bp - B), (0, 0)))
    n_steps = Bp // TB

    # Megacore sharding only pays off when each core gets several batch tiles to
    # amortize its own weight DMA; otherwise keep the grid on one core.
    semantics = ("parallel",) if n_steps >= 8 else ("arbitrary",)

    kernel = make_kernel(layout, TC)

    weight_specs = [_const_block_spec(w.shape) for w in weights]
    in_specs = ([pl.BlockSpec((TB, input_dim), lambda i: (i, 0))]
                + weight_specs
                + [_const_block_spec(vec.shape)])

    slab = pl.pallas_call(
        kernel,
        out_shape=jax.ShapeDtypeStruct((Bp, head_pad), jnp.float32),
        grid=(n_steps,),
        in_specs=in_specs,
        out_specs=pl.BlockSpec((TB, head_pad), lambda i: (i, 0)),
        compiler_params=pltpu.CompilerParams(dimension_semantics=semantics),
    )(x, *weights, vec)

    slab = slab[:B]
    water_mean = slab[:, :TC]
    fert_mean = slab[:, TC:2 * TC]
    crop_mask_logits = slab[:, 2 * TC:3 * TC]
    harvest_mask_logits = slab[:, 3 * TC:4 * TC]
    crop_select_logits = slab[:, 4 * TC:4 * TC + n_crops]

    # batch-independent stds, hoisted out of the kernel (XLA can constant-fold/cache)
    water_std = jnp.exp(water_log_std)
    fert_std = jnp.exp(fert_log_std)

    return (water_mean, water_std, fert_mean, fert_std,
            crop_mask_logits, harvest_mask_logits, crop_select_logits)


if __name__ == "__main__":
    # small but representative shapes
    batch = 16
    input_dim = 32
    total_cells = 128
    n_crops = 8

    key = jax.random.PRNGKey(0)
    k_x, k_p = jax.random.split(key)
    x = jax.random.normal(k_x, (batch, input_dim), jnp.float32)
    weights, vec, layout, wls, fls, head_pad = init_params(
        k_p, input_dim, total_cells, n_crops)

    outs = hybrid_policy_forward(x, weights, vec, layout, wls, fls,
                                 total_cells, n_crops)
    outs = jax.block_until_ready(outs)

    (water_mean, water_std, fert_mean, fert_std,
     crop_mask_logits, harvest_mask_logits, crop_select_logits) = outs

    assert water_mean.shape == (batch, total_cells)
    assert water_std.shape == (total_cells,)
    assert fert_mean.shape == (batch, total_cells)
    assert fert_std.shape == (total_cells,)
    assert crop_mask_logits.shape == (batch, total_cells)
    assert harvest_mask_logits.shape == (batch, total_cells)
    assert crop_select_logits.shape == (batch, n_crops)
    assert bool(jnp.all(jnp.isfinite(water_mean)))
    assert bool(jnp.all((water_mean >= 0.0) & (water_mean <= 1.0)))
    assert bool(jnp.all((fert_mean >= 0.0) & (fert_mean <= 1.0)))
    assert bool(jnp.all(jnp.isfinite(crop_select_logits)))

    print("KERNEL_OK")
</pallas_src>

<mosaic_0001>
module attributes {stable_mosaic.version = 11 : i64} {
  func.func @kernel(%arg0: i32, %arg1: memref<16x32xf32, #tpu.memory_space<vmem>>, %arg2: memref<32x256xbf16, #tpu.memory_space<vmem>>, %arg3: memref<256x512xbf16, #tpu.memory_space<vmem>>, %arg4: memref<512x512xbf16, #tpu.memory_space<vmem>>, %arg5: memref<512x512xbf16, #tpu.memory_space<vmem>>, %arg6: memref<512x256xbf16, #tpu.memory_space<vmem>>, %arg7: memref<256x256xbf16, #tpu.memory_space<vmem>>, %arg8: memref<256x256xbf16, #tpu.memory_space<vmem>>, %arg9: memref<256x640xbf16, #tpu.memory_space<vmem>>, %arg10: memref<1x8320xf32, #tpu.memory_space<vmem>>, %arg11: memref<16x640xf32, #tpu.memory_space<vmem>>) attributes {dimension_semantics = [#tpu.dimension_semantics<arbitrary>], iteration_bounds = array<i64: 1>, scalar_prefetch = 0 : i64, scratch_operands = 0 : i64, tpu.core_type = #tpu.core_type<tc>, window_params = [{transform_indices = @transform_0, window_bounds = array<i64: 16, 32>}, {pipeline_mode = #tpu.pipeline_mode<synchronous>, transform_indices = @transform_1, window_bounds = array<i64: 32, 256>}, {pipeline_mode = #tpu.pipeline_mode<synchronous>, transform_indices = @transform_2, window_bounds = array<i64: 256, 512>}, {pipeline_mode = #tpu.pipeline_mode<synchronous>, transform_indices = @transform_3, window_bounds = array<i64: 512, 512>}, {pipeline_mode = #tpu.pipeline_mode<synchronous>, transform_indices = @transform_4, window_bounds = array<i64: 512, 512>}, {pipeline_mode = #tpu.pipeline_mode<synchronous>, transform_indices = @transform_5, window_bounds = array<i64: 512, 256>}, {pipeline_mode = #tpu.pipeline_mode<synchronous>, transform_indices = @transform_6, window_bounds = array<i64: 256, 256>}, {pipeline_mode = #tpu.pipeline_mode<synchronous>, transform_indices = @transform_7, window_bounds = array<i64: 256, 256>}, {pipeline_mode = #tpu.pipeline_mode<synchronous>, transform_indices = @transform_8, window_bounds = array<i64: 256, 640>}, {pipeline_mode = #tpu.pipeline_mode<synchronous>, transform_indices = @transform_9, window_bounds = array<i64: 1, 8320>}, {transform_indices = @transform_10, window_bounds = array<i64: 16, 640>}]} {
    %c0 = arith.constant 0 : index
    %c0_0 = arith.constant 0 : index
    %0 = vector.load %arg1[%c0, %c0_0] : memref<16x32xf32, #tpu.memory_space<vmem>>, vector<16x32xf32>
    %c0_1 = arith.constant 0 : index
    %c0_2 = arith.constant 0 : index
    %1 = vector.load %arg10[%c0_1, %c0_2] : memref<1x8320xf32, #tpu.memory_space<vmem>>, vector<1x256xf32>
    %2 = arith.truncf %0 : vector<16x32xf32> to vector<16x32xbf16>
    %c0_3 = arith.constant 0 : index
    %c0_4 = arith.constant 0 : index
    %3 = vector.load %arg2[%c0_3, %c0_4] : memref<32x256xbf16, #tpu.memory_space<vmem>>, vector<32x256xbf16>
    %cst = arith.constant dense<0.000000e+00> : vector<16x256xf32>
    %4 = tpu.matmul %2, %3, %cst {dimension_numbers = #tpu.dot_dimension_numbers<[1], [0], [0], [1], [0, 0, 1, 1], [], []>} : vector<16x32xbf16>, vector<32x256xbf16>, vector<16x256xf32> -> vector<16x256xf32>
    %5 = vector.broadcast %1 : vector<1x256xf32> to vector<16x256xf32>
    %6 = arith.addf %4, %5 : vector<16x256xf32>
    %c0_5 = arith.constant 0 : index
    %c256 = arith.constant 256 : index
    %7 = vector.load %arg10[%c0_5, %c256] : memref<1x8320xf32, #tpu.memory_space<vmem>>, vector<1x256xf32>
    %c0_6 = arith.constant 0 : index
    %c512 = arith.constant 512 : index
    %8 = vector.load %arg10[%c0_6, %c512] : memref<1x8320xf32, #tpu.memory_space<vmem>>, vector<1x256xf32>
    %cst_7 = arith.constant dense<0.000000e+00> : vector<16xf32>
    %9 = vector.multi_reduction <add>, %6, %cst_7 [1] : vector<16x256xf32> to vector<16xf32>
    %10 = vector.shape_cast %9 : vector<16xf32> to vector<16x1xf32>
    %cst_8 = arith.constant 2.560000e+02 : f32
    %11 = vector.broadcast %cst_8 : f32 to vector<16x1xf32>
    %12 = arith.divf %10, %11 : vector<16x1xf32>
    %13 = arith.mulf %6, %6 : vector<16x256xf32>
    %cst_9 = arith.constant dense<0.000000e+00> : vector<16xf32>
    %14 = vector.multi_reduction <add>, %13, %cst_9 [1] : vector<16x256xf32> to vector<16xf32>
    %15 = vector.shape_cast %14 : vector<16xf32> to vector<16x1xf32>
    %cst_10 = arith.constant 2.560000e+02 : f32
    %16 = vector.broadcast %cst_10 : f32 to vector<16x1xf32>
    %17 = arith.divf %15, %16 : vector<16x1xf32>
    %18 = arith.mulf %12, %12 : vector<16x1xf32>
    %19 = arith.subf %17, %18 : vector<16x1xf32>
    %20 = vector.broadcast %12 : vector<16x1xf32> to vector<16x256xf32>
    %21 = arith.subf %6, %20 : vector<16x256xf32>
    %cst_11 = arith.constant 9.99999974E-6 : f32
    %22 = vector.broadcast %cst_11 : f32 to vector<16x1xf32>
    %23 = arith.addf %19, %22 : vector<16x1xf32>
    %24 = math.rsqrt %23 : vector<16x1xf32>
    %25 = vector.broadcast %24 : vector<16x1xf32> to vector<16x256xf32>
    %26 = vector.broadcast %7 : vector<1x256xf32> to vector<16x256xf32>
    %27 = arith.mulf %25, %26 : vector<16x256xf32>
    %28 = arith.mulf %21, %27 : vector<16x256xf32>
    %29 = vector.broadcast %8 : vector<1x256xf32> to vector<16x256xf32>
    %30 = arith.addf %28, %29 : vector<16x256xf32>
    %31 = math.absf %30 : vector<16x256xf32>
    %cst_12 = arith.constant 0.000000e+00 : f32
    %32 = vector.broadcast %cst_12 : f32 to vector<16x256xf32>
    %33 = arith.subf %32, %31 : vector<16x256xf32>
    %34 = math.exp %33 : vector<16x256xf32>
    %cst_13 = arith.constant 1.000000e+00 : f32
    %35 = vector.broadcast %cst_13 : f32 to vector<16x256xf32>
    %36 = arith.addf %35, %34 : vector<16x256xf32>
    %37 = tpu.reciprocal %36 {approx = true} : vector<16x256xf32> -> vector<16x256xf32>
    %cst_14 = arith.constant 1.000000e+00 : f32
    %38 = vector.broadcast %cst_14 : f32 to vector<16x256xf32>
    %39 = arith.minimumf %37, %38 : vector<16x256xf32>
    %cst_15 = arith.constant 0.000000e+00 : f32
    %40 = vector.broadcast %cst_15 : f32 to vector<16x256xf32>
    %41 = arith.cmpf oge, %30, %40 : vector<16x256xf32>
    %cst_16 = arith.constant 1.000000e+00 : f32
    %42 = vector.broadcast %cst_16 : f32 to vector<16x256xf32>
    %43 = arith.subf %42, %39 : vector<16x256xf32>
    %44 = arith.select %41, %39, %43 : vector<16x256xi1>, vector<16x256xf32>
    %45 = arith.mulf %30, %44 : vector<16x256xf32>
    %c0_17 = arith.constant 0 : index
    %c768 = arith.constant 768 : index
    %46 = vector.load %arg10[%c0_17, %c768] : memref<1x8320xf32, #tpu.memory_space<vmem>>, vector<1x512xf32>
    %47 = arith.truncf %45 : vector<16x256xf32> to vector<16x256xbf16>
    %c0_18 = arith.constant 0 : index
    %c0_19 = arith.constant 0 : index
    %48 = vector.load %arg3[%c0_18, %c0_19] : memref<256x512xbf16, #tpu.memory_space<vmem>>, vector<256x512xbf16>
    %cst_20 = arith.constant dense<0.000000e+00> : vector<16x512xf32>
    %49 = tpu.matmul %47, %48, %cst_20 {dimension_numbers = #tpu.dot_dimension_numbers<[1], [0], [0], [1], [0, 0, 1, 1], [], []>} : vector<16x256xbf16>, vector<256x512xbf16>, vector<16x512xf32> -> vector<16x512xf32>
    %50 = vector.broadcast %46 : vector<1x512xf32> to vector<16x512xf32>
    %51 = arith.addf %49, %50 : vector<16x512xf32>
    %c0_21 = arith.constant 0 : index
    %c1280 = arith.constant 1280 : index
    %52 = vector.load %arg10[%c0_21, %c1280] : memref<1x8320xf32, #tpu.memory_space<vmem>>, vector<1x512xf32>
    %c0_22 = arith.constant 0 : index
    %c1792 = arith.constant 1792 : index
    %53 = vector.load %arg10[%c0_22, %c1792] : memref<1x8320xf32, #tpu.memory_space<vmem>>, vector<1x512xf32>
    %cst_23 = arith.constant dense<0.000000e+00> : vector<16xf32>
    %54 = vector.multi_reduction <add>, %51, %cst_23 [1] : vector<16x512xf32> to vector<16xf32>
    %55 = vector.shape_cast %54 : vector<16xf32> to vector<16x1xf32>
    %cst_24 = arith.constant 5.120000e+02 : f32
    %56 = vector.broadcast %cst_24 : f32 to vector<16x1xf32>
    %57 = arith.divf %55, %56 : vector<16x1xf32>
    %58 = arith.mulf %51, %51 : vector<16x512xf32>
    %cst_25 = arith.constant dense<0.000000e+00> : vector<16xf32>
    %59 = vector.multi_reduction <add>, %58, %cst_25 [1] : vector<16x512xf32> to vector<16xf32>
    %60 = vector.shape_cast %59 : vector<16xf32> to vector<16x1xf32>
    %cst_26 = arith.constant 5.120000e+02 : f32
    %61 = vector.broadcast %cst_26 : f32 to vector<16x1xf32>
    %62 = arith.divf %60, %61 : vector<16x1xf32>
    %63 = arith.mulf %57, %57 : vector<16x1xf32>
    %64 = arith.subf %62, %63 : vector<16x1xf32>
    %65 = vector.broadcast %57 : vector<16x1xf32> to vector<16x512xf32>
    %66 = arith.subf %51, %65 : vector<16x512xf32>
    %cst_27 = arith.constant 9.99999974E-6 : f32
    %67 = vector.broadcast %cst_27 : f32 to vector<16x1xf32>
    %68 = arith.addf %64, %67 : vector<16x1xf32>
    %69 = math.rsqrt %68 : vector<16x1xf32>
    %70 = vector.broadcast %69 : vector<16x1xf32> to vector<16x512xf32>
    %71 = vector.broadcast %52 : vector<1x512xf32> to vector<16x512xf32>
    %72 = arith.mulf %70, %71 : vector<16x512xf32>
    %73 = arith.mulf %66, %72 : vector<16x512xf32>
    %74 = vector.broadcast %53 : vector<1x512xf32> to vector<16x512xf32>
    %75 = arith.addf %73, %74 : vector<16x512xf32>
    %76 = math.absf %75 : vector<16x512xf32>
    %cst_28 = arith.constant 0.000000e+00 : f32
    %77 = vector.broadcast %cst_28 : f32 to vector<16x512xf32>
    %78 = arith.subf %77, %76 : vector<16x512xf32>
    %79 = math.exp %78 : vector<16x512xf32>
    %cst_29 = arith.constant 1.000000e+00 : f32
    %80 = vector.broadcast %cst_29 : f32 to vector<16x512xf32>
    %81 = arith.addf %80, %79 : vector<16x512xf32>
    %82 = tpu.reciprocal %81 {approx = true} : vector<16x512xf32> -> vector<16x512xf32>
    %cst_30 = arith.constant 1.000000e+00 : f32
    %83 = vector.broadcast %cst_30 : f32 to vector<16x512xf32>
    %84 = arith.minimumf %82, %83 : vector<16x512xf32>
    %cst_31 = arith.constant 0.000000e+00 : f32
    %85 = vector.broadcast %cst_31 : f32 to vector<16x512xf32>
    %86 = arith.cmpf oge, %75, %85 : vector<16x512xf32>
    %cst_32 = arith.constant 1.000000e+00 : f32
    %87 = vector.broadcast %cst_32 : f32 to vector<16x512xf32>
    %88 = arith.subf %87, %84 : vector<16x512xf32>
    %89 = arith.select %86, %84, %88 : vector<16x512xi1>, vector<16x512xf32>
    %90 = arith.mulf %75, %89 : vector<16x512xf32>
    %c0_33 = arith.constant 0 : index
    %c2304 = arith.constant 2304 : index
    %91 = vector.load %arg10[%c0_33, %c2304] : memref<1x8320xf32, #tpu.memory_space<vmem>>, vector<1x512xf32>
    %92 = arith.truncf %90 : vector<16x512xf32> to vector<16x512xbf16>
    %c0_34 = arith.constant 0 : index
    %c0_35 = arith.constant 0 : index
    %93 = vector.load %arg4[%c0_34, %c0_35] : memref<512x512xbf16, #tpu.memory_space<vmem>>, vector<512x512xbf16>
    %cst_36 = arith.constant dense<0.000000e+00> : vector<16x512xf32>
    %94 = tpu.matmul %92, %93, %cst_36 {dimension_numbers = #tpu.dot_dimension_numbers<[1], [0], [0], [1], [0, 0, 1, 1], [], []>} : vector<16x512xbf16>, vector<512x512xbf16>, vector<16x512xf32> -> vector<16x512xf32>
    %95 = vector.broadcast %91 : vector<1x512xf32> to vector<16x512xf32>
    %96 = arith.addf %94, %95 : vector<16x512xf32>
    %c0_37 = arith.constant 0 : index
    %c2816 = arith.constant 2816 : index
    %97 = vector.load %arg10[%c0_37, %c2816] : memref<1x8320xf32, #tpu.memory_space<vmem>>, vector<1x512xf32>
    %c0_38 = arith.constant 0 : index
    %c3328 = arith.constant 3328 : index
    %98 = vector.load %arg10[%c0_38, %c3328] : memref<1x8320xf32, #tpu.memory_space<vmem>>, vector<1x512xf32>
    %cst_39 = arith.constant dense<0.000000e+00> : vector<16xf32>
    %99 = vector.multi_reduction <add>, %96, %cst_39 [1] : vector<16x512xf32> to vector<16xf32>
    %100 = vector.shape_cast %99 : vector<16xf32> to vector<16x1xf32>
    %cst_40 = arith.constant 5.120000e+02 : f32
    %101 = vector.broadcast %cst_40 : f32 to vector<16x1xf32>
    %102 = arith.divf %100, %101 : vector<16x1xf32>
    %103 = arith.mulf %96, %96 : vector<16x512xf32>
    %cst_41 = arith.constant dense<0.000000e+00> : vector<16xf32>
    %104 = vector.multi_reduction <add>, %103, %cst_41 [1] : vector<16x512xf32> to vector<16xf32>
    %105 = vector.shape_cast %104 : vector<16xf32> to vector<16x1xf32>
    %cst_42 = arith.constant 5.120000e+02 : f32
    %106 = vector.broadcast %cst_42 : f32 to vector<16x1xf32>
    %107 = arith.divf %105, %106 : vector<16x1xf32>
    %108 = arith.mulf %102, %102 : vector<16x1xf32>
    %109 = arith.subf %107, %108 : vector<16x1xf32>
    %110 = vector.broadcast %102 : vector<16x1xf32> to vector<16x512xf32>
    %111 = arith.subf %96, %110 : vector<16x512xf32>
    %cst_43 = arith.constant 9.99999974E-6 : f32
    %112 = vector.broadcast %cst_43 : f32 to vector<16x1xf32>
    %113 = arith.addf %109, %112 : vector<16x1xf32>
    %114 = math.rsqrt %113 : vector<16x1xf32>
    %115 = vector.broadcast %114 : vector<16x1xf32> to vector<16x512xf32>
    %116 = vector.broadcast %97 : vector<1x512xf32> to vector<16x512xf32>
    %117 = arith.mulf %115, %116 : vector<16x512xf32>
    %118 = arith.mulf %111, %117 : vector<16x512xf32>
    %119 = vector.broadcast %98 : vector<1x512xf32> to vector<16x512xf32>
    %120 = arith.addf %118, %119 : vector<16x512xf32>
    %cst_44 = arith.constant 0.000000e+00 : f32
    %121 = vector.broadcast %cst_44 : f32 to vector<16x512xf32>
    %122 = arith.cmpf ogt, %120, %121 : vector<16x512xf32>
    %cst_45 = arith.constant 0.00999999977 : f32
    %123 = vector.broadcast %cst_45 : f32 to vector<16x512xf32>
    %124 = arith.mulf %123, %120 : vector<16x512xf32>
    %125 = arith.select %122, %120, %124 : vector<16x512xi1>, vector<16x512xf32>
    %c0_46 = arith.constant 0 : index
    %c3840 = arith.constant 3840 : index
    %126 = vector.load %arg10[%c0_46, %c3840] : memref<1x8320xf32, #tpu.memory_space<vmem>>, vector<1x512xf32>
    %127 = arith.truncf %125 : vector<16x512xf32> to vector<16x512xbf16>
    %c0_47 = arith.constant 0 : index
    %c0_48 = arith.constant 0 : index
    %128 = vector.load %arg5[%c0_47, %c0_48] : memref<512x512xbf16, #tpu.memory_space<vmem>>, vector<512x512xbf16>
    %cst_49 = arith.constant dense<0.000000e+00> : vector<16x512xf32>
    %129 = tpu.matmul %127, %128, %cst_49 {dimension_numbers = #tpu.dot_dimension_numbers<[1], [0], [0], [1], [0, 0, 1, 1], [], []>} : vector<16x512xbf16>, vector<512x512xbf16>, vector<16x512xf32> -> vector<16x512xf32>
    %130 = vector.broadcast %126 : vector<1x512xf32> to vector<16x512xf32>
    %131 = arith.addf %129, %130 : vector<16x512xf32>
    %c0_50 = arith.constant 0 : index
    %c4352 = arith.constant 4352 : index
    %132 = vector.load %arg10[%c0_50, %c4352] : memref<1x8320xf32, #tpu.memory_space<vmem>>, vector<1x512xf32>
    %c0_51 = arith.constant 0 : index
    %c4864 = arith.constant 4864 : index
    %133 = vector.load %arg10[%c0_51, %c4864] : memref<1x8320xf32, #tpu.memory_space<vmem>>, vector<1x512xf32>
    %cst_52 = arith.constant dense<0.000000e+00> : vector<16xf32>
    %134 = vector.multi_reduction <add>, %131, %cst_52 [1] : vector<16x512xf32> to vector<16xf32>
    %135 = vector.shape_cast %134 : vector<16xf32> to vector<16x1xf32>
    %cst_53 = arith.constant 5.120000e+02 : f32
    %136 = vector.broadcast %cst_53 : f32 to vector<16x1xf32>
    %137 = arith.divf %135, %136 : vector<16x1xf32>
    %138 = arith.mulf %131, %131 : vector<16x512xf32>
    %cst_54 = arith.constant dense<0.000000e+00> : vector<16xf32>
    %139 = vector.multi_reduction <add>, %138, %cst_54 [1] : vector<16x512xf32> to vector<16xf32>
    %140 = vector.shape_cast %139 : vector<16xf32> to vector<16x1xf32>
    %cst_55 = arith.constant 5.120000e+02 : f32
    %141 = vector.broadcast %cst_55 : f32 to vector<16x1xf32>
    %142 = arith.divf %140, %141 : vector<16x1xf32>
    %143 = arith.mulf %137, %137 : vector<16x1xf32>
    %144 = arith.subf %142, %143 : vector<16x1xf32>
    %145 = vector.broadcast %137 : vector<16x1xf32> to vector<16x512xf32>
    %146 = arith.subf %131, %145 : vector<16x512xf32>
    %cst_56 = arith.constant 9.99999974E-6 : f32
    %147 = vector.broadcast %cst_56 : f32 to vector<16x1xf32>
    %148 = arith.addf %144, %147 : vector<16x1xf32>
    %149 = math.rsqrt %148 : vector<16x1xf32>
    %150 = vector.broadcast %149 : vector<16x1xf32> to vector<16x512xf32>
    %151 = vector.broadcast %132 : vector<1x512xf32> to vector<16x512xf32>
    %152 = arith.mulf %150, %151 : vector<16x512xf32>
    %153 = arith.mulf %146, %152 : vector<16x512xf32>
    %154 = vector.broadcast %133 : vector<1x512xf32> to vector<16x512xf32>
    %155 = arith.addf %153, %154 : vector<16x512xf32>
    %156 = arith.addf %90, %155 : vector<16x512xf32>
    %c0_57 = arith.constant 0 : index
    %c5376 = arith.constant 5376 : index
    %157 = vector.load %arg10[%c0_57, %c5376] : memref<1x8320xf32, #tpu.memory_space<vmem>>, vector<1x256xf32>
    %158 = arith.truncf %156 : vector<16x512xf32> to vector<16x512xbf16>
    %c0_58 = arith.constant 0 : index
    %c0_59 = arith.constant 0 : index
    %159 = vector.load %arg6[%c0_58, %c0_59] : memref<512x256xbf16, #tpu.memory_space<vmem>>, vector<512x256xbf16>
    %cst_60 = arith.constant dense<0.000000e+00> : vector<16x256xf32>
    %160 = tpu.matmul %158, %159, %cst_60 {dimension_numbers = #tpu.dot_dimension_numbers<[1], [0], [0], [1], [0, 0, 1, 1], [], []>} : vector<16x512xbf16>, vector<512x256xbf16>, vector<16x256xf32> -> vector<16x256xf32>
    %161 = vector.broadcast %157 : vector<1x256xf32> to vector<16x256xf32>
    %162 = arith.addf %160, %161 : vector<16x256xf32>
    %c0_61 = arith.constant 0 : index
    %c5632 = arith.constant 5632 : index
    %163 = vector.load %arg10[%c0_61, %c5632] : memref<1x8320xf32, #tpu.memory_space<vmem>>, vector<1x256xf32>
    %c0_62 = arith.constant 0 : index
    %c5888 = arith.constant 5888 : index
    %164 = vector.load %arg10[%c0_62, %c5888] : memref<1x8320xf32, #tpu.memory_space<vmem>>, vector<1x256xf32>
    %cst_63 = arith.constant dense<0.000000e+00> : vector<16xf32>
    %165 = vector.multi_reduction <add>, %162, %cst_63 [1] : vector<16x256xf32> to vector<16xf32>
    %166 = vector.shape_cast %165 : vector<16xf32> to vector<16x1xf32>
    %cst_64 = arith.constant 2.560000e+02 : f32
    %167 = vector.broadcast %cst_64 : f32 to vector<16x1xf32>
    %168 = arith.divf %166, %167 : vector<16x1xf32>
    %169 = arith.mulf %162, %162 : vector<16x256xf32>
    %cst_65 = arith.constant dense<0.000000e+00> : vector<16xf32>
    %170 = vector.multi_reduction <add>, %169, %cst_65 [1] : vector<16x256xf32> to vector<16xf32>
    %171 = vector.shape_cast %170 : vector<16xf32> to vector<16x1xf32>
    %cst_66 = arith.constant 2.560000e+02 : f32
    %172 = vector.broadcast %cst_66 : f32 to vector<16x1xf32>
    %173 = arith.divf %171, %172 : vector<16x1xf32>
    %174 = arith.mulf %168, %168 : vector<16x1xf32>
    %175 = arith.subf %173, %174 : vector<16x1xf32>
    %176 = vector.broadcast %168 : vector<16x1xf32> to vector<16x256xf32>
    %177 = arith.subf %162, %176 : vector<16x256xf32>
    %cst_67 = arith.constant 9.99999974E-6 : f32
    %178 = vector.broadcast %cst_67 : f32 to vector<16x1xf32>
    %179 = arith.addf %175, %178 : vector<16x1xf32>
    %180 = math.rsqrt %179 : vector<16x1xf32>
    %181 = vector.broadcast %180 : vector<16x1xf32> to vector<16x256xf32>
    %182 = vector.broadcast %163 : vector<1x256xf32> to vector<16x256xf32>
    %183 = arith.mulf %181, %182 : vector<16x256xf32>
    %184 = arith.mulf %177, %183 : vector<16x256xf32>
    %185 = vector.broadcast %164 : vector<1x256xf32> to vector<16x256xf32>
    %186 = arith.addf %184, %185 : vector<16x256xf32>
    %187 = math.absf %186 : vector<16x256xf32>
    %cst_68 = arith.constant 0.000000e+00 : f32
    %188 = vector.broadcast %cst_68 : f32 to vector<16x256xf32>
    %189 = arith.subf %188, %187 : vector<16x256xf32>
    %190 = math.exp %189 : vector<16x256xf32>
    %cst_69 = arith.constant 1.000000e+00 : f32
    %191 = vector.broadcast %cst_69 : f32 to vector<16x256xf32>
    %192 = arith.addf %191, %190 : vector<16x256xf32>
    %193 = tpu.reciprocal %192 {approx = true} : vector<16x256xf32> -> vector<16x256xf32>
    %cst_70 = arith.constant 1.000000e+00 : f32
    %194 = vector.broadcast %cst_70 : f32 to vector<16x256xf32>
    %195 = arith.minimumf %193, %194 : vector<16x256xf32>
    %cst_71 = arith.constant 0.000000e+00 : f32
    %196 = vector.broadcast %cst_71 : f32 to vector<16x256xf32>
    %197 = arith.cmpf oge, %186, %196 : vector<16x256xf32>
    %cst_72 = arith.constant 1.000000e+00 : f32
    %198 = vector.broadcast %cst_72 : f32 to vector<16x256xf32>
    %199 = arith.subf %198, %195 : vector<16x256xf32>
    %200 = arith.select %197, %195, %199 : vector<16x256xi1>, vector<16x256xf32>
    %201 = arith.mulf %186, %200 : vector<16x256xf32>
    %c0_73 = arith.constant 0 : index
    %c6144 = arith.constant 6144 : index
    %202 = vector.load %arg10[%c0_73, %c6144] : memref<1x8320xf32, #tpu.memory_space<vmem>>, vector<1x256xf32>
    %203 = arith.truncf %201 : vector<16x256xf32> to vector<16x256xbf16>
    %c0_74 = arith.constant 0 : index
    %c0_75 = arith.constant 0 : index
    %204 = vector.load %arg7[%c0_74, %c0_75] : memref<256x256xbf16, #tpu.memory_space<vmem>>, vector<256x256xbf16>
    %cst_76 = arith.constant dense<0.000000e+00> : vector<16x256xf32>
    %205 = tpu.matmul %203, %204, %cst_76 {dimension_numbers = #tpu.dot_dimension_numbers<[1], [0], [0], [1], [0, 0, 1, 1], [], []>} : vector<16x256xbf16>, vector<256x256xbf16>, vector<16x256xf32> -> vector<16x256xf32>
    %206 = vector.broadcast %202 : vector<1x256xf32> to vector<16x256xf32>
    %207 = arith.addf %205, %206 : vector<16x256xf32>
    %c0_77 = arith.constant 0 : index
    %c6400 = arith.constant 6400 : index
    %208 = vector.load %arg10[%c0_77, %c6400] : memref<1x8320xf32, #tpu.memory_space<vmem>>, vector<1x256xf32>
    %c0_78 = arith.constant 0 : index
    %c6656 = arith.constant 6656 : index
    %209 = vector.load %arg10[%c0_78, %c6656] : memref<1x8320xf32, #tpu.memory_space<vmem>>, vector<1x256xf32>
    %cst_79 = arith.constant dense<0.000000e+00> : vector<16xf32>
    %210 = vector.multi_reduction <add>, %207, %cst_79 [1] : vector<16x256xf32> to vector<16xf32>
    %211 = vector.shape_cast %210 : vector<16xf32> to vector<16x1xf32>
    %cst_80 = arith.constant 2.560000e+02 : f32
    %212 = vector.broadcast %cst_80 : f32 to vector<16x1xf32>
    %213 = arith.divf %211, %212 : vector<16x1xf32>
    %214 = arith.mulf %207, %207 : vector<16x256xf32>
    %cst_81 = arith.constant dense<0.000000e+00> : vector<16xf32>
    %215 = vector.multi_reduction <add>, %214, %cst_81 [1] : vector<16x256xf32> to vector<16xf32>
    %216 = vector.shape_cast %215 : vector<16xf32> to vector<16x1xf32>
    %cst_82 = arith.constant 2.560000e+02 : f32
    %217 = vector.broadcast %cst_82 : f32 to vector<16x1xf32>
    %218 = arith.divf %216, %217 : vector<16x1xf32>
    %219 = arith.mulf %213, %213 : vector<16x1xf32>
    %220 = arith.subf %218, %219 : vector<16x1xf32>
    %221 = vector.broadcast %213 : vector<16x1xf32> to vector<16x256xf32>
    %222 = arith.subf %207, %221 : vector<16x256xf32>
    %cst_83 = arith.constant 9.99999974E-6 : f32
    %223 = vector.broadcast %cst_83 : f32 to vector<16x1xf32>
    %224 = arith.addf %220, %223 : vector<16x1xf32>
    %225 = math.rsqrt %224 : vector<16x1xf32>
    %226 = vector.broadcast %225 : vector<16x1xf32> to vector<16x256xf32>
    %227 = vector.broadcast %208 : vector<1x256xf32> to vector<16x256xf32>
    %228 = arith.mulf %226, %227 : vector<16x256xf32>
    %229 = arith.mulf %222, %228 : vector<16x256xf32>
    %230 = vector.broadcast %209 : vector<1x256xf32> to vector<16x256xf32>
    %231 = arith.addf %229, %230 : vector<16x256xf32>
    %cst_84 = arith.constant 0.000000e+00 : f32
    %232 = vector.broadcast %cst_84 : f32 to vector<16x256xf32>
    %233 = arith.cmpf ogt, %231, %232 : vector<16x256xf32>
    %cst_85 = arith.constant 0.00999999977 : f32
    %234 = vector.broadcast %cst_85 : f32 to vector<16x256xf32>
    %235 = arith.mulf %234, %231 : vector<16x256xf32>
    %236 = arith.select %233, %231, %235 : vector<16x256xi1>, vector<16x256xf32>
    %c0_86 = arith.constant 0 : index
    %c6912 = arith.constant 6912 : index
    %237 = vector.load %arg10[%c0_86, %c6912] : memref<1x8320xf32, #tpu.memory_space<vmem>>, vector<1x256xf32>
    %238 = arith.truncf %236 : vector<16x256xf32> to vector<16x256xbf16>
    %c0_87 = arith.constant 0 : index
    %c0_88 = arith.constant 0 : index
    %239 = vector.load %arg8[%c0_87, %c0_88] : memref<256x256xbf16, #tpu.memory_space<vmem>>, vector<256x256xbf16>
    %cst_89 = arith.constant dense<0.000000e+00> : vector<16x256xf32>
    %240 = tpu.matmul %238, %239, %cst_89 {dimension_numbers = #tpu.dot_dimension_numbers<[1], [0], [0], [1], [0, 0, 1, 1], [], []>} : vector<16x256xbf16>, vector<256x256xbf16>, vector<16x256xf32> -> vector<16x256xf32>
    %241 = vector.broadcast %237 : vector<1x256xf32> to vector<16x256xf32>
    %242 = arith.addf %240, %241 : vector<16x256xf32>
    %c0_90 = arith.constant 0 : index
    %c7168 = arith.constant 7168 : index
    %243 = vector.load %arg10[%c0_90, %c7168] : memref<1x8320xf32, #tpu.memory_space<vmem>>, vector<1x256xf32>
    %c0_91 = arith.constant 0 : index
    %c7424 = arith.constant 7424 : index
    %244 = vector.load %arg10[%c0_91, %c7424] : memref<1x8320xf32, #tpu.memory_space<vmem>>, vector<1x256xf32>
    %cst_92 = arith.constant dense<0.000000e+00> : vector<16xf32>
    %245 = vector.multi_reduction <add>, %242, %cst_92 [1] : vector<16x256xf32> to vector<16xf32>
    %246 = vector.shape_cast %245 : vector<16xf32> to vector<16x1xf32>
    %cst_93 = arith.constant 2.560000e+02 : f32
    %247 = vector.broadcast %cst_93 : f32 to vector<16x1xf32>
    %248 = arith.divf %246, %247 : vector<16x1xf32>
    %249 = arith.mulf %242, %242 : vector<16x256xf32>
    %cst_94 = arith.constant dense<0.000000e+00> : vector<16xf32>
    %250 = vector.multi_reduction <add>, %249, %cst_94 [1] : vector<16x256xf32> to vector<16xf32>
    %251 = vector.shape_cast %250 : vector<16xf32> to vector<16x1xf32>
    %cst_95 = arith.constant 2.560000e+02 : f32
    %252 = vector.broadcast %cst_95 : f32 to vector<16x1xf32>
    %253 = arith.divf %251, %252 : vector<16x1xf32>
    %254 = arith.mulf %248, %248 : vector<16x1xf32>
    %255 = arith.subf %253, %254 : vector<16x1xf32>
    %256 = vector.broadcast %248 : vector<16x1xf32> to vector<16x256xf32>
    %257 = arith.subf %242, %256 : vector<16x256xf32>
    %cst_96 = arith.constant 9.99999974E-6 : f32
    %258 = vector.broadcast %cst_96 : f32 to vector<16x1xf32>
    %259 = arith.addf %255, %258 : vector<16x1xf32>
    %260 = math.rsqrt %259 : vector<16x1xf32>
    %261 = vector.broadcast %260 : vector<16x1xf32> to vector<16x256xf32>
    %262 = vector.broadcast %243 : vector<1x256xf32> to vector<16x256xf32>
    %263 = arith.mulf %261, %262 : vector<16x256xf32>
    %264 = arith.mulf %257, %263 : vector<16x256xf32>
    %265 = vector.broadcast %244 : vector<1x256xf32> to vector<16x256xf32>
    %266 = arith.addf %264, %265 : vector<16x256xf32>
    %267 = arith.addf %201, %266 : vector<16x256xf32>
    %c0_97 = arith.constant 0 : index
    %c7680 = arith.constant 7680 : index
    %268 = vector.load %arg10[%c0_97, %c7680] : memref<1x8320xf32, #tpu.memory_space<vmem>>, vector<1x640xf32>
    %269 = arith.truncf %267 : vector<16x256xf32> to vector<16x256xbf16>
    %c0_98 = arith.constant 0 : index
    %c0_99 = arith.constant 0 : index
    %270 = vector.load %arg9[%c0_98, %c0_99] : memref<256x640xbf16, #tpu.memory_space<vmem>>, vector<256x640xbf16>
    %cst_100 = arith.constant dense<0.000000e+00> : vector<16x640xf32>
    %271 = tpu.matmul %269, %270, %cst_100 {dimension_numbers = #tpu.dot_dimension_numbers<[1], [0], [0], [1], [0, 0, 1, 1], [], []>} : vector<16x256xbf16>, vector<256x640xbf16>, vector<16x640xf32> -> vector<16x640xf32>
    %272 = vector.broadcast %268 : vector<1x640xf32> to vector<16x640xf32>
    %273 = arith.addf %271, %272 : vector<16x640xf32>
    %274 = vector.extract_strided_slice %273 {offsets = [0, 0], sizes = [16, 256], strides = [1, 1]} : vector<16x640xf32> to vector<16x256xf32>
    %275 = math.absf %274 : vector<16x256xf32>
    %cst_101 = arith.constant 0.000000e+00 : f32
    %276 = vector.broadcast %cst_101 : f32 to vector<16x256xf32>
    %277 = arith.subf %276, %275 : vector<16x256xf32>
    %278 = math.exp %277 : vector<16x256xf32>
    %cst_102 = arith.constant 1.000000e+00 : f32
    %279 = vector.broadcast %cst_102 : f32 to vector<16x256xf32>
    %280 = arith.addf %279, %278 : vector<16x256xf32>
    %281 = tpu.reciprocal %280 {approx = true} : vector<16x256xf32> -> vector<16x256xf32>
    %cst_103 = arith.constant 1.000000e+00 : f32
    %282 = vector.broadcast %cst_103 : f32 to vector<16x256xf32>
    %283 = arith.minimumf %281, %282 : vector<16x256xf32>
    %cst_104 = arith.constant 0.000000e+00 : f32
    %284 = vector.broadcast %cst_104 : f32 to vector<16x256xf32>
    %285 = arith.cmpf oge, %274, %284 : vector<16x256xf32>
    %cst_105 = arith.constant 1.000000e+00 : f32
    %286 = vector.broadcast %cst_105 : f32 to vector<16x256xf32>
    %287 = arith.subf %286, %283 : vector<16x256xf32>
    %288 = arith.select %285, %283, %287 : vector<16x256xi1>, vector<16x256xf32>
    %c0_106 = arith.constant 0 : index
    %c0_107 = arith.constant 0 : index
    %289 = vector.load %arg11[%c0_106, %c0_107] : memref<16x640xf32, #tpu.memory_space<vmem>>, vector<16x256xf32>
    tpu.vector_store %arg11[%c0_106, %c0_107], %288 {strides = array<i32>} : memref<16x640xf32, #tpu.memory_space<vmem>>, vector<16x256xf32>,
    %290 = vector.extract_strided_slice %273 {offsets = [0, 256], sizes = [16, 384], strides = [1, 1]} : vector<16x640xf32> to vector<16x384xf32>
    %c0_108 = arith.constant 0 : index
    %c256_109 = arith.constant 256 : index
    %291 = vector.load %arg11[%c0_108, %c256_109] : memref<16x640xf32, #tpu.memory_space<vmem>>, vector<16x384xf32>
    tpu.vector_store %arg11[%c0_108, %c256_109], %290 {strides = array<i32>} : memref<16x640xf32, #tpu.memory_space<vmem>>, vector<16x384xf32>,
    return
  }
  func.func @transform_0(%arg0: i32) -> (i32, i32) {
    %c0_i32 = arith.constant 0 : i32
    %c0_i32_0 = arith.constant 0 : i32
    return %arg0, %c0_i32 : i32, i32
  }
  func.func @transform_1(%arg0: i32) -> (i32, i32) {
    %c0_i32 = arith.constant 0 : i32
    %c0_i32_0 = arith.constant 0 : i32
    %c0_i32_1 = arith.constant 0 : i32
    return %c0_i32, %c0_i32_0 : i32, i32
  }
  func.func @transform_2(%arg0: i32) -> (i32, i32) {
    %c0_i32 = arith.constant 0 : i32
    %c0_i32_0 = arith.constant 0 : i32
    %c0_i32_1 = arith.constant 0 : i32
    return %c0_i32, %c0_i32_0 : i32, i32
  }
  func.func @transform_3(%arg0: i32) -> (i32, i32) {
    %c0_i32 = arith.constant 0 : i32
    %c0_i32_0 = arith.constant 0 : i32
    %c0_i32_1 = arith.constant 0 : i32
    return %c0_i32, %c0_i32_0 : i32, i32
  }
  func.func @transform_4(%arg0: i32) -> (i32, i32) {
    %c0_i32 = arith.constant 0 : i32
    %c0_i32_0 = arith.constant 0 : i32
    %c0_i32_1 = arith.constant 0 : i32
    return %c0_i32, %c0_i32_0 : i32, i32
  }
  func.func @transform_5(%arg0: i32) -> (i32, i32) {
    %c0_i32 = arith.constant 0 : i32
    %c0_i32_0 = arith.constant 0 : i32
    %c0_i32_1 = arith.constant 0 : i32
    return %c0_i32, %c0_i32_0 : i32, i32
  }
  func.func @transform_6(%arg0: i32) -> (i32, i32) {
    %c0_i32 = arith.constant 0 : i32
    %c0_i32_0 = arith.constant 0 : i32
    %c0_i32_1 = arith.constant 0 : i32
    return %c0_i32, %c0_i32_0 : i32, i32
  }
  func.func @transform_7(%arg0: i32) -> (i32, i32) {
    %c0_i32 = arith.constant 0 : i32
    %c0_i32_0 = arith.constant 0 : i32
    %c0_i32_1 = arith.constant 0 : i32
    return %c0_i32, %c0_i32_0 : i32, i32
  }
  func.func @transform_8(%arg0: i32) -> (i32, i32) {
    %c0_i32 = arith.constant 0 : i32
    %c0_i32_0 = arith.constant 0 : i32
    %c0_i32_1 = arith.constant 0 : i32
    return %c0_i32, %c0_i32_0 : i32, i32
  }
  func.func @transform_9(%arg0: i32) -> (i32, i32) {
    %c0_i32 = arith.constant 0 : i32
    %c0_i32_0 = arith.constant 0 : i32
    %c0_i32_1 = arith.constant 0 : i32
    return %c0_i32, %c0_i32_0 : i32, i32
  }
  func.func @transform_10(%arg0: i32) -> (i32, i32) {
    %c0_i32 = arith.constant 0 : i32
    %c0_i32_0 = arith.constant 0 : i32
    return %arg0, %c0_i32 : i32, i32
  }
}

</mosaic_0001>

<bundles_post_ra>
// kernel: tpu_custom_call.1
= control target key start
LH: loop header
LB: loop body
LE: loop exit
PB: predicated region body
PF: predicated region fallthrough
CT: control target
= control target key end

     0   :  { %15 = vsyncpa [#allocation3], 0  ;;  %s7690_s0 = inlined_call_operand.hbm [shape: f32[16,32], index: 0, kind: input, shape index: {}]   ;;  %s7691_s1 = inlined_call_operand.hbm [shape: bf16[32,256], index: 1, kind: input, shape index: {}]   ;;  %s7692_s2 = inlined_call_operand.hbm [shape: bf16[256,512], index: 2, kind: input, shape index: {}]   ;;  %s7693_s3 = inlined_call_operand.hbm [shape: bf16[512,512], index: 3, kind: input, shape index: {}]   ;;  %s7694_s4 = inlined_call_operand.hbm [shape: bf16[512,512], index: 4, kind: input, shape index: {}]   ;;  %s7695_s5 = inlined_call_operand.hbm [shape: bf16[512,256], index: 5, kind: input, shape index: {}]   ;;  %s7696_s6 = inlined_call_operand.hbm [shape: bf16[256,256], index: 6, kind: input, shape index: {}]   ;;  %s7697_s7 = inlined_call_operand.hbm [shape: bf16[256,256], index: 7, kind: input, shape index: {}]   ;;  %s7698_s8 = inlined_call_operand.hbm [shape: bf16[256,640], index: 8, kind: input, shape index: {}]   ;;  %s7699_s9 = inlined_call_operand.hbm [shape: f32[1,8320], index: 9, kind: input, shape index: {}]   ;;  %s7700_s10 = inlined_call_operand.hbm [shape: f32[16,640], index: 10, kind: output, shape index: {}]  }
   0x1   :  { %16 = vsyncpa [#allocation6], 0 }
   0x2   :  { %17 = vsyncpa [#allocation9], 0 }
   0x3   :  { %18 = vsyncpa [#allocation12], 0 }
   0x4   :  { %19 = vsyncpa [#allocation15], 0 }
   0x5   :  { %20 = vsyncpa [#allocation18], 0 }
   0x6   :  { %21 = vsyncpa [#allocation4], 0  ;;  %s7022_s13 = smov [#allocation5]   ;;  %s6766_s17 = scalar_lea.hbm %s7691_s1, 512 }
   0x7   :  { %s39_s14 = sshll.u32 %s7022_s13, 4  ;;  %p6767_p0 = scmp.ne.s32.totalorder %s7691_s1, %s6766_s17  ;;  %s40_s14 = int_to_ptr.vmem [resolvable:$true] %s39_s14 }
   0x8   :  { %p6770_p1 = scmp.lt.u32.totalorder %s6766_s17, %s7691_s1 }
   0xa   :  { %p6772_p2 = pnand %p6770_p1, %p6767_p0 }
   0xc   :  { %6775 = shalt.err (!%p6772_p2)
}
   0xd   :  { %s6776_s22 = scalar_lea.vmem %s40_s14, 512  ;;  %p6781_p4 = scmp.lt.s32.totalorder %s40_s14, %s40_s14 }
   0xe   :  { %p6777_p3 = scmp.ne.s32.totalorder %s40_s14, %s6776_s22  ;;  %p6782_p5 = scmp.lt.s32.totalorder %s6776_s22, %s6776_s22 }
  0x10   :  { %p6783_p6 = por %p6782_p5, %p6781_p4 }
  0x12   :  { %p6784_p7 = pnand %p6783_p6, %p6777_p3 }
  0x14   :  { %6787 = shalt.err (!%p6784_p7)
}
  0x15   :  { %s7023_s23 = smov 128   ;;  %s7024_s24 = smov 8  }
  0x16   :  { %45 = dma.hbm_to_vmem [thread:$0]  %s7691_s1, 512, %s40_s14, [#allocation6], %s7023_s23, %s7023_s23, %s7024_s24  }
  0x17   :  { %s7025_s27 = smov [#allocation8]   ;;  %s7026_s29 = smov [#allocation11]  }
  0x18   :  { %s63_s28 = sshll.u32 %s7025_s27, 4  ;;  %s87_s30 = sshll.u32 %s7026_s29, 4  ;;  %s64_s28 = int_to_ptr.vmem [resolvable:$true] %s63_s28  ;;  %s88_s30 = int_to_ptr.vmem [resolvable:$true] %s87_s30 }
  0x19   :  { %s6788_s13 = scalar_lea.hbm %s7693_s3, 16384 }
  0x1a   :  { %p6789_p8 = scmp.ne.s32.totalorder %s7693_s3, %s6788_s13  ;;  %p6792_p9 = scmp.lt.u32.totalorder %s6788_s13, %s7693_s3 }
  0x1c   :  { %p6794_p10 = pnand %p6792_p9, %p6789_p8 }
  0x1e   :  { %6797 = shalt.err (!%p6794_p10)
}
  0x1f   :  { %s6798_s1 = scalar_lea.vmem %s64_s28, 16384  ;;  %p6803_p12 = scmp.lt.s32.totalorder %s64_s28, %s64_s28 }
  0x20   :  { %p6799_p11 = scmp.ne.s32.totalorder %s64_s28, %s6798_s1  ;;  %p6804_p13 = scmp.lt.s32.totalorder %s6798_s1, %s6798_s1 }
  0x22   :  { %p6805_p0 = por %p6804_p13, %p6803_p12 }
  0x24   :  { %p6806_p1 = pnand %p6805_p0, %p6799_p11 }
  0x26   :  { %6809 = shalt.err (!%p6806_p1)
}
  0x27   :  { %s7027_s14 = smov 256   ;;  %s7028_s19 = smov 16  }
  0x28   :  { %69 = dma.hbm_to_vmem [thread:$0]  %s7693_s3, 16384, %s64_s28, [#allocation9], %s7027_s14, %s7027_s14, %s7028_s19  }
  0x29   :  { %s6810_s26 = scalar_lea.hbm %s7695_s5, 8192 }
  0x2a   :  { %p6811_p2 = scmp.ne.s32.totalorder %s7695_s5, %s6810_s26  ;;  %p6814_p3 = scmp.lt.u32.totalorder %s6810_s26, %s7695_s5 }
  0x2c   :  { %p6816_p4 = pnand %p6814_p3, %p6811_p2 }
  0x2e   :  { %6819 = shalt.err (!%p6816_p4)
}
  0x2f   :  { %s6820_s13 = scalar_lea.vmem %s88_s30, 8192  ;;  %p6825_p6 = scmp.lt.s32.totalorder %s88_s30, %s88_s30 }
  0x30   :  { %p6821_p5 = scmp.ne.s32.totalorder %s88_s30, %s6820_s13  ;;  %p6826_p7 = scmp.lt.s32.totalorder %s6820_s13, %s6820_s13 }
  0x32   :  { %p6827_p8 = por %p6826_p7, %p6825_p6 }
  0x34   :  { %p6828_p9 = pnand %p6827_p8, %p6821_p5 }
  0x36   :  { %6831 = shalt.err (!%p6828_p9)
}
  0x37   :  { %93 = dma.hbm_to_vmem [thread:$0]  %s7695_s5, 8192, %s88_s30, [#allocation12], %s7023_s23, %s7023_s23, %s7024_s24  }
  0x38   :  { %s7029_s15 = smov [#allocation14]   ;;  %s7030_s17 = smov [#allocation2]  }
  0x39   :  { %s111_s16 = sshll.u32 %s7029_s15, 4  ;;  %s27_s18 = sshll.u32 %s7030_s17, 4  ;;  %s112_s16 = int_to_ptr.vmem [resolvable:$true] %s111_s16  ;;  %s28_s18 = int_to_ptr.vmem [resolvable:$true] %s27_s18 }
  0x3a   :  { %s6832_s21 = scalar_lea.hbm %s7697_s7, 4096 }
  0x3b   :  { %p6833_p10 = scmp.ne.s32.totalorder %s7697_s7, %s6832_s21  ;;  %p6836_p11 = scmp.lt.u32.totalorder %s6832_s21, %s7697_s7 }
  0x3d   :  { %p6838_p12 = pnand %p6836_p11, %p6833_p10 }
  0x3f   :  { %6841 = shalt.err (!%p6838_p12)
}
  0x40   :  { %s6842_s5 = scalar_lea.vmem %s112_s16, 4096  ;;  %p6847_p0 = scmp.lt.s32.totalorder %s112_s16, %s112_s16 }
  0x41   :  { %p6843_p13 = scmp.ne.s32.totalorder %s112_s16, %s6842_s5  ;;  %p6848_p1 = scmp.lt.s32.totalorder %s6842_s5, %s6842_s5 }
  0x43   :  { %p6849_p2 = por %p6848_p1, %p6847_p0 }
  0x45   :  { %p6850_p3 = pnand %p6849_p2, %p6843_p13 }
  0x47   :  { %6853 = shalt.err (!%p6850_p3)
}
  0x48   :  { %117 = dma.hbm_to_vmem [thread:$0]  %s7697_s7, 4096, %s112_s16, [#allocation15], %s7023_s23, %s7023_s23, %s7024_s24  }
  0x49   :  { %s6854_s13 = scalar_lea.hbm %s7690_s0, 256 }
  0x4a   :  { %p6855_p4 = scmp.ne.s32.totalorder %s7690_s0, %s6854_s13  ;;  %p6858_p5 = scmp.lt.u32.totalorder %s6854_s13, %s7690_s0 }
  0x4c   :  { %p6860_p6 = pnand %p6858_p5, %p6855_p4 }
  0x4e   :  { %6863 = shalt.err (!%p6860_p6)
}
  0x4f   :  { %s6864_s1 = scalar_lea.vmem %s28_s18, 256  ;;  %p6869_p8 = scmp.lt.s32.totalorder %s28_s18, %s28_s18 }
  0x50   :  { %p6865_p7 = scmp.ne.s32.totalorder %s28_s18, %s6864_s1  ;;  %p6870_p9 = scmp.lt.s32.totalorder %s6864_s1, %s6864_s1 }
  0x52   :  { %p6871_p10 = por %p6870_p9, %p6869_p8 }
  0x54   :  { %p6872_p11 = pnand %p6871_p10, %p6865_p7 }
  0x56   :  { %6875 = shalt.err (!%p6872_p11)
}
  0x57   :  { %33 = dma.hbm_to_vmem [thread:$0]  %s7690_s0, 256, %s28_s18, [#allocation3], %s7023_s23, %s7023_s23, %s7024_s24  }
  0x58   :  { %s7031_s20 = smov [#allocation7]   ;;  %s7032_s22 = smov [#allocation10]  }
  0x59   :  { %s51_s21 = sshll.u32 %s7031_s20, 4  ;;  %s75_s25 = sshll.u32 %s7032_s22, 4  ;;  %s52_s21 = int_to_ptr.vmem [resolvable:$true] %s51_s21  ;;  %s76_s25 = int_to_ptr.vmem [resolvable:$true] %s75_s25 }
  0x5a   :  { %s6876_s5 = scalar_lea.hbm %s7692_s2, 8192 }
  0x5b   :  { %p6877_p12 = scmp.ne.s32.totalorder %s7692_s2, %s6876_s5  ;;  %p6880_p13 = scmp.lt.u32.totalorder %s6876_s5, %s7692_s2 }
  0x5d   :  { %p6882_p0 = pnand %p6880_p13, %p6877_p12 }
  0x5f   :  { %6885 = shalt.err (!%p6882_p0)
}
  0x60   :  { %s6886_s0 = scalar_lea.vmem %s52_s21, 8192  ;;  %p6891_p2 = scmp.lt.s32.totalorder %s52_s21, %s52_s21 }
  0x61   :  { %p6887_p1 = scmp.ne.s32.totalorder %s52_s21, %s6886_s0  ;;  %p6892_p3 = scmp.lt.s32.totalorder %s6886_s0, %s6886_s0 }
  0x63   :  { %p6893_p4 = por %p6892_p3, %p6891_p2 }
  0x65   :  { %p6894_p5 = pnand %p6893_p4, %p6887_p1 }
  0x67   :  { %6897 = shalt.err (!%p6894_p5)
}
  0x68   :  { %57 = dma.hbm_to_vmem [thread:$0]  %s7692_s2, 8192, %s52_s21, [#allocation6], %s7027_s14, %s7027_s14, %s7028_s19  }
  0x69   :  { %s6898_s15 = scalar_lea.hbm %s7694_s4, 16384 }
  0x6a   :  { %p6899_p6 = scmp.ne.s32.totalorder %s7694_s4, %s6898_s15  ;;  %p6902_p7 = scmp.lt.u32.totalorder %s6898_s15, %s7694_s4 }
  0x6c   :  { %p6904_p8 = pnand %p6902_p7, %p6899_p6 }
  0x6e   :  { %6907 = shalt.err (!%p6904_p8)
}
  0x6f   :  { %s6908_s20 = scalar_lea.vmem %s76_s25, 16384  ;;  %p6913_p10 = scmp.lt.s32.totalorder %s76_s25, %s76_s25 }
  0x70   :  { %p6909_p9 = scmp.ne.s32.totalorder %s76_s25, %s6908_s20  ;;  %p6914_p11 = scmp.lt.s32.totalorder %s6908_s20, %s6908_s20 }
  0x72   :  { %p6915_p12 = por %p6914_p11, %p6913_p10 }
  0x74   :  { %p6916_p13 = pnand %p6915_p12, %p6909_p9 }
  0x76   :  { %6919 = shalt.err (!%p6916_p13)
}
  0x77   :  { %81 = dma.hbm_to_vmem [thread:$0]  %s7694_s4, 16384, %s76_s25, [#allocation9], %s7027_s14, %s7027_s14, %s7028_s19  }
  0x78   :  { %s7033_s22 = smov [#allocation13]   ;;  %s7034_s27 = smov [#allocation16]  }
  0x79   :  { %s99_s26 = sshll.u32 %s7033_s22, 4  ;;  %s123_s5 = sshll.u32 %s7034_s27, 4  ;;  %s100_s26 = int_to_ptr.vmem [resolvable:$true] %s99_s26  ;;  %s124_s5 = int_to_ptr.vmem [resolvable:$true] %s123_s5 }
  0x7a   :  { %s6920_s11 = scalar_lea.hbm %s7696_s6, 4096 }
  0x7b   :  { %p6921_p0 = scmp.ne.s32.totalorder %s7696_s6, %s6920_s11  ;;  %p6924_p1 = scmp.lt.u32.totalorder %s6920_s11, %s7696_s6 }
  0x7d   :  { %p6926_p2 = pnand %p6924_p1, %p6921_p0 }
  0x7f   :  { %6929 = shalt.err (!%p6926_p2)
}
  0x80   :  { %s6930_s4 = scalar_lea.vmem %s100_s26, 4096  ;;  %p6935_p4 = scmp.lt.s32.totalorder %s100_s26, %s100_s26 }
  0x81   :  { %p6931_p3 = scmp.ne.s32.totalorder %s100_s26, %s6930_s4  ;;  %p6936_p5 = scmp.lt.s32.totalorder %s6930_s4, %s6930_s4 }
  0x83   :  { %p6937_p6 = por %p6936_p5, %p6935_p4 }
  0x85   :  { %p6938_p7 = pnand %p6937_p6, %p6931_p3 }
  0x87   :  { %6941 = shalt.err (!%p6938_p7)
}
  0x88   :  { %105 = dma.hbm_to_vmem [thread:$0]  %s7696_s6, 4096, %s100_s26, [#allocation12], %s7023_s23, %s7023_s23, %s7024_s24  }
  0x89   :  { %s6942_s28 = scalar_lea.hbm %s7698_s8, 10240 }
  0x8a   :  { %p6943_p8 = scmp.ne.s32.totalorder %s7698_s8, %s6942_s28  ;;  %p6946_p9 = scmp.lt.u32.totalorder %s6942_s28, %s7698_s8 }
  0x8c   :  { %p6948_p10 = pnand %p6946_p9, %p6943_p8 }
  0x8e   :  { %6951 = shalt.err (!%p6948_p10)
}
  0x8f   :  { %s6952_s16 = scalar_lea.vmem %s124_s5, 10240  ;;  %p6957_p12 = scmp.lt.s32.totalorder %s124_s5, %s124_s5 }
  0x90   :  { %p6953_p11 = scmp.ne.s32.totalorder %s124_s5, %s6952_s16  ;;  %p6958_p13 = scmp.lt.s32.totalorder %s6952_s16, %s6952_s16 }
  0x92   :  { %p6959_p0 = por %p6958_p13, %p6957_p12 }
  0x94   :  { %p6960_p1 = pnand %p6959_p0, %p6953_p11 }
  0x96   :  { %6963 = shalt.err (!%p6960_p1)
}
  0x97   :  { %s7035_s6 = smov 320   ;;  %s7036_s23 = smov 20  }
  0x98   :  { %129 = dma.hbm_to_vmem [thread:$0]  %s7698_s8, 10240, %s124_s5, [#allocation15], %s7035_s6, %s7035_s6, %s7036_s23  }
  0x99   :  { %s7037_s2 = smov [#allocation17]   ;;  %s6964_s27 = scalar_lea.hbm %s7699_s9, 1040 }
  0x9a   :  { %s136_s21 = sshll.u32 %s7037_s2, 4  ;;  %p6965_p2 = scmp.ne.s32.totalorder %s7699_s9, %s6964_s27  ;;  %s137_s21 = int_to_ptr.vmem [resolvable:$true] %s136_s21 }
  0x9b   :  { %p6968_p3 = scmp.lt.u32.totalorder %s6964_s27, %s7699_s9 }
  0x9d   :  { %p6970_p4 = pnand %p6968_p3, %p6965_p2 }
  0x9f   :  { %6973 = shalt.err (!%p6970_p4)
}
  0xa0   :  { %s6974_s0 = scalar_lea.vmem %s137_s21, 1040  ;;  %s6978_s8 = scalar_lea.vmem %s137_s21, 1056 }
  0xa1   :  { %p6975_p5 = scmp.ne.s32.totalorder %s137_s21, %s6974_s0  ;;  %p6979_p6 = scmp.lt.s32.totalorder %s137_s21, %s137_s21 }
  0xa2   :  { %p6980_p7 = scmp.lt.s32.totalorder %s6978_s8, %s6974_s0 }
  0xa4   :  { %p6981_p8 = por %p6980_p7, %p6979_p6 }
  0xa6   :  { %p6982_p9 = pnand %p6981_p8, %p6975_p5 }
  0xa8   :  { %6985 = shalt.err (!%p6982_p9)
}
  0xa9   :  { %139 = dma.hbm_to_vmem [thread:$0]  %s7699_s9, 1040, %s137_s21, [#allocation18]  }
  0xaa   :  { %7008 = dma.done.wait [#allocation3], 256  }
  0xab   :  { %7009 = vsyncadd [#allocation3], 4294967040 }
  0xac   :  { %7010 = dma.done.wait [#allocation6], 8704  }
  0xad   :  { %7011 = vsyncadd [#allocation6], 4294958592 }
  0xae   :  { %7012 = dma.done.wait [#allocation9], 32768  }
  0xaf   :  { %7013 = vsyncadd [#allocation9], 4294934528 }
  0xb0   :  { %7014 = dma.done.wait [#allocation12], 12288  }
  0xb1   :  { %7015 = vsyncadd [#allocation12], 4294955008 }
  0xb2   :  { %7016 = dma.done.wait [#allocation15], 14336  }
  0xb3   :  { %7017 = vsyncadd [#allocation15], 4294952960 }
  0xb4   :  { %7018 = dma.done.wait [#allocation18], 1040  }
  0xb5   :  { %7019 = vsyncadd [#allocation18], 4294966256  ;;  %v7038_v0 = vmov 0   ;;  %v5868_v1 = vld [vmem:[#allocation5 + $0x4] ss:$8 sps:$4 sm:$0xff]   ;;  %v171_v5 = vld [vmem:[#allocation2] sm:$0xff]  ;;  %v180_v8 = vlaneseq }
  0xb6   :  { %246 = vmatprep.mubr.bf16.mxu0 %v7038_v0  ;;  %v5870_v2 = vld [vmem:[#allocation5] ss:$8 sps:$4 sm:$0xff]   ;;  %214 = vmatprep.subr.bf16.mxu0 %v5868_v1  ;;  %v5871_v3 = vld [vmem:[#allocation5 + $0x14] ss:$8 sps:$4 sm:$0xff]   ;;  %v5873_v4 = vld [vmem:[#allocation5 + $0x10] ss:$8 sps:$4 sm:$0xff]  }
  0xb7   :  { %215 = vmatpush1.bf16.msra.mxu0 %v5870_v2  ;;  %v172_v6 = vld [vmem:[#allocation2 + $0x8] sm:$0xff]  ;;  %vm210_vm0 = vcmask 261120   ;;  %v7241_v9 = vshrl.u32 %v180_v8, 7  ;;  %v173_v11 = vld [vmem:[#allocation17] sm:$0x3]  ;;  %s7039_s9 = smov [#allocation19]  }
  0xb8   :  { %216 = vmatprep.subr.bf16.mxu0 %v5871_v3  ;;  %v174_v7 = vpack.c.bf16 %v172_v6, %v171_v5  ;;  %v5874_v31 = vld [vmem:[#allocation7 + $0x4] ss:$16 sps:$4 sm:$0xff]   ;;  %v5878_v32 = vld [vmem:[#allocation7 + $0xc] ss:$16 sps:$4 sm:$0xff]   ;;  %v5876_v33 = vld [vmem:[#allocation7 + $0x8] ss:$16 sps:$4 sm:$0xff]  }
  0xb9   :  { %v7244_v10 = vsub.s32 0, %v7241_v9  ;;  %v7247_v12 = vsub.s32 1, %v7241_v9  ;;  %778 = vmatprep.subr.bf16.mxu1 %v5874_v31  ;;  %v5879_v34 = vld [vmem:[#allocation7] ss:$16 sps:$4 sm:$0xff]   ;;  %v5880_v35 = vld [vmem:[#allocation7 + $0x24] ss:$16 sps:$4 sm:$0xff]  }
  0xba   :  { %779 = vmatpush1.bf16.msra.mxu1 %v5879_v34  ;;  %v5884_v36 = vld [vmem:[#allocation7 + $0x2c] ss:$16 sps:$4 sm:$0xff]   ;;  %v5882_v37 = vld [vmem:[#allocation7 + $0x28] ss:$16 sps:$4 sm:$0xff]   ;;  %v5885_v38 = vld [vmem:[#allocation7 + $0x20] ss:$16 sps:$4 sm:$0xff]  }
  0xbb   :  { %217 = vmatpush1.bf16.msra.mxu0 %v5873_v4  ;;  %v183_v13 = vrot.slane %v173_v11, %v7244_v10  ;;  %v187_v14 = vrot.slane %v173_v11, %v7247_v12  ;;  %780 = vmatprep.subr.bf16.mxu1 %v5880_v35  ;;  %v5886_v39 = vld [vmem:[#allocation7 + $0x44] ss:$16 sps:$4 sm:$0xff]   ;;  %v5890_v40 = vld [vmem:[#allocation7 + $0x4c] ss:$16 sps:$4 sm:$0xff]   ;;  %v5888_v41 = vld [vmem:[#allocation7 + $0x48] ss:$16 sps:$4 sm:$0xff]  }
  0xbc   :  { %821 = vmatprep.subr.bf16.mxu0 %v5878_v32  ;;  %v5891_v42 = vld [vmem:[#allocation7 + $0x40] ss:$16 sps:$4 sm:$0xff]   ;;  %v5892_v43 = vld [vmem:[#allocation7 + $0x64] ss:$16 sps:$4 sm:$0xff]   ;;  %v5896_v44 = vld [vmem:[#allocation7 + $0x6c] ss:$16 sps:$4 sm:$0xff]  }
  0xbd   :  { %v5894_v45 = vld [vmem:[#allocation7 + $0x68] ss:$16 sps:$4 sm:$0xff]   ;;  %v5897_v46 = vld [vmem:[#allocation7 + $0x60] ss:$16 sps:$4 sm:$0xff]   ;;  %v5898_v47 = vld [vmem:[#allocation7 + $0x84] ss:$16 sps:$4 sm:$0xff]  }
  0xbe   :  { %5257 = vmatmul.mubr.msk.bf16.vlgmr.msra.gmra.mrb[0].mxu0 %vm210_vm0, %v174_v7  ;;  %781 = vmatpush1.bf16.msra.mxu1 %v5885_v38  ;;  %v5902_v48 = vld [vmem:[#allocation7 + $0x8c] ss:$16 sps:$4 sm:$0xff]   ;;  %v5900_v49 = vld [vmem:[#allocation7 + $0x88] ss:$16 sps:$4 sm:$0xff]   ;;  %v5903_v50 = vld [vmem:[#allocation7 + $0x80] ss:$16 sps:$4 sm:$0xff]  }
  0xbf   :  { %822 = vmatpush1.bf16.msra.mxu0 %v5876_v33  ;;  %782 = vmatprep.subr.bf16.mxu1 %v5886_v39  ;;  %v5904_v51 = vld [vmem:[#allocation7 + $0xa4] ss:$16 sps:$4 sm:$0xff]   ;;  %v5908_v52 = vld [vmem:[#allocation7 + $0xac] ss:$16 sps:$4 sm:$0xff]   ;;  %v5906_v53 = vld [vmem:[#allocation7 + $0xa8] ss:$16 sps:$4 sm:$0xff]  }
  0xc0   :  { %823 = vmatprep.subr.bf16.mxu0 %v5884_v36  ;;  %v5909_v54 = vld [vmem:[#allocation7 + $0xa0] ss:$16 sps:$4 sm:$0xff]   ;;  %v5910_v55 = vld [vmem:[#allocation7 + $0xc4] ss:$16 sps:$4 sm:$0xff]   ;;  %v5914_v56 = vld [vmem:[#allocation7 + $0xcc] ss:$16 sps:$4 sm:$0xff]  }
  0xc1   :  { %v5912_v57 = vld [vmem:[#allocation7 + $0xc8] ss:$16 sps:$4 sm:$0xff]   ;;  %v5915_v58 = vld [vmem:[#allocation7 + $0xc0] ss:$16 sps:$4 sm:$0xff]   ;;  %v5916_v59 = vld [vmem:[#allocation7 + $0xe4] ss:$16 sps:$4 sm:$0xff]  }
  0xc2   :  { %783 = vmatpush1.bf16.msra.mxu1 %v5891_v42  ;;  %v5920_v60 = vld [vmem:[#allocation7 + $0xec] ss:$16 sps:$4 sm:$0xff]   ;;  %v5918_v61 = vld [vmem:[#allocation7 + $0xe8] ss:$16 sps:$4 sm:$0xff]   ;;  %v5921_v62 = vld [vmem:[#allocation7 + $0xe0] ss:$16 sps:$4 sm:$0xff]  }
  0xc3   :  { %824 = vmatpush1.bf16.msra.mxu0 %v5882_v37  ;;  %784 = vmatprep.subr.bf16.mxu1 %v5892_v43  ;;  %v5922_v63 = vld [vmem:[#allocation7 + $0x104] ss:$16 sps:$4 sm:$0xff]   ;;  %v5926_v0 = vld [vmem:[#allocation7 + $0x10c] ss:$16 sps:$4 sm:$0xff]   ;;  %v5924_v1 = vld [vmem:[#allocation7 + $0x108] ss:$16 sps:$4 sm:$0xff]  }
  0xc4   :  { %825 = vmatprep.subr.bf16.mxu0 %v5890_v40  ;;  %v5927_v2 = vld [vmem:[#allocation7 + $0x100] ss:$16 sps:$4 sm:$0xff]   ;;  %v5928_v3 = vld [vmem:[#allocation7 + $0x124] ss:$16 sps:$4 sm:$0xff]   ;;  %v5932_v4 = vld [vmem:[#allocation7 + $0x12c] ss:$16 sps:$4 sm:$0xff]  }
  0xc5   :  { %v5930_v5 = vld [vmem:[#allocation7 + $0x128] ss:$16 sps:$4 sm:$0xff]   ;;  %v5933_v6 = vld [vmem:[#allocation7 + $0x120] ss:$16 sps:$4 sm:$0xff]   ;;  %v5934_v7 = vld [vmem:[#allocation7 + $0x144] ss:$16 sps:$4 sm:$0xff]  }
  0xc6   :  { %785 = vmatpush1.bf16.msra.mxu1 %v5897_v46  ;;  %v5938_v8 = vld [vmem:[#allocation7 + $0x14c] ss:$16 sps:$4 sm:$0xff]   ;;  %v5936_v11 = vld [vmem:[#allocation7 + $0x148] ss:$16 sps:$4 sm:$0xff]   ;;  %v5963_v33 = vld [vmem:[#allocation7 + $0x1c0] ss:$16 sps:$4 sm:$0xff]  }
  0xc7   :  { %826 = vmatpush1.bf16.msra.mxu0 %v5888_v41  ;;  %786 = vmatprep.subr.bf16.mxu1 %v5898_v47  ;;  %v5962_v31 = vld [vmem:[#allocation7 + $0x1cc] ss:$16 sps:$4 sm:$0xff]   ;;  %v5960_v32 = vld [vmem:[#allocation7 + $0x1c8] ss:$16 sps:$4 sm:$0xff]   ;;  %v5964_v34 = vld [vmem:[#allocation7 + $0x1e4] ss:$16 sps:$4 sm:$0xff]  }
  0xc8   :  { %827 = vmatprep.subr.bf16.mxu0 %v5896_v44  ;;  %v5968_v35 = vld [vmem:[#allocation7 + $0x1ec] ss:$16 sps:$4 sm:$0xff]   ;;  %v5966_v36 = vld [vmem:[#allocation7 + $0x1e8] ss:$16 sps:$4 sm:$0xff]   ;;  %v5969_v37 = vld [vmem:[#allocation7 + $0x1e0] ss:$16 sps:$4 sm:$0xff]  }
  0xc9   :  { %s5236_s13 = sshll.u32 %s7039_s9, 4  ;;  %s5237_s13 = int_to_ptr.vmem [resolvable:$true] %s5236_s13 }
  0xca   :  { %787 = vmatpush1.bf16.msra.mxu1 %v5903_v50  ;;  %s6986_s4 = scalar_lea.vmem %s5237_s13, 1280  ;;  %p6991_p11 = scmp.lt.s32.totalorder %s5237_s13, %s5237_s13 }
  0xcb   :  { %828 = vmatpush1.bf16.msra.mxu0 %v5894_v45  ;;  %788 = vmatprep.subr.bf16.mxu1 %v5904_v51  ;;  %p6987_p10 = scmp.ne.s32.totalorder %s5237_s13, %s6986_s4  ;;  %p6992_p12 = scmp.lt.s32.totalorder %s6986_s4, %s6986_s4 }
  0xcc   :  { %829 = vmatprep.subr.bf16.mxu0 %v5902_v48 }
  0xcd   :  { %p6993_p13 = por %p6992_p12, %p6991_p11 }
  0xce   :  { %789 = vmatpush1.bf16.msra.mxu1 %v5909_v54 }
  0xcf   :  { %830 = vmatpush1.bf16.msra.mxu0 %v5900_v49  ;;  %790 = vmatprep.subr.bf16.mxu1 %v5910_v55  ;;  %p6994_p0 = pnand %p6993_p13, %p6987_p10 }
  0xd0   :  { %831 = vmatprep.subr.bf16.mxu0 %v5908_v52  ;;  %v257_v52 = vld [vmem:[#allocation17 + $0x2] sm:$0x3] }
  0xd1   :  { %v296_v54 = vrot.slane %v257_v52, %v7244_v10  ;;  %v300_v55 = vrot.slane %v257_v52, %v7247_v12 }
  0xd2   :  { %791 = vmatpush1.bf16.msra.mxu1 %v5915_v58 }
  0xd3   :  { %832 = vmatpush1.bf16.msra.mxu0 %v5906_v53  ;;  %792 = vmatprep.subr.bf16.mxu1 %v5916_v59  ;;  %v258_v53 = vld [vmem:[#allocation17 + $0x4] sm:$0x3] }
  0xd4   :  { %833 = vmatprep.subr.bf16.mxu0 %v5914_v56  ;;  %v319_v58 = vrot.slane %v258_v53, %v7247_v12 }
  0xd6   :  { %793 = vmatpush1.bf16.msra.mxu1 %v5921_v62 }
  0xd7   :  { %834 = vmatpush1.bf16.msra.mxu0 %v5912_v57  ;;  %794 = vmatprep.subr.bf16.mxu1 %v5922_v63  ;;  %v315_v57 = vrot.slane %v258_v53, %v7244_v10 }
  0xd8   :  { %835 = vmatprep.subr.bf16.mxu0 %v5920_v60 }
  0xda   :  { %795 = vmatpush1.bf16.msra.mxu1 %v5927_v2 }
  0xdb   :  { %836 = vmatpush1.bf16.msra.mxu0 %v5918_v61  ;;  %796 = vmatprep.subr.bf16.mxu1 %v5928_v3 }
  0xdc   :  { %837 = vmatprep.subr.bf16.mxu0 %v5926_v0 }
  0xde   :  { %797 = vmatpush1.bf16.msra.mxu1 %v5933_v6 }
  0xdf   :  { %838 = vmatpush1.bf16.msra.mxu0 %v5924_v1  ;;  %798 = vmatprep.subr.bf16.mxu1 %v5934_v7 }
  0xe0   :  { %839 = vmatprep.subr.bf16.mxu0 %v5932_v4 }
  0xe3   :  { %840 = vmatpush1.bf16.msra.mxu0 %v5930_v5 }
  0xe4   :  { %841 = vmatprep.subr.bf16.mxu0 %v5938_v8 }
  0xe7   :  { %842 = vmatpush1.bf16.msra.mxu0 %v5936_v11 }
 0x191   :  { %v248_v15 = vpop.f32.mrb[0].mxu0 }
 0x192   :  { %v7251_v16 = vadd.f32 %v248_v15, %v183_v13  ;;  %v250_v17 = vpop.f32.mrb[1].mxu0  ;;  %v5944_v15 = vld [vmem:[#allocation7 + $0x16c] ss:$16 sps:$4 sm:$0xff]  }
 0x193   :  { %v7253_v18 = vadd.f32 %v250_v17, %v187_v14  ;;  %v252_v19 = vpop.f32.mrb[2].mxu0  ;;  %v5942_v17 = vld [vmem:[#allocation7 + $0x168] ss:$16 sps:$4 sm:$0xff]   ;;  %843 = vmatprep.subr.bf16.mxu0 %v5944_v15 }
 0x194   :  { %v7255_v20 = vadd.f32 %v252_v19, %v183_v13  ;;  %v254_v21 = vpop.f32.mrb[3].mxu0  ;;  %v268_v22 = vmul.f32 %v7251_v16, %v7251_v16  ;;  %v5939_v13 = vld [vmem:[#allocation7 + $0x140] ss:$16 sps:$4 sm:$0xff]   ;;  %844 = vmatpush1.bf16.msra.mxu0 %v5942_v17 }
 0x195   :  { %v7259_v23 = vadd.f32 %v254_v21, %v187_v14  ;;  %v259_v24 = vadd.f32 %v7253_v18, %v7251_v16  ;;  %v269_v25 = vmul.f32 %v7253_v18, %v7253_v18  ;;  %v5940_v14 = vld [vmem:[#allocation7 + $0x164] ss:$16 sps:$4 sm:$0xff]   ;;  %799 = vmatpush1.bf16.msra.mxu1 %v5939_v13  ;;  %v5945_v19 = vld [vmem:[#allocation7 + $0x160] ss:$16 sps:$4 sm:$0xff]  }
 0x196   :  { %v270_v27 = vmul.f32 %v7255_v20, %v7255_v20  ;;  %800 = vmatprep.subr.bf16.mxu1 %v5940_v14  ;;  %v5946_v21 = vld [vmem:[#allocation7 + $0x184] ss:$16 sps:$4 sm:$0xff]  }
 0x197   :  { %260 = vadd.xlane.f32.xlu0 %v259_v24  ;;  %v272_v26 = vadd.f32 %v269_v25, %v268_v22  ;;  %v271_v28 = vmul.f32 %v7259_v23, %v7259_v23  ;;  %v262_v29 = vadd.f32 %v7259_v23, %v7255_v20  ;;  %v5950_v22 = vld [vmem:[#allocation7 + $0x18c] ss:$16 sps:$4 sm:$0xff]   ;;  %v5948_v24 = vld [vmem:[#allocation7 + $0x188] ss:$16 sps:$4 sm:$0xff]   ;;  %v5951_v25 = vld [vmem:[#allocation7 + $0x180] ss:$16 sps:$4 sm:$0xff]  }
 0x198   :  { %845 = vmatprep.subr.bf16.mxu0 %v5950_v22 }
 0x199   :  { %273 = vadd.xlane.f32.xlu1 %v272_v26  ;;  %v275_v30 = vadd.f32 %v271_v28, %v270_v27  ;;  %801 = vmatpush1.bf16.msra.mxu1 %v5945_v19  ;;  %v5952_v26 = vld [vmem:[#allocation7 + $0x1a4] ss:$16 sps:$4 sm:$0xff]   ;;  %v5956_v27 = vld [vmem:[#allocation7 + $0x1ac] ss:$16 sps:$4 sm:$0xff]   ;;  %v5954_v28 = vld [vmem:[#allocation7 + $0x1a8] ss:$16 sps:$4 sm:$0xff]  }
 0x19a   :  { %802 = vmatprep.subr.bf16.mxu1 %v5946_v21  ;;  %846 = vmatpush1.bf16.msra.mxu0 %v5948_v24 }
 0x19b   :  { %263 = vadd.xlane.f32.xlu0 %v262_v29  ;;  %v5957_v29 = vld [vmem:[#allocation7 + $0x1a0] ss:$16 sps:$4 sm:$0xff]   ;;  %847 = vmatprep.subr.bf16.mxu0 %v5956_v27 }
 0x19d   :  { %276 = vadd.xlane.f32.xlu1 %v275_v30  ;;  %803 = vmatpush1.bf16.msra.mxu1 %v5951_v25  ;;  %v5958_v30 = vld [vmem:[#allocation7 + $0x1c4] ss:$16 sps:$4 sm:$0xff]  }
 0x19e   :  { %804 = vmatprep.subr.bf16.mxu1 %v5952_v26  ;;  %848 = vmatpush1.bf16.msra.mxu0 %v5954_v28 }
 0x19f   :  { %849 = vmatprep.subr.bf16.mxu0 %v5962_v31 }
 0x1a1   :  { %805 = vmatpush1.bf16.msra.mxu1 %v5957_v29 }
 0x1a2   :  { %806 = vmatprep.subr.bf16.mxu1 %v5958_v30  ;;  %850 = vmatpush1.bf16.msra.mxu0 %v5960_v32 }
 0x1a3   :  { %851 = vmatprep.subr.bf16.mxu0 %v5968_v35 }
 0x1a5   :  { %807 = vmatpush1.bf16.msra.mxu1 %v5963_v33 }
 0x1a6   :  { %808 = vmatprep.subr.bf16.mxu1 %v5964_v34  ;;  %852 = vmatpush1.bf16.msra.mxu0 %v5966_v36 }
 0x1a9   :  { %809 = vmatpush1.bf16.msra.mxu1 %v5969_v37 }
 0x224   :  { %v261_v38 = vpop.xlane.xlu0 %260 }
 0x225   :  { %v266_v39 = vmul.f32 0.00390625, %v261_v38 }
 0x226   :  { %v274_v40 = vpop.xlane.xlu1 %273 }
 0x227   :  { %v278_v41 = vmul.f32 0.00390625, %v274_v40  ;;  %v280_v42 = vmul.f32 %v266_v39, %v266_v39  ;;  %v284_v59 = vsub.f32 %v7251_v16, %v266_v39  ;;  %v285_v60 = vsub.f32 %v7253_v18, %v266_v39 }
 0x228   :  { %v264_v43 = vpop.xlane.xlu0 %263 }
 0x229   :  { %v282_v44 = vsub.f32 %v278_v41, %v280_v42  ;;  %v267_v45 = vmul.f32 0.00390625, %v264_v43 }
 0x22a   :  { %v277_v46 = vpop.xlane.xlu1 %276 }
 0x22b   :  { %v288_v47 = vadd.f32 1e-05, %v282_v44  ;;  %v279_v48 = vmul.f32 0.00390625, %v277_v46  ;;  %v281_v49 = vmul.f32 %v267_v45, %v267_v45  ;;  %v286_v4 = vsub.f32 %v7255_v20, %v267_v45 }
 0x22c   :  { %v287_v5 = vsub.f32 %v7259_v23, %v267_v45 }
 0x22d   :  { %6658 = vrsqrt.f32 %v288_v47  ;;  %v283_v50 = vsub.f32 %v279_v48, %v281_v49 }
 0x22f   :  { %v289_v51 = vadd.f32 1e-05, %v283_v50 }
 0x231   :  { %6660 = vrsqrt.f32 %v289_v51 }
 0x237   :  { %v6659_v56 = vpop.eup %6658 }
 0x238   :  { %v304_v61 = vmul.f32 %v6659_v56, %v300_v55  ;;  %v303_v62 = vmul.f32 %v6659_v56, %v296_v54 }
 0x23a   :  { %v308_v63 = vmul.f32 %v304_v61, %v285_v60  ;;  %v307_v0 = vmul.f32 %v303_v62, %v284_v59  ;;  %v7285_v61 = vsub.s32 3, %v7241_v9 }
 0x23b   :  { %v6661_v1 = vpop.eup %6660 }
 0x23c   :  { %v323_v2 = vadd.f32 %v319_v58, %v308_v63  ;;  %v322_v3 = vadd.f32 %v315_v57, %v307_v0  ;;  %v306_v6 = vmul.f32 %v6661_v1, %v300_v55  ;;  %v305_v7 = vmul.f32 %v6661_v1, %v296_v54 }
 0x23e   :  { %v327_v8 = vand.u32 2147483647, %v323_v2  ;;  %v326_v11 = vand.u32 2147483647, %v322_v3  ;;  %v310_v13 = vmul.f32 %v306_v6, %v287_v5  ;;  %v309_v14 = vmul.f32 %v305_v7, %v286_v4 }
 0x23f   :  { %vm355_vm1 = vcmp.ge.f32.partialorder %v323_v2, 0.0  ;;  %vm354_vm2 = vcmp.ge.f32.partialorder %v322_v3, 0.0 }
 0x240   :  { %v331_v16 = vsub.f32 0.0, %v327_v8  ;;  %v330_v15 = vsub.f32 0.0, %v326_v11  ;;  %v325_v18 = vadd.f32 %v319_v58, %v310_v13  ;;  %v324_v17 = vadd.f32 %v315_v57, %v309_v14  ;;  %v370_v58 = vld [vmem:[#allocation17 + $0x6] sm:$0xf] }
 0x241   :  { %v7280_v57 = vsub.s32 2, %v7241_v9  ;;  %v441_v59 = vrot.slane %v370_v58, %v7244_v10  ;;  %v445_v62 = vrot.slane %v370_v58, %v7247_v12  ;;  %v453_v4 = vrot.slane %v370_v58, %v7285_v61 }
 0x242   :  { %v336_v19 = vmul.f32 1.442695, %v331_v16  ;;  %v334_v21 = vmul.f32 1.442695, %v330_v15  ;;  %v329_v22 = vand.u32 2147483647, %v325_v18 }
 0x243   :  { %v328_v24 = vand.u32 2147483647, %v324_v17  ;;  %vm357_vm3 = vcmp.ge.f32.partialorder %v325_v18, 0.0  ;;  %vm356_vm4 = vcmp.ge.f32.partialorder %v324_v17, 0.0  ;;  %v449_v60 = vrot.slane %v370_v58, %v7280_v57  ;;  %v5994_v58 = vld [vmem:[#allocation8 + $0x80] ss:$16 sps:$4 sm:$0xff]  }
 0x244   :  { %6662 = vpow2.f32 %v336_v19  ;;  %v333_v25 = vsub.f32 0.0, %v329_v22 }
 0x245   :  { %v332_v26 = vsub.f32 0.0, %v328_v24  ;;  %6664 = vpow2.f32 %v334_v21 }
 0x246   :  { %v340_v20 = vmul.f32 1.442695, %v333_v25 }
 0x247   :  { %v338_v23 = vmul.f32 1.442695, %v332_v26 }
 0x248   :  { %6666 = vpow2.f32 %v340_v20 }
 0x249   :  { %6668 = vpow2.f32 %v338_v23 }
 0x24e   :  { %v6663_v27 = vpop.eup %6662 }
 0x24f   :  { %v6665_v28 = vpop.eup %6664  ;;  %v343_v29 = vadd.f32 1.0, %v6663_v27 }
 0x250   :  { %v342_v30 = vadd.f32 1.0, %v6665_v28 }
 0x251   :  { %6670 = vrcp.f32 %v343_v29 }
 0x252   :  { %6672 = vrcp.f32 %v342_v30  ;;  %v6667_v31 = vpop.eup %6666 }
 0x253   :  { %v6669_v32 = vpop.eup %6668  ;;  %v345_v33 = vadd.f32 1.0, %v6667_v31 }
 0x254   :  { %v344_v34 = vadd.f32 1.0, %v6669_v32 }
 0x255   :  { %6674 = vrcp.f32 %v345_v33 }
 0x256   :  { %6676 = vrcp.f32 %v344_v34 }
 0x25b   :  { %v6671_v35 = vpop.eup %6670 }
 0x25c   :  { %v6673_v36 = vpop.eup %6672  ;;  %v351_v37 = vmin.f32 %v6671_v35, 1.0 }
 0x25d   :  { %v350_v38 = vmin.f32 %v6673_v36, 1.0 }
 0x25e   :  { %v359_v39 = vsub.f32 1.0, %v351_v37 }
 0x25f   :  { %v6675_v40 = vpop.eup %6674  ;;  %v358_v41 = vsub.f32 1.0, %v350_v38 }
 0x260   :  { %v6677_v42 = vpop.eup %6676  ;;  %v353_v43 = vmin.f32 %v6675_v40, 1.0  ;;  %v363_v46 = vsel %vm355_vm1, %v351_v37, %v359_v39  ;;  %v5972_v39 = vld [vmem:[#allocation8 + $0x4] ss:$16 sps:$4 sm:$0xff]   ;;  %v5975_v40 = vld [vmem:[#allocation8 + $0xc] ss:$16 sps:$4 sm:$0xff]  }
 0x261   :  { %v352_v44 = vmin.f32 %v6677_v42, 1.0  ;;  %v362_v48 = vsel %vm354_vm2, %v350_v38, %v358_v41  ;;  %v367_v50 = vmul.f32 %v363_v46, %v323_v2  ;;  %v5970_v41 = vld [vmem:[#allocation8] ss:$16 sps:$4 sm:$0xff]   ;;  %v5973_v42 = vld [vmem:[#allocation8 + $0x8] ss:$16 sps:$4 sm:$0xff]   ;;  %1863 = vmatprep.subr.bf16.mxu1 %v5972_v39  ;;  %1949 = vmatprep.subr.bf16.mxu0 %v5975_v40 }
 0x262   :  { %v361_v45 = vsub.f32 1.0, %v353_v43  ;;  %v366_v53 = vmul.f32 %v362_v48, %v322_v3  ;;  %v5979_v46 = vld [vmem:[#allocation8 + $0x28] ss:$16 sps:$4 sm:$0xff]   ;;  %v5984_v48 = vld [vmem:[#allocation8 + $0x44] ss:$16 sps:$4 sm:$0xff]  }
 0x263   :  { %v360_v47 = vsub.f32 1.0, %v352_v44  ;;  %v6045_v39 = vld [vmem:[#allocation8 + $0x188] ss:$16 sps:$4 sm:$0xff]   ;;  %v6050_v40 = vld [vmem:[#allocation8 + $0x1a4] ss:$16 sps:$4 sm:$0xff]  }
 0x264   :  { %v365_v49 = vsel %vm357_vm3, %v353_v43, %v361_v45  ;;  %v5978_v43 = vld [vmem:[#allocation8 + $0x24] ss:$16 sps:$4 sm:$0xff]   ;;  %v5976_v45 = vld [vmem:[#allocation8 + $0x20] ss:$16 sps:$4 sm:$0xff]  }
 0x265   :  { %v369_v51 = vmul.f32 %v365_v49, %v325_v18  ;;  %v364_v52 = vsel %vm356_vm4, %v352_v44, %v360_v47  ;;  %v5981_v44 = vld [vmem:[#allocation8 + $0x2c] ss:$16 sps:$4 sm:$0xff]   ;;  %v5982_v47 = vld [vmem:[#allocation8 + $0x40] ss:$16 sps:$4 sm:$0xff]   ;;  %v5985_v49 = vld [vmem:[#allocation8 + $0x48] ss:$16 sps:$4 sm:$0xff]  }
 0x266   :  { %v368_v54 = vmul.f32 %v364_v52, %v324_v17  ;;  %v5993_v52 = vld [vmem:[#allocation8 + $0x6c] ss:$16 sps:$4 sm:$0xff]  }
 0x267   :  { %v372_v55 = vpack.c.bf16 %v369_v51, %v367_v50  ;;  %v5987_v50 = vld [vmem:[#allocation8 + $0x4c] ss:$16 sps:$4 sm:$0xff]   ;;  %v5990_v51 = vld [vmem:[#allocation8 + $0x64] ss:$16 sps:$4 sm:$0xff]  }
 0x268   :  { %v371_v56 = vpack.c.bf16 %v368_v54, %v366_v53  ;;  %v5988_v53 = vld [vmem:[#allocation8 + $0x60] ss:$16 sps:$4 sm:$0xff]   ;;  %v5991_v54 = vld [vmem:[#allocation8 + $0x68] ss:$16 sps:$4 sm:$0xff]  }
 0x269   :  { %810 = vmatprep.mubr.bf16.mxu1 %v372_v55  ;;  %853 = vmatprep.mubr.bf16.mxu0 %v372_v55  ;;  %v5996_v55 = vld [vmem:[#allocation8 + $0x84] ss:$16 sps:$4 sm:$0xff]  }
 0x26a   :  { %811 = vmatmul.mubr.bf16.vlgmr.msra.gmra.mrb[0].mxu1 %v371_v56  ;;  %854 = vmatmul.mubr.bf16.vlgmr.msra.gmra.mrb[4].mxu0 %v371_v56  ;;  %v5999_v56 = vld [vmem:[#allocation8 + $0x8c] ss:$16 sps:$4 sm:$0xff]  }
 0x26b   :  { %1864 = vmatpush1.bf16.msra.mxu1 %v5970_v41  ;;  %1950 = vmatpush1.bf16.msra.mxu0 %v5973_v42  ;;  %v6053_v41 = vld [vmem:[#allocation8 + $0x1ac] ss:$16 sps:$4 sm:$0xff]   ;;  %v6048_v42 = vld [vmem:[#allocation8 + $0x1a0] ss:$16 sps:$4 sm:$0xff]  }
 0x26c   :  { %1865 = vmatprep.subr.bf16.mxu1 %v5978_v43  ;;  %1951 = vmatprep.subr.bf16.mxu0 %v5981_v44  ;;  %v6051_v43 = vld [vmem:[#allocation8 + $0x1a8] ss:$16 sps:$4 sm:$0xff]   ;;  %v6056_v44 = vld [vmem:[#allocation8 + $0x1c4] ss:$16 sps:$4 sm:$0xff]  }
 0x26f   :  { %1866 = vmatpush1.bf16.msra.mxu1 %v5976_v45  ;;  %1952 = vmatpush1.bf16.msra.mxu0 %v5979_v46  ;;  %v6059_v45 = vld [vmem:[#allocation8 + $0x1cc] ss:$16 sps:$4 sm:$0xff]   ;;  %v6054_v46 = vld [vmem:[#allocation8 + $0x1c0] ss:$16 sps:$4 sm:$0xff]  }
 0x270   :  { %1867 = vmatprep.subr.bf16.mxu1 %v5984_v48  ;;  %1953 = vmatprep.subr.bf16.mxu0 %v5987_v50  ;;  %v6062_v48 = vld [vmem:[#allocation8 + $0x1e4] ss:$16 sps:$4 sm:$0xff]   ;;  %v6060_v50 = vld [vmem:[#allocation8 + $0x1e0] ss:$16 sps:$4 sm:$0xff]  }
 0x273   :  { %1868 = vmatpush1.bf16.msra.mxu1 %v5982_v47  ;;  %1954 = vmatpush1.bf16.msra.mxu0 %v5985_v49  ;;  %v6057_v47 = vld [vmem:[#allocation8 + $0x1c8] ss:$16 sps:$4 sm:$0xff]   ;;  %v6065_v49 = vld [vmem:[#allocation8 + $0x1ec] ss:$16 sps:$4 sm:$0xff]  }
 0x274   :  { %1869 = vmatprep.subr.bf16.mxu1 %v5990_v51  ;;  %1955 = vmatprep.subr.bf16.mxu0 %v5993_v52  ;;  %v6063_v51 = vld [vmem:[#allocation8 + $0x1e8] ss:$16 sps:$4 sm:$0xff]   ;;  %v6068_v52 = vld [vmem:[#allocation8 + $0x204] ss:$16 sps:$4 sm:$0xff]  }
 0x277   :  { %1870 = vmatpush1.bf16.msra.mxu1 %v5988_v53  ;;  %1956 = vmatpush1.bf16.msra.mxu0 %v5991_v54  ;;  %v6071_v53 = vld [vmem:[#allocation8 + $0x20c] ss:$16 sps:$4 sm:$0xff]  }
 0x278   :  { %1871 = vmatprep.subr.bf16.mxu1 %v5996_v55  ;;  %1957 = vmatprep.subr.bf16.mxu0 %v5999_v56 }
 0x27b   :  { %1872 = vmatpush1.bf16.msra.mxu1 %v5994_v58 }
 0x33d   :  { %v812_v63 = vpop.f32.mrb[0].mxu1  ;;  %v855_v0 = vpop.f32.mrb[4].mxu0 }
 0x33e   :  { %v7288_v1 = vadd.f32 %v812_v63, %v441_v59  ;;  %v7290_v2 = vadd.f32 %v855_v0, %v449_v60  ;;  %v814_v3 = vpop.f32.mrb[1].mxu1  ;;  %v857_v5 = vpop.f32.mrb[5].mxu0  ;;  %v6000_v63 = vld [vmem:[#allocation8 + $0xa0] ss:$16 sps:$4 sm:$0xff]   ;;  %v6003_v0 = vld [vmem:[#allocation8 + $0xa8] ss:$16 sps:$4 sm:$0xff]  }
 0x33f   :  { %v7293_v6 = vadd.f32 %v814_v3, %v445_v62  ;;  %v816_v7 = vpop.f32.mrb[2].mxu1  ;;  %v859_v8 = vpop.f32.mrb[6].mxu0  ;;  %v7309_v22 = vadd.f32 %v857_v5, %v453_v4  ;;  %v6008_v3 = vld [vmem:[#allocation8 + $0xc4] ss:$16 sps:$4 sm:$0xff]   ;;  %v6006_v5 = vld [vmem:[#allocation8 + $0xc0] ss:$16 sps:$4 sm:$0xff]  }
 0x340   :  { %v879_v11 = vmul.f32 %v7288_v1, %v7288_v1  ;;  %v7297_v13 = vadd.f32 %v816_v7, %v441_v59  ;;  %v7299_v14 = vadd.f32 %v859_v8, %v449_v60  ;;  %v818_v16 = vpop.f32.mrb[3].mxu1  ;;  %v861_v15 = vpop.f32.mrb[7].mxu0  ;;  %v881_v21 = vmul.f32 %v7290_v2, %v7290_v2  ;;  %v5997_v59 = vld [vmem:[#allocation8 + $0x88] ss:$16 sps:$4 sm:$0xff]   ;;  %v6002_v60 = vld [vmem:[#allocation8 + $0xa4] ss:$16 sps:$4 sm:$0xff]  }
 0x341   :  { %v866_v18 = vadd.f32 %v7293_v6, %v7288_v1  ;;  %v880_v17 = vmul.f32 %v7293_v6, %v7293_v6  ;;  %v7305_v19 = vadd.f32 %v818_v16, %v445_v62  ;;  %v7320_v28 = vadd.f32 %v861_v15, %v453_v4  ;;  %v6005_v62 = vld [vmem:[#allocation8 + $0xac] ss:$16 sps:$4 sm:$0xff]   ;;  %1958 = vmatpush1.bf16.msra.mxu0 %v5997_v59  ;;  %v6009_v7 = vld [vmem:[#allocation8 + $0xc8] ss:$16 sps:$4 sm:$0xff]   ;;  %v6014_v8 = vld [vmem:[#allocation8 + $0xe4] ss:$16 sps:$4 sm:$0xff]  }
 0x342   :  { %v883_v24 = vmul.f32 %v7297_v13, %v7297_v13  ;;  %v885_v27 = vmul.f32 %v7299_v14, %v7299_v14  ;;  %v882_v34 = vmul.f32 %v7309_v22, %v7309_v22  ;;  %1873 = vmatprep.subr.bf16.mxu1 %v6002_v60  ;;  %1959 = vmatprep.subr.bf16.mxu0 %v6005_v62  ;;  %v6011_v4 = vld [vmem:[#allocation8 + $0xcc] ss:$16 sps:$4 sm:$0xff]   ;;  %v6012_v16 = vld [vmem:[#allocation8 + $0xe0] ss:$16 sps:$4 sm:$0xff]   ;;  %v6015_v15 = vld [vmem:[#allocation8 + $0xe8] ss:$16 sps:$4 sm:$0xff]  }
 0x343   :  { %v871_v25 = vadd.f32 %v7305_v19, %v7297_v13  ;;  %v884_v26 = vmul.f32 %v7305_v19, %v7305_v19  ;;  %v867_v20 = vadd.f32 %v866_v18, %v7290_v2  ;;  %v887_v23 = vadd.f32 %v880_v17, %v879_v11  ;;  %1874 = vmatpush1.bf16.msra.mxu1 %v6000_v63  ;;  %v6017_v11 = vld [vmem:[#allocation8 + $0xec] ss:$16 sps:$4 sm:$0xff]   ;;  %v6020_v18 = vld [vmem:[#allocation8 + $0x104] ss:$16 sps:$4 sm:$0xff]  }
 0x344   :  { %v886_v37 = vmul.f32 %v7320_v28, %v7320_v28  ;;  %1875 = vmatprep.subr.bf16.mxu1 %v6008_v3  ;;  %v6023_v17 = vld [vmem:[#allocation8 + $0x10c] ss:$16 sps:$4 sm:$0xff]  }
 0x345   :  { %v868_v29 = vadd.f32 %v867_v20, %v7309_v22  ;;  %v872_v30 = vadd.f32 %v871_v25, %v7299_v14  ;;  %v888_v31 = vadd.f32 %v887_v23, %v881_v21  ;;  %v892_v32 = vadd.f32 %v884_v26, %v883_v24  ;;  %1960 = vmatpush1.bf16.msra.mxu0 %v6003_v0  ;;  %v6018_v21 = vld [vmem:[#allocation8 + $0x100] ss:$16 sps:$4 sm:$0xff]   ;;  %v6021_v24 = vld [vmem:[#allocation8 + $0x108] ss:$16 sps:$4 sm:$0xff]   ;;  %v6026_v25 = vld [vmem:[#allocation8 + $0x124] ss:$16 sps:$4 sm:$0xff]  }
 0x346   :  { %1961 = vmatprep.subr.bf16.mxu0 %v6011_v4  ;;  %v6029_v26 = vld [vmem:[#allocation8 + $0x12c] ss:$16 sps:$4 sm:$0xff]   ;;  %v6024_v20 = vld [vmem:[#allocation8 + $0x120] ss:$16 sps:$4 sm:$0xff]   ;;  %v6027_v23 = vld [vmem:[#allocation8 + $0x128] ss:$16 sps:$4 sm:$0xff]  }
 0x347   :  { %869 = vadd.xlane.f32.xlu0 %v868_v29  ;;  %v873_v33 = vadd.f32 %v872_v30, %v7320_v28  ;;  %v893_v35 = vadd.f32 %v892_v32, %v885_v27  ;;  %v889_v36 = vadd.f32 %v888_v31, %v882_v34  ;;  %1876 = vmatpush1.bf16.msra.mxu1 %v6006_v5  ;;  %v6032_v27 = vld [vmem:[#allocation8 + $0x144] ss:$16 sps:$4 sm:$0xff]   ;;  %v6035_v29 = vld [vmem:[#allocation8 + $0x14c] ss:$16 sps:$4 sm:$0xff]   ;;  %v6030_v30 = vld [vmem:[#allocation8 + $0x140] ss:$16 sps:$4 sm:$0xff]  }
 0x348   :  { %1877 = vmatprep.subr.bf16.mxu1 %v6014_v8  ;;  %v6033_v31 = vld [vmem:[#allocation8 + $0x148] ss:$16 sps:$4 sm:$0xff]   ;;  %v6038_v32 = vld [vmem:[#allocation8 + $0x164] ss:$16 sps:$4 sm:$0xff]   ;;  %v6036_v34 = vld [vmem:[#allocation8 + $0x160] ss:$16 sps:$4 sm:$0xff]  }
 0x349   :  { %874 = vadd.xlane.f32.xlu1 %v873_v33  ;;  %v894_v38 = vadd.f32 %v893_v35, %v886_v37  ;;  %1962 = vmatpush1.bf16.msra.mxu0 %v6009_v7  ;;  %v6041_v33 = vld [vmem:[#allocation8 + $0x16c] ss:$16 sps:$4 sm:$0xff]   ;;  %v6039_v35 = vld [vmem:[#allocation8 + $0x168] ss:$16 sps:$4 sm:$0xff]  }
 0x34a   :  { %1963 = vmatprep.subr.bf16.mxu0 %v6017_v11  ;;  %v6047_v37 = vld [vmem:[#allocation8 + $0x18c] ss:$16 sps:$4 sm:$0xff]  }
 0x34b   :  { %890 = vadd.xlane.f32.xlu0 %v889_v36  ;;  %1878 = vmatpush1.bf16.msra.mxu1 %v6012_v16  ;;  %v6044_v36 = vld [vmem:[#allocation8 + $0x184] ss:$16 sps:$4 sm:$0xff]   ;;  %v864_v11 = vld [vmem:[#allocation17 + $0xa] sm:$0xf]  ;;  %v865_v16 = vld [vmem:[#allocation17 + $0xe] sm:$0xf] }
 0x34c   :  { %1879 = vmatprep.subr.bf16.mxu1 %v6020_v18  ;;  %v919_v18 = vrot.slane %v864_v11, %v7244_v10 }
 0x34d   :  { %895 = vadd.xlane.f32.xlu1 %v894_v38  ;;  %1964 = vmatpush1.bf16.msra.mxu0 %v6015_v15  ;;  %v6042_v38 = vld [vmem:[#allocation8 + $0x180] ss:$16 sps:$4 sm:$0xff]   ;;  %v923_v15 = vrot.slane %v864_v11, %v7247_v12 }
 0x34e   :  { %1965 = vmatprep.subr.bf16.mxu0 %v6023_v17  ;;  %v931_v17 = vrot.slane %v864_v11, %v7285_v61 }
 0x34f   :  { %1880 = vmatpush1.bf16.msra.mxu1 %v6018_v21  ;;  %v927_v21 = vrot.slane %v864_v11, %v7280_v57 }
 0x350   :  { %1881 = vmatprep.subr.bf16.mxu1 %v6026_v25  ;;  %v956_v25 = vrot.slane %v865_v16, %v7244_v10 }
 0x351   :  { %1966 = vmatpush1.bf16.msra.mxu0 %v6021_v24  ;;  %v960_v24 = vrot.slane %v865_v16, %v7247_v12 }
 0x352   :  { %1967 = vmatprep.subr.bf16.mxu0 %v6029_v26  ;;  %v968_v26 = vrot.slane %v865_v16, %v7285_v61 }
 0x353   :  { %1882 = vmatpush1.bf16.msra.mxu1 %v6024_v20  ;;  %v964_v20 = vrot.slane %v865_v16, %v7280_v57 }
 0x354   :  { %1883 = vmatprep.subr.bf16.mxu1 %v6032_v27 }
 0x355   :  { %1968 = vmatpush1.bf16.msra.mxu0 %v6027_v23 }
 0x356   :  { %1969 = vmatprep.subr.bf16.mxu0 %v6035_v29 }
 0x357   :  { %1884 = vmatpush1.bf16.msra.mxu1 %v6030_v30 }
 0x358   :  { %1885 = vmatprep.subr.bf16.mxu1 %v6038_v32 }
 0x359   :  { %1970 = vmatpush1.bf16.msra.mxu0 %v6033_v31 }
 0x35a   :  { %1971 = vmatprep.subr.bf16.mxu0 %v6041_v33 }
 0x35b   :  { %1886 = vmatpush1.bf16.msra.mxu1 %v6036_v34 }
 0x35c   :  { %1887 = vmatprep.subr.bf16.mxu1 %v6044_v36 }
 0x35d   :  { %1972 = vmatpush1.bf16.msra.mxu0 %v6039_v35 }
 0x35e   :  { %1973 = vmatprep.subr.bf16.mxu0 %v6047_v37 }
 0x35f   :  { %1888 = vmatpush1.bf16.msra.mxu1 %v6042_v38 }
 0x360   :  { %1889 = vmatprep.subr.bf16.mxu1 %v6050_v40 }
 0x361   :  { %1974 = vmatpush1.bf16.msra.mxu0 %v6045_v39 }
 0x362   :  { %1975 = vmatprep.subr.bf16.mxu0 %v6053_v41 }
 0x363   :  { %1890 = vmatpush1.bf16.msra.mxu1 %v6048_v42 }
 0x364   :  { %1891 = vmatprep.subr.bf16.mxu1 %v6056_v44 }
 0x365   :  { %1976 = vmatpush1.bf16.msra.mxu0 %v6051_v43 }
 0x366   :  { %1977 = vmatprep.subr.bf16.mxu0 %v6059_v45 }
 0x367   :  { %1892 = vmatpush1.bf16.msra.mxu1 %v6054_v46 }
 0x368   :  { %1893 = vmatprep.subr.bf16.mxu1 %v6062_v48 }
 0x369   :  { %1978 = vmatpush1.bf16.msra.mxu0 %v6057_v47 }
 0x36a   :  { %1979 = vmatprep.subr.bf16.mxu0 %v6065_v49 }
 0x36b   :  { %1894 = vmatpush1.bf16.msra.mxu1 %v6060_v50 }
 0x36c   :  { %1906 = vmatprep.subr.bf16.mxu1 %v6068_v52 }
 0x36d   :  { %1980 = vmatpush1.bf16.msra.mxu0 %v6063_v51 }
 0x36e   :  { %1992 = vmatprep.subr.bf16.mxu0 %v6071_v53 }
 0x3d4   :  { %v870_v54 = vpop.xlane.xlu0 %869 }
 0x3d5   :  { %v877_v55 = vmul.f32 0.001953125, %v870_v54 }
 0x3d6   :  { %v875_v56 = vpop.xlane.xlu1 %874 }
 0x3d7   :  { %v878_v58 = vmul.f32 0.001953125, %v875_v56  ;;  %v899_v60 = vmul.f32 %v877_v55, %v877_v55  ;;  %v903_v27 = vsub.f32 %v7288_v1, %v877_v55  ;;  %v904_v29 = vsub.f32 %v7293_v6, %v877_v55 }
 0x3d8   :  { %v891_v59 = vpop.xlane.xlu0 %890  ;;  %v905_v30 = vsub.f32 %v7290_v2, %v877_v55  ;;  %v906_v31 = vsub.f32 %v7309_v22, %v877_v55 }
 0x3d9   :  { %v897_v62 = vmul.f32 0.001953125, %v891_v59  ;;  %v900_v3 = vmul.f32 %v878_v58, %v878_v58  ;;  %v907_v37 = vsub.f32 %v7297_v13, %v878_v58  ;;  %v908_v38 = vsub.f32 %v7305_v19, %v878_v58 }
 0x3da   :  { %v896_v63 = vpop.xlane.xlu1 %895  ;;  %v909_v39 = vsub.f32 %v7299_v14, %v878_v58  ;;  %v910_v40 = vsub.f32 %v7320_v28, %v878_v58 }
 0x3db   :  { %v901_v0 = vsub.f32 %v897_v62, %v899_v60  ;;  %v898_v4 = vmul.f32 0.001953125, %v896_v63 }
 0x3dd   :  { %v911_v5 = vadd.f32 1e-05, %v901_v0  ;;  %v902_v7 = vsub.f32 %v898_v4, %v900_v3 }
 0x3df   :  { %6678 = vrsqrt.f32 %v911_v5  ;;  %v912_v8 = vadd.f32 1e-05, %v902_v7 }
 0x3e1   :  { %6680 = vrsqrt.f32 %v912_v8 }
 0x3e9   :  { %v6679_v23 = vpop.eup %6678 }
 0x3ea   :  { %v937_v32 = vmul.f32 %v6679_v23, %v923_v15  ;;  %v936_v33 = vmul.f32 %v6679_v23, %v919_v18  ;;  %v939_v34 = vmul.f32 %v6679_v23, %v931_v17  ;;  %v938_v35 = vmul.f32 %v6679_v23, %v927_v21 }
 0x3eb   :  { %v6681_v36 = vpop.eup %6680 }
 0x3ec   :  { %v941_v1 = vmul.f32 %v6681_v36, %v923_v15  ;;  %v945_v41 = vmul.f32 %v937_v32, %v904_v29  ;;  %v940_v6 = vmul.f32 %v6681_v36, %v919_v18  ;;  %v944_v42 = vmul.f32 %v936_v33, %v903_v27 }
 0x3ed   :  { %v943_v2 = vmul.f32 %v6681_v36, %v931_v17  ;;  %v947_v43 = vmul.f32 %v939_v34, %v906_v31  ;;  %v942_v22 = vmul.f32 %v6681_v36, %v927_v21  ;;  %v946_v44 = vmul.f32 %v938_v35, %v905_v30 }
 0x3ee   :  { %v949_v45 = vmul.f32 %v941_v1, %v908_v38  ;;  %v7345_v46 = vadd.f32 %v960_v24, %v945_v41  ;;  %v948_v47 = vmul.f32 %v940_v6, %v907_v37  ;;  %v7347_v48 = vadd.f32 %v956_v25, %v944_v42 }
 0x3ef   :  { %v951_v13 = vmul.f32 %v943_v2, %v910_v40  ;;  %v7349_v19 = vadd.f32 %v968_v26, %v947_v43  ;;  %v950_v14 = vmul.f32 %v942_v22, %v909_v39  ;;  %v7351_v49 = vadd.f32 %v964_v20, %v946_v44 }
 0x3f0   :  { %v7353_v28 = vadd.f32 %v960_v24, %v949_v45  ;;  %v982_v50 = vand.u32 2147483647, %v7345_v46  ;;  %v7356_v51 = vadd.f32 %v956_v25, %v948_v47  ;;  %v981_v52 = vand.u32 2147483647, %v7347_v48 }
 0x3f1   :  { %v7359_v53 = vadd.f32 %v968_v26, %v951_v13  ;;  %v984_v54 = vand.u32 2147483647, %v7349_v19  ;;  %v7365_v16 = vadd.f32 %v964_v20, %v950_v14  ;;  %vm1038_vm5 = vcmp.ge.f32.partialorder %v7345_v46, 0.0 }
 0x3f2   :  { %v986_v55 = vand.u32 2147483647, %v7353_v28  ;;  %v990_v56 = vsub.f32 0.0, %v982_v50  ;;  %v985_v58 = vand.u32 2147483647, %v7356_v51  ;;  %v989_v59 = vsub.f32 0.0, %v981_v52 }
 0x3f3   :  { %v988_v60 = vand.u32 2147483647, %v7359_v53  ;;  %v992_v62 = vsub.f32 0.0, %v984_v54  ;;  %vm1037_vm6 = vcmp.ge.f32.partialorder %v7347_v48, 0.0  ;;  %vm1042_vm7 = vcmp.ge.f32.partialorder %v7353_v28, 0.0 }
 0x3f4   :  { %v994_v63 = vsub.f32 0.0, %v986_v55  ;;  %v999_v0 = vmul.f32 1.442695, %v990_v56  ;;  %v993_v3 = vsub.f32 0.0, %v985_v58  ;;  %v997_v4 = vmul.f32 1.442695, %v989_v59 }
 0x3f5   :  { %v996_v5 = vsub.f32 0.0, %v988_v60  ;;  %v1003_v7 = vmul.f32 1.442695, %v992_v62  ;;  %vm1041_vm8 = vcmp.ge.f32.partialorder %v7356_v51, 0.0  ;;  %vm1040_vm9 = vcmp.ge.f32.partialorder %v7349_v19, 0.0 }
 0x3f6   :  { %6682 = vpow2.f32 %v999_v0  ;;  %v1007_v8 = vmul.f32 1.442695, %v994_v63  ;;  %v1005_v11 = vmul.f32 1.442695, %v993_v3  ;;  %vm1044_vm10 = vcmp.ge.f32.partialorder %v7359_v53, 0.0 }
 0x3f7   :  { %6684 = vpow2.f32 %v997_v4  ;;  %v1011_v15 = vmul.f32 1.442695, %v996_v5  ;;  %v6066_v60 = vld [vmem:[#allocation8 + $0x200] ss:$16 sps:$4 sm:$0xff]   ;;  %v6077_v0 = vld [vmem:[#allocation8 + $0x22c] ss:$16 sps:$4 sm:$0xff]  }
 0x3f8   :  { %6686 = vpow2.f32 %v1007_v8  ;;  %v6072_v4 = vld [vmem:[#allocation8 + $0x220] ss:$16 sps:$4 sm:$0xff]   ;;  %v6075_v5 = vld [vmem:[#allocation8 + $0x228] ss:$16 sps:$4 sm:$0xff]   ;;  %vm1043_vm11 = vcmp.ge.f32.partialorder %v7365_v16, 0.0  ;;  %vm1039_vm12 = vcmp.ge.f32.partialorder %v7351_v49, 0.0 }
 0x3f9   :  { %6688 = vpow2.f32 %v1005_v11  ;;  %v6081_v8 = vld [vmem:[#allocation8 + $0x248] ss:$16 sps:$4 sm:$0xff]   ;;  %v987_v11 = vand.u32 2147483647, %v7365_v16 }
 0x3fa   :  { %6690 = vpow2.f32 %v1003_v7  ;;  %v6083_v7 = vld [vmem:[#allocation8 + $0x24c] ss:$16 sps:$4 sm:$0xff]  }
 0x3fb   :  { %6692 = vpow2.f32 %v1011_v15  ;;  %v6086_v15 = vld [vmem:[#allocation8 + $0x264] ss:$16 sps:$4 sm:$0xff]  }
 0x400   :  { %v6683_v18 = vpop.eup %6682 }
 0x401   :  { %v6685_v17 = vpop.eup %6684  ;;  %v1014_v21 = vadd.f32 1.0, %v6683_v18  ;;  %v6089_v18 = vld [vmem:[#allocation8 + $0x26c] ss:$16 sps:$4 sm:$0xff]  }
 0x402   :  { %v6687_v24 = vpop.eup %6686  ;;  %v1013_v25 = vadd.f32 1.0, %v6685_v17  ;;  %v983_v17 = vand.u32 2147483647, %v7351_v49 }
 0x403   :  { %v6689_v26 = vpop.eup %6688  ;;  %v1018_v23 = vadd.f32 1.0, %v6687_v24  ;;  %6694 = vrcp.f32 %v1014_v21  ;;  %v6084_v21 = vld [vmem:[#allocation8 + $0x260] ss:$16 sps:$4 sm:$0xff]   ;;  %v6087_v24 = vld [vmem:[#allocation8 + $0x268] ss:$16 sps:$4 sm:$0xff]  }
 0x404   :  { %v6691_v27 = vpop.eup %6690  ;;  %v1017_v29 = vadd.f32 1.0, %v6689_v26  ;;  %6696 = vrcp.f32 %v1013_v25  ;;  %v995_v25 = vsub.f32 0.0, %v987_v11  ;;  %v6092_v26 = vld [vmem:[#allocation8 + $0x284] ss:$16 sps:$4 sm:$0xff]  }
 0x405   :  { %v6693_v30 = vpop.eup %6692  ;;  %6698 = vrcp.f32 %v1018_v23  ;;  %v1016_v20 = vadd.f32 1.0, %v6691_v27  ;;  %v6095_v23 = vld [vmem:[#allocation8 + $0x28c] ss:$16 sps:$4 sm:$0xff]   ;;  %v991_v27 = vsub.f32 0.0, %v983_v17 }
 0x406   :  { %6700 = vrcp.f32 %v1017_v29  ;;  %v1020_v31 = vadd.f32 1.0, %v6693_v30  ;;  %v6090_v29 = vld [vmem:[#allocation8 + $0x280] ss:$16 sps:$4 sm:$0xff]   ;;  %v6093_v30 = vld [vmem:[#allocation8 + $0x288] ss:$16 sps:$4 sm:$0xff]  }
 0x407   :  { %6702 = vrcp.f32 %v1016_v20  ;;  %v1009_v20 = vmul.f32 1.442695, %v995_v25 }
 0x408   :  { %6704 = vrcp.f32 %v1020_v31  ;;  %v6098_v31 = vld [vmem:[#allocation8 + $0x2a4] ss:$16 sps:$4 sm:$0xff]  }
 0x409   :  { %6706 = vpow2.f32 %v1009_v20 }
 0x40d   :  { %v6695_v32 = vpop.eup %6694 }
 0x40e   :  { %v6697_v33 = vpop.eup %6696  ;;  %v1030_v34 = vmin.f32 %v6695_v32, 1.0  ;;  %v6101_v32 = vld [vmem:[#allocation8 + $0x2ac] ss:$16 sps:$4 sm:$0xff]  }
 0x40f   :  { %v6699_v35 = vpop.eup %6698  ;;  %v1029_v36 = vmin.f32 %v6697_v33, 1.0  ;;  %v1001_v33 = vmul.f32 1.442695, %v991_v27 }
 0x410   :  { %v6701_v37 = vpop.eup %6700  ;;  %v1034_v38 = vmin.f32 %v6699_v35, 1.0  ;;  %v1046_v39 = vsub.f32 1.0, %v1030_v34  ;;  %v6099_v35 = vld [vmem:[#allocation8 + $0x2a8] ss:$16 sps:$4 sm:$0xff]  }
 0x411   :  { %v6703_v40 = vpop.eup %6702  ;;  %v1033_v1 = vmin.f32 %v6701_v37, 1.0  ;;  %v1045_v41 = vsub.f32 1.0, %v1029_v36  ;;  %v6107_v37 = vld [vmem:[#allocation8 + $0x2cc] ss:$16 sps:$4 sm:$0xff]   ;;  %6708 = vpow2.f32 %v1001_v33 }
 0x412   :  { %v6705_v6 = vpop.eup %6704  ;;  %v1050_v42 = vsub.f32 1.0, %v1034_v38  ;;  %v1054_v2 = vsel %vm1038_vm5, %v1030_v34, %v1046_v39  ;;  %v1032_v43 = vmin.f32 %v6703_v40, 1.0  ;;  %v6096_v34 = vld [vmem:[#allocation8 + $0x2a0] ss:$16 sps:$4 sm:$0xff]   ;;  %v6105_v39 = vld [vmem:[#allocation8 + $0x2c8] ss:$16 sps:$4 sm:$0xff]  }
 0x413   :  { %v1049_v22 = vsub.f32 1.0, %v1033_v1  ;;  %v1053_v44 = vsel %vm1037_vm6, %v1029_v36, %v1045_v41  ;;  %v1036_v45 = vmin.f32 %v6705_v6, 1.0  ;;  %v7373_v14 = vmul.f32 %v1054_v2, %v7345_v46  ;;  %v6069_v46 = vld [vmem:[#allocation8 + $0x208] ss:$16 sps:$4 sm:$0xff]   ;;  %v6104_v36 = vld [vmem:[#allocation8 + $0x2c4] ss:$16 sps:$4 sm:$0xff]  }
 0x414   :  { %v1058_v47 = vsel %vm1042_vm7, %v1034_v38, %v1050_v42  ;;  %v1048_v13 = vsub.f32 1.0, %v1032_v43  ;;  %v7379_v55 = vmul.f32 %v1053_v44, %v7347_v48  ;;  %v6102_v38 = vld [vmem:[#allocation8 + $0x2c0] ss:$16 sps:$4 sm:$0xff]   ;;  %v6110_v40 = vld [vmem:[#allocation8 + $0x2e4] ss:$16 sps:$4 sm:$0xff]  }
 0x415   :  { %v7376_v50 = vmul.f32 %v1058_v47, %v7353_v28  ;;  %v1057_v52 = vsel %vm1041_vm8, %v1033_v1, %v1049_v22  ;;  %v1052_v54 = vsub.f32 1.0, %v1036_v45  ;;  %v6113_v1 = vld [vmem:[#allocation8 + $0x2ec] ss:$16 sps:$4 sm:$0xff]   ;;  %v6108_v41 = vld [vmem:[#allocation8 + $0x2e0] ss:$16 sps:$4 sm:$0xff]  }
 0x416   :  { %v7382_v56 = vmul.f32 %v1057_v52, %v7356_v51  ;;  %v1056_v58 = vsel %vm1040_vm9, %v1032_v43, %v1048_v13  ;;  %v6074_v51 = vld [vmem:[#allocation8 + $0x224] ss:$16 sps:$4 sm:$0xff]   ;;  %v6111_v6 = vld [vmem:[#allocation8 + $0x2e8] ss:$16 sps:$4 sm:$0xff]   ;;  %v6119_v2 = vld [vmem:[#allocation8 + $0x30c] ss:$16 sps:$4 sm:$0xff]   ;;  %v6707_v43 = vpop.eup %6706 }
 0x417   :  { %v1071_v59 = vpack.c.bf16 %v7376_v50, %v7373_v14  ;;  %v1060_v62 = vsel %vm1044_vm10, %v1036_v45, %v1052_v54  ;;  %v7390_v63 = vmul.f32 %v1056_v58, %v7349_v19  ;;  %v6080_v19 = vld [vmem:[#allocation8 + $0x244] ss:$16 sps:$4 sm:$0xff]   ;;  %v6114_v44 = vld [vmem:[#allocation8 + $0x300] ss:$16 sps:$4 sm:$0xff]   ;;  %v6117_v45 = vld [vmem:[#allocation8 + $0x308] ss:$16 sps:$4 sm:$0xff]  }
 0x418   :  { %v1070_v28 = vpack.c.bf16 %v7382_v56, %v7379_v55  ;;  %v7393_v48 = vmul.f32 %v1060_v62, %v7359_v53  ;;  %v6078_v53 = vld [vmem:[#allocation8 + $0x240] ss:$16 sps:$4 sm:$0xff]   ;;  %v6116_v42 = vld [vmem:[#allocation8 + $0x304] ss:$16 sps:$4 sm:$0xff]   ;;  %v6125_v13 = vld [vmem:[#allocation8 + $0x32c] ss:$16 sps:$4 sm:$0xff]  }
 0x419   :  { %1895 = vmatprep.mubr.bf16.mxu1 %v1071_v59  ;;  %1981 = vmatprep.mubr.bf16.mxu0 %v1071_v59  ;;  %v6122_v47 = vld [vmem:[#allocation8 + $0x324] ss:$16 sps:$4 sm:$0xff]   ;;  %v1019_v52 = vadd.f32 1.0, %v6707_v43  ;;  %v6120_v58 = vld [vmem:[#allocation8 + $0x320] ss:$16 sps:$4 sm:$0xff]  }
 0x41a   :  { %1896 = vmatmul.mubr.bf16.vlgmr.msra.gmra.mrb[4].mxu1 %v1070_v28  ;;  %1982 = vmatmul.mubr.bf16.vlgmr.msra.gmra.mrb[8].mxu0 %v1070_v28  ;;  %v1073_v3 = vpack.c.bf16 %v7393_v48, %v7390_v63  ;;  %v6123_v59 = vld [vmem:[#allocation8 + $0x328] ss:$16 sps:$4 sm:$0xff]   ;;  %v6126_v62 = vld [vmem:[#allocation8 + $0x340] ss:$16 sps:$4 sm:$0xff]   ;;  %v6176_v43 = vld [vmem:[#allocation10 + $0x44] ss:$16 sps:$4 sm:$0xff]  }
 0x41b   :  { %1907 = vmatpush1.bf16.msra.mxu1 %v6066_v60  ;;  %1993 = vmatpush1.bf16.msra.mxu0 %v6069_v46  ;;  %v6709_v22 = vpop.eup %6708  ;;  %v6128_v60 = vld [vmem:[#allocation8 + $0x344] ss:$16 sps:$4 sm:$0xff]   ;;  %v6131_v46 = vld [vmem:[#allocation8 + $0x34c] ss:$16 sps:$4 sm:$0xff]   ;;  %6710 = vrcp.f32 %v1019_v52  ;;  %v6129_v28 = vld [vmem:[#allocation8 + $0x348] ss:$16 sps:$4 sm:$0xff]  }
 0x41c   :  { %1938 = vmatprep.mubr.bf16.mxu1 %v1073_v3  ;;  %2024 = vmatprep.mubr.bf16.mxu0 %v1073_v3  ;;  %v1015_v54 = vadd.f32 1.0, %v6709_v22  ;;  %v6132_v3 = vld [vmem:[#allocation8 + $0x360] ss:$16 sps:$4 sm:$0xff]   ;;  %v6179_v22 = vld [vmem:[#allocation10 + $0x4c] ss:$16 sps:$4 sm:$0xff]  }
 0x41d   :  { %1908 = vmatprep.subr.bf16.mxu1 %v6074_v51  ;;  %1994 = vmatprep.subr.bf16.mxu0 %v6077_v0  ;;  %v6134_v51 = vld [vmem:[#allocation8 + $0x364] ss:$16 sps:$4 sm:$0xff]   ;;  %v6137_v0 = vld [vmem:[#allocation8 + $0x36c] ss:$16 sps:$4 sm:$0xff]   ;;  %v6180_v52 = vld [vmem:[#allocation10 + $0x60] ss:$16 sps:$4 sm:$0xff]  }
 0x41e   :  { %6712 = vrcp.f32 %v1015_v54  ;;  %v6183_v54 = vld [vmem:[#allocation10 + $0x68] ss:$16 sps:$4 sm:$0xff]  }
 0x41f   :  { %1909 = vmatpush1.bf16.msra.mxu1 %v6072_v4  ;;  %1995 = vmatpush1.bf16.msra.mxu0 %v6075_v5  ;;  %v6135_v4 = vld [vmem:[#allocation8 + $0x368] ss:$16 sps:$4 sm:$0xff]   ;;  %v6140_v5 = vld [vmem:[#allocation8 + $0x384] ss:$16 sps:$4 sm:$0xff]  }
 0x420   :  { %1910 = vmatprep.subr.bf16.mxu1 %v6080_v19  ;;  %1996 = vmatprep.subr.bf16.mxu0 %v6083_v7  ;;  %v6143_v19 = vld [vmem:[#allocation8 + $0x38c] ss:$16 sps:$4 sm:$0xff]  }
 0x423   :  { %1911 = vmatpush1.bf16.msra.mxu1 %v6078_v53  ;;  %1997 = vmatpush1.bf16.msra.mxu0 %v6081_v8  ;;  %v6138_v53 = vld [vmem:[#allocation8 + $0x380] ss:$16 sps:$4 sm:$0xff]   ;;  %v6141_v8 = vld [vmem:[#allocation8 + $0x388] ss:$16 sps:$4 sm:$0xff]  }
 0x424   :  { %1912 = vmatprep.subr.bf16.mxu1 %v6086_v15  ;;  %1998 = vmatprep.subr.bf16.mxu0 %v6089_v18  ;;  %v6146_v15 = vld [vmem:[#allocation8 + $0x3a4] ss:$16 sps:$4 sm:$0xff]   ;;  %v6149_v18 = vld [vmem:[#allocation8 + $0x3ac] ss:$16 sps:$4 sm:$0xff]  }
 0x425   :  { %v6711_v7 = vpop.eup %6710 }
 0x426   :  { %v1035_v17 = vmin.f32 %v6711_v7, 1.0  ;;  %v6206_v7 = vld [vmem:[#allocation10 + $0xe4] ss:$16 sps:$4 sm:$0xff]  }
 0x427   :  { %1913 = vmatpush1.bf16.msra.mxu1 %v6084_v21  ;;  %1999 = vmatpush1.bf16.msra.mxu0 %v6087_v24  ;;  %v6144_v21 = vld [vmem:[#allocation8 + $0x3a0] ss:$16 sps:$4 sm:$0xff]   ;;  %v6147_v24 = vld [vmem:[#allocation8 + $0x3a8] ss:$16 sps:$4 sm:$0xff]  }
 0x428   :  { %1914 = vmatprep.subr.bf16.mxu1 %v6092_v26  ;;  %2000 = vmatprep.subr.bf16.mxu0 %v6095_v23  ;;  %v6713_v11 = vpop.eup %6712  ;;  %v6152_v26 = vld [vmem:[#allocation8 + $0x3c4] ss:$16 sps:$4 sm:$0xff]   ;;  %v6155_v23 = vld [vmem:[#allocation8 + $0x3cc] ss:$16 sps:$4 sm:$0xff]   ;;  %v1051_v27 = vsub.f32 1.0, %v1035_v17 }
 0x429   :  { %v1031_v25 = vmin.f32 %v6713_v11, 1.0  ;;  %v6207_v11 = vld [vmem:[#allocation10 + $0xe8] ss:$16 sps:$4 sm:$0xff]  }
 0x42a   :  { %v1059_v33 = vsel %vm1043_vm11, %v1035_v17, %v1051_v27 }
 0x42b   :  { %1915 = vmatpush1.bf16.msra.mxu1 %v6090_v29  ;;  %2001 = vmatpush1.bf16.msra.mxu0 %v6093_v30  ;;  %v6150_v29 = vld [vmem:[#allocation8 + $0x3c0] ss:$16 sps:$4 sm:$0xff]   ;;  %v6153_v30 = vld [vmem:[#allocation8 + $0x3c8] ss:$16 sps:$4 sm:$0xff]   ;;  %v1047_v20 = vsub.f32 1.0, %v1031_v25 }
 0x42c   :  { %1916 = vmatprep.subr.bf16.mxu1 %v6098_v31  ;;  %2002 = vmatprep.subr.bf16.mxu0 %v6101_v32  ;;  %v6158_v31 = vld [vmem:[#allocation8 + $0x3e4] ss:$16 sps:$4 sm:$0xff]   ;;  %v6161_v32 = vld [vmem:[#allocation8 + $0x3ec] ss:$16 sps:$4 sm:$0xff]  }
 0x42f   :  { %1917 = vmatpush1.bf16.msra.mxu1 %v6096_v34  ;;  %2003 = vmatpush1.bf16.msra.mxu0 %v6099_v35  ;;  %v6156_v34 = vld [vmem:[#allocation8 + $0x3e0] ss:$16 sps:$4 sm:$0xff]   ;;  %v6159_v35 = vld [vmem:[#allocation8 + $0x3e8] ss:$16 sps:$4 sm:$0xff]  }
 0x430   :  { %1918 = vmatprep.subr.bf16.mxu1 %v6104_v36  ;;  %2004 = vmatprep.subr.bf16.mxu0 %v6107_v37  ;;  %v1055_v36 = vsel %vm1039_vm12, %v1031_v25, %v1047_v20  ;;  %v7402_v37 = vmul.f32 %v1059_v33, %v7365_v16  ;;  %v6168_v16 = vld [vmem:[#allocation10 + $0x20] ss:$16 sps:$4 sm:$0xff]  }
 0x433   :  { %1919 = vmatpush1.bf16.msra.mxu1 %v6102_v38  ;;  %2005 = vmatpush1.bf16.msra.mxu0 %v6105_v39  ;;  %v7405_v38 = vmul.f32 %v1055_v36, %v7351_v49  ;;  %v6171_v49 = vld [vmem:[#allocation10 + $0x28] ss:$16 sps:$4 sm:$0xff]  }
 0x434   :  { %1920 = vmatprep.subr.bf16.mxu1 %v6110_v40  ;;  %2006 = vmatprep.subr.bf16.mxu0 %v6113_v1  ;;  %v6162_v40 = vld [vmem:[#allocation10] ss:$16 sps:$4 sm:$0xff]   ;;  %v6164_v1 = vld [vmem:[#allocation10 + $0x4] ss:$16 sps:$4 sm:$0xff]  }
 0x435   :  { %v1072_v39 = vpack.c.bf16 %v7402_v37, %v7405_v38 }
 0x437   :  { %1921 = vmatpush1.bf16.msra.mxu1 %v6108_v41  ;;  %2007 = vmatpush1.bf16.msra.mxu0 %v6111_v6  ;;  %v6165_v41 = vld [vmem:[#allocation10 + $0x8] ss:$16 sps:$4 sm:$0xff]   ;;  %v6167_v6 = vld [vmem:[#allocation10 + $0xc] ss:$16 sps:$4 sm:$0xff]  }
 0x438   :  { %1922 = vmatprep.subr.bf16.mxu1 %v6116_v42  ;;  %2008 = vmatprep.subr.bf16.mxu0 %v6119_v2  ;;  %v6170_v42 = vld [vmem:[#allocation10 + $0x24] ss:$16 sps:$4 sm:$0xff]   ;;  %v6173_v2 = vld [vmem:[#allocation10 + $0x2c] ss:$16 sps:$4 sm:$0xff]  }
 0x43b   :  { %1923 = vmatpush1.bf16.msra.mxu1 %v6114_v44  ;;  %2009 = vmatpush1.bf16.msra.mxu0 %v6117_v45  ;;  %v6174_v44 = vld [vmem:[#allocation10 + $0x40] ss:$16 sps:$4 sm:$0xff]   ;;  %v6177_v45 = vld [vmem:[#allocation10 + $0x48] ss:$16 sps:$4 sm:$0xff]  }
 0x43c   :  { %1924 = vmatprep.subr.bf16.mxu1 %v6122_v47  ;;  %2010 = vmatprep.subr.bf16.mxu0 %v6125_v13  ;;  %v6182_v47 = vld [vmem:[#allocation10 + $0x64] ss:$16 sps:$4 sm:$0xff]   ;;  %v6185_v13 = vld [vmem:[#allocation10 + $0x6c] ss:$16 sps:$4 sm:$0xff]  }
 0x43f   :  { %1925 = vmatpush1.bf16.msra.mxu1 %v6120_v58  ;;  %2011 = vmatpush1.bf16.msra.mxu0 %v6123_v59  ;;  %v6188_v58 = vld [vmem:[#allocation10 + $0x84] ss:$16 sps:$4 sm:$0xff]   ;;  %v6191_v59 = vld [vmem:[#allocation10 + $0x8c] ss:$16 sps:$4 sm:$0xff]  }
 0x440   :  { %1926 = vmatprep.subr.bf16.mxu1 %v6128_v60  ;;  %2012 = vmatprep.subr.bf16.mxu0 %v6131_v46  ;;  %v6186_v60 = vld [vmem:[#allocation10 + $0x80] ss:$16 sps:$4 sm:$0xff]   ;;  %v6189_v46 = vld [vmem:[#allocation10 + $0x88] ss:$16 sps:$4 sm:$0xff]  }
 0x443   :  { %1927 = vmatpush1.bf16.msra.mxu1 %v6126_v62  ;;  %2013 = vmatpush1.bf16.msra.mxu0 %v6129_v28  ;;  %v6194_v62 = vld [vmem:[#allocation10 + $0xa4] ss:$16 sps:$4 sm:$0xff]   ;;  %v6197_v28 = vld [vmem:[#allocation10 + $0xac] ss:$16 sps:$4 sm:$0xff]  }
 0x444   :  { %1928 = vmatprep.subr.bf16.mxu1 %v6134_v51  ;;  %2014 = vmatprep.subr.bf16.mxu0 %v6137_v0  ;;  %v6192_v51 = vld [vmem:[#allocation10 + $0xa0] ss:$16 sps:$4 sm:$0xff]   ;;  %v6195_v0 = vld [vmem:[#allocation10 + $0xa8] ss:$16 sps:$4 sm:$0xff]  }
 0x447   :  { %1929 = vmatpush1.bf16.msra.mxu1 %v6132_v3  ;;  %2015 = vmatpush1.bf16.msra.mxu0 %v6135_v4  ;;  %v6200_v3 = vld [vmem:[#allocation10 + $0xc4] ss:$16 sps:$4 sm:$0xff]   ;;  %v6203_v4 = vld [vmem:[#allocation10 + $0xcc] ss:$16 sps:$4 sm:$0xff]  }
 0x448   :  { %1930 = vmatprep.subr.bf16.mxu1 %v6140_v5  ;;  %2016 = vmatprep.subr.bf16.mxu0 %v6143_v19  ;;  %v6198_v5 = vld [vmem:[#allocation10 + $0xc0] ss:$16 sps:$4 sm:$0xff]   ;;  %v6201_v19 = vld [vmem:[#allocation10 + $0xc8] ss:$16 sps:$4 sm:$0xff]  }
 0x44b   :  { %1931 = vmatpush1.bf16.msra.mxu1 %v6138_v53  ;;  %2017 = vmatpush1.bf16.msra.mxu0 %v6141_v8  ;;  %v6209_v53 = vld [vmem:[#allocation10 + $0xec] ss:$16 sps:$4 sm:$0xff]   ;;  %v6204_v8 = vld [vmem:[#allocation10 + $0xe0] ss:$16 sps:$4 sm:$0xff]  }
 0x44c   :  { %1932 = vmatprep.subr.bf16.mxu1 %v6146_v15  ;;  %2018 = vmatprep.subr.bf16.mxu0 %v6149_v18  ;;  %v1069_v15 = vld [vmem:[#allocation17 + $0x12] sm:$0xf] }
 0x44d   :  { %v1206_v18 = vrot.slane %v1069_v15, %v7244_v10  ;;  %v1214_v17 = vrot.slane %v1069_v15, %v7280_v57 }
 0x44f   :  { %1933 = vmatpush1.bf16.msra.mxu1 %v6144_v21  ;;  %2019 = vmatpush1.bf16.msra.mxu0 %v6147_v24  ;;  %v1210_v21 = vrot.slane %v1069_v15, %v7247_v12 }
 0x450   :  { %1934 = vmatprep.subr.bf16.mxu1 %v6152_v26  ;;  %2020 = vmatprep.subr.bf16.mxu0 %v6155_v23 }
 0x453   :  { %1935 = vmatpush1.bf16.msra.mxu1 %v6150_v29  ;;  %2021 = vmatpush1.bf16.msra.mxu0 %v6153_v30  ;;  %v1218_v29 = vrot.slane %v1069_v15, %v7285_v61  ;;  %v6225_v15 = vld [vmem:[#allocation10 + $0x148] ss:$16 sps:$4 sm:$0xff]  }
 0x454   :  { %1936 = vmatprep.subr.bf16.mxu1 %v6158_v31  ;;  %2022 = vmatprep.subr.bf16.mxu0 %v6161_v32 }
 0x457   :  { %1937 = vmatpush1.bf16.msra.mxu1 %v6156_v34  ;;  %2023 = vmatpush1.bf16.msra.mxu0 %v6159_v35 }
 0x458   :  { %2969 = vmatprep.subr.bf16.mxu1 %v6164_v1  ;;  %3055 = vmatprep.subr.bf16.mxu0 %v6167_v6 }
 0x45a   :  { %1939 = vmatmul.mubr.bf16.vlgmr.msra.gmra.mrb[4].mxu1 %v1072_v39  ;;  %2025 = vmatmul.mubr.bf16.vlgmr.msra.gmra.mrb[8].mxu0 %v1072_v39 }
 0x45b   :  { %2970 = vmatpush1.bf16.msra.mxu1 %v6162_v40  ;;  %3056 = vmatpush1.bf16.msra.mxu0 %v6165_v41 }
 0x45c   :  { %2971 = vmatprep.subr.bf16.mxu1 %v6170_v42  ;;  %3057 = vmatprep.subr.bf16.mxu0 %v6173_v2 }
 0x45f   :  { %2972 = vmatpush1.bf16.msra.mxu1 %v6168_v16  ;;  %3058 = vmatpush1.bf16.msra.mxu0 %v6171_v49 }
 0x460   :  { %2973 = vmatprep.subr.bf16.mxu1 %v6176_v43  ;;  %3059 = vmatprep.subr.bf16.mxu0 %v6179_v22 }
 0x463   :  { %2974 = vmatpush1.bf16.msra.mxu1 %v6174_v44  ;;  %3060 = vmatpush1.bf16.msra.mxu0 %v6177_v45 }
 0x464   :  { %2975 = vmatprep.subr.bf16.mxu1 %v6182_v47  ;;  %3061 = vmatprep.subr.bf16.mxu0 %v6185_v13 }
 0x467   :  { %2976 = vmatpush1.bf16.msra.mxu1 %v6180_v52  ;;  %3062 = vmatpush1.bf16.msra.mxu0 %v6183_v54 }
 0x468   :  { %2977 = vmatprep.subr.bf16.mxu1 %v6188_v58  ;;  %3063 = vmatprep.subr.bf16.mxu0 %v6191_v59 }
 0x46b   :  { %2978 = vmatpush1.bf16.msra.mxu1 %v6186_v60  ;;  %3064 = vmatpush1.bf16.msra.mxu0 %v6189_v46 }
 0x46c   :  { %2979 = vmatprep.subr.bf16.mxu1 %v6194_v62  ;;  %3065 = vmatprep.subr.bf16.mxu0 %v6197_v28 }
 0x46f   :  { %2980 = vmatpush1.bf16.msra.mxu1 %v6192_v51  ;;  %3066 = vmatpush1.bf16.msra.mxu0 %v6195_v0  ;;  %v6210_v51 = vld [vmem:[#allocation10 + $0x100] ss:$16 sps:$4 sm:$0xff]   ;;  %v6212_v0 = vld [vmem:[#allocation10 + $0x104] ss:$16 sps:$4 sm:$0xff]  }
 0x470   :  { %2981 = vmatprep.subr.bf16.mxu1 %v6200_v3  ;;  %3067 = vmatprep.subr.bf16.mxu0 %v6203_v4  ;;  %v6213_v3 = vld [vmem:[#allocation10 + $0x108] ss:$16 sps:$4 sm:$0xff]   ;;  %v6215_v4 = vld [vmem:[#allocation10 + $0x10c] ss:$16 sps:$4 sm:$0xff]  }
 0x473   :  { %2982 = vmatpush1.bf16.msra.mxu1 %v6198_v5  ;;  %3068 = vmatpush1.bf16.msra.mxu0 %v6201_v19  ;;  %v6218_v5 = vld [vmem:[#allocation10 + $0x124] ss:$16 sps:$4 sm:$0xff]   ;;  %v6221_v19 = vld [vmem:[#allocation10 + $0x12c] ss:$16 sps:$4 sm:$0xff]  }
 0x474   :  { %2983 = vmatprep.subr.bf16.mxu1 %v6206_v7  ;;  %3069 = vmatprep.subr.bf16.mxu0 %v6209_v53  ;;  %v6216_v7 = vld [vmem:[#allocation10 + $0x120] ss:$16 sps:$4 sm:$0xff]   ;;  %v6219_v53 = vld [vmem:[#allocation10 + $0x128] ss:$16 sps:$4 sm:$0xff]  }
 0x477   :  { %2984 = vmatpush1.bf16.msra.mxu1 %v6204_v8  ;;  %3070 = vmatpush1.bf16.msra.mxu0 %v6207_v11  ;;  %v6224_v8 = vld [vmem:[#allocation10 + $0x144] ss:$16 sps:$4 sm:$0xff]   ;;  %v6222_v11 = vld [vmem:[#allocation10 + $0x140] ss:$16 sps:$4 sm:$0xff]  }
 0x478   :  { %2985 = vmatprep.subr.bf16.mxu1 %v6212_v0  ;;  %3071 = vmatprep.subr.bf16.mxu0 %v6215_v4 }
 0x47b   :  { %2986 = vmatpush1.bf16.msra.mxu1 %v6210_v51  ;;  %3072 = vmatpush1.bf16.msra.mxu0 %v6213_v3 }
 0x47c   :  { %2987 = vmatprep.subr.bf16.mxu1 %v6218_v5  ;;  %3073 = vmatprep.subr.bf16.mxu0 %v6221_v19  ;;  %v2035_v19 = vld [vmem:[#allocation17 + $0x16] sm:$0xf] }
 0x47f   :  { %2988 = vmatpush1.bf16.msra.mxu1 %v6216_v7  ;;  %3074 = vmatpush1.bf16.msra.mxu0 %v6219_v53  ;;  %v2036_v7 = vld [vmem:[#allocation17 + $0x1a] sm:$0xf]  ;;  %v2093_v53 = vrot.slane %v2035_v19, %v7247_v12 }
 0x480   :  { %2989 = vmatprep.subr.bf16.mxu1 %v6224_v8  ;;  %v2089_v8 = vrot.slane %v2035_v19, %v7244_v10 }
 0x483   :  { %2990 = vmatpush1.bf16.msra.mxu1 %v6222_v11  ;;  %v2101_v11 = vrot.slane %v2035_v19, %v7285_v61 }
 0x52d   :  { %v1940_v24 = vpop.f32.mrb[4].mxu1  ;;  %v2026_v25 = vpop.f32.mrb[8].mxu0 }
 0x52e   :  { %v7412_v26 = vadd.f32 %v1940_v24, %v1206_v18  ;;  %v7414_v23 = vadd.f32 %v2026_v25, %v1214_v17  ;;  %v1942_v27 = vpop.f32.mrb[5].mxu1  ;;  %v2028_v30 = vpop.f32.mrb[9].mxu0  ;;  %v6228_v24 = vld [vmem:[#allocation10 + $0x160] ss:$16 sps:$4 sm:$0xff]   ;;  %v6231_v25 = vld [vmem:[#allocation10 + $0x168] ss:$16 sps:$4 sm:$0xff]  }
 0x52f   :  { %v7417_v20 = vadd.f32 %v1942_v27, %v1210_v21  ;;  %v1944_v31 = vpop.f32.mrb[6].mxu1  ;;  %v2030_v32 = vpop.f32.mrb[10].mxu0  ;;  %v7433_v42 = vadd.f32 %v2028_v30, %v1218_v29  ;;  %v6236_v27 = vld [vmem:[#allocation10 + $0x184] ss:$16 sps:$4 sm:$0xff]   ;;  %v6234_v30 = vld [vmem:[#allocation10 + $0x180] ss:$16 sps:$4 sm:$0xff]  }
 0x530   :  { %v2049_v33 = vmul.f32 %v7412_v26, %v7412_v26  ;;  %v7421_v34 = vadd.f32 %v1944_v31, %v1206_v18  ;;  %v7423_v35 = vadd.f32 %v2030_v32, %v1214_v17  ;;  %v1946_v36 = vpop.f32.mrb[7].mxu1  ;;  %v2032_v39 = vpop.f32.mrb[11].mxu0  ;;  %v2051_v6 = vmul.f32 %v7414_v23, %v7414_v23  ;;  %v6227_v18 = vld [vmem:[#allocation10 + $0x14c] ss:$16 sps:$4 sm:$0xff]   ;;  %v6230_v17 = vld [vmem:[#allocation10 + $0x164] ss:$16 sps:$4 sm:$0xff]  }
 0x531   :  { %v2037_v40 = vadd.f32 %v7417_v20, %v7412_v26  ;;  %v2050_v1 = vmul.f32 %v7417_v20, %v7417_v20  ;;  %v7429_v41 = vadd.f32 %v1946_v36, %v1210_v21  ;;  %v7444_v45 = vadd.f32 %v2032_v39, %v1218_v29  ;;  %v6233_v21 = vld [vmem:[#allocation10 + $0x16c] ss:$16 sps:$4 sm:$0xff]   ;;  %3075 = vmatprep.subr.bf16.mxu0 %v6227_v18  ;;  %v6237_v31 = vld [vmem:[#allocation10 + $0x188] ss:$16 sps:$4 sm:$0xff]   ;;  %v6242_v32 = vld [vmem:[#allocation10 + $0x1a4] ss:$16 sps:$4 sm:$0xff]  }
 0x532   :  { %v2053_v2 = vmul.f32 %v7421_v34, %v7421_v34  ;;  %v2055_v44 = vmul.f32 %v7423_v35, %v7423_v35  ;;  %v2052_v59 = vmul.f32 %v7433_v42, %v7433_v42  ;;  %3076 = vmatpush1.bf16.msra.mxu0 %v6225_v15  ;;  %2991 = vmatprep.subr.bf16.mxu1 %v6230_v17  ;;  %v6239_v29 = vld [vmem:[#allocation10 + $0x18c] ss:$16 sps:$4 sm:$0xff]   ;;  %v6240_v36 = vld [vmem:[#allocation10 + $0x1a0] ss:$16 sps:$4 sm:$0xff]   ;;  %v6243_v39 = vld [vmem:[#allocation10 + $0x1a8] ss:$16 sps:$4 sm:$0xff]  }
 0x533   :  { %v2042_v16 = vadd.f32 %v7429_v41, %v7421_v34  ;;  %v2054_v49 = vmul.f32 %v7429_v41, %v7429_v41  ;;  %v2038_v43 = vadd.f32 %v7414_v23, %v2037_v40  ;;  %v2057_v22 = vadd.f32 %v2050_v1, %v2049_v33  ;;  %3077 = vmatprep.subr.bf16.mxu0 %v6233_v21  ;;  %v6245_v33 = vld [vmem:[#allocation10 + $0x1ac] ss:$16 sps:$4 sm:$0xff]   ;;  %v6248_v40 = vld [vmem:[#allocation10 + $0x1c4] ss:$16 sps:$4 sm:$0xff]  }
 0x534   :  { %v2056_v62 = vmul.f32 %v7444_v45, %v7444_v45  ;;  %2992 = vmatpush1.bf16.msra.mxu1 %v6228_v24  ;;  %v6251_v1 = vld [vmem:[#allocation10 + $0x1cc] ss:$16 sps:$4 sm:$0xff]   ;;  %v2097_v15 = vrot.slane %v2035_v19, %v7280_v57  ;;  %v2130_v18 = vrot.slane %v2036_v7, %v7247_v12  ;;  %v2126_v17 = vrot.slane %v2036_v7, %v7244_v10 }
 0x535   :  { %v2039_v47 = vadd.f32 %v7433_v42, %v2038_v43  ;;  %v2043_v13 = vadd.f32 %v7423_v35, %v2042_v16  ;;  %v2058_v52 = vadd.f32 %v2057_v22, %v2051_v6  ;;  %v2062_v54 = vadd.f32 %v2054_v49, %v2053_v2  ;;  %2993 = vmatprep.subr.bf16.mxu1 %v6236_v27  ;;  %v6246_v6 = vld [vmem:[#allocation10 + $0x1c0] ss:$16 sps:$4 sm:$0xff]   ;;  %v6249_v2 = vld [vmem:[#allocation10 + $0x1c8] ss:$16 sps:$4 sm:$0xff]   ;;  %v6254_v16 = vld [vmem:[#allocation10 + $0x1e4] ss:$16 sps:$4 sm:$0xff]  }
 0x536   :  { %3078 = vmatpush1.bf16.msra.mxu0 %v6231_v25  ;;  %v6257_v49 = vld [vmem:[#allocation10 + $0x1ec] ss:$16 sps:$4 sm:$0xff]   ;;  %v6252_v43 = vld [vmem:[#allocation10 + $0x1e0] ss:$16 sps:$4 sm:$0xff]   ;;  %v6255_v22 = vld [vmem:[#allocation10 + $0x1e8] ss:$16 sps:$4 sm:$0xff]   ;;  %v2138_v21 = vrot.slane %v2036_v7, %v7285_v61  ;;  %v2134_v24 = vrot.slane %v2036_v7, %v7280_v57 }
 0x537   :  { %2040 = vadd.xlane.f32.xlu0 %v2039_v47  ;;  %v2044_v58 = vadd.f32 %v7444_v45, %v2043_v13  ;;  %v2063_v60 = vadd.f32 %v2062_v54, %v2055_v44  ;;  %v2059_v46 = vadd.f32 %v2058_v52, %v2052_v59  ;;  %3079 = vmatprep.subr.bf16.mxu0 %v6239_v29  ;;  %v6260_v44 = vld [vmem:[#allocation10 + $0x204] ss:$16 sps:$4 sm:$0xff]   ;;  %v6263_v47 = vld [vmem:[#allocation10 + $0x20c] ss:$16 sps:$4 sm:$0xff]  }
 0x538   :  { %2994 = vmatpush1.bf16.msra.mxu1 %v6234_v30 }
 0x539   :  { %2045 = vadd.xlane.f32.xlu1 %v2044_v58  ;;  %v2064_v28 = vadd.f32 %v2063_v60, %v2056_v62  ;;  %2995 = vmatprep.subr.bf16.mxu1 %v6242_v32 }
 0x53a   :  { %3080 = vmatpush1.bf16.msra.mxu0 %v6237_v31 }
 0x53b   :  { %2060 = vadd.xlane.f32.xlu0 %v2059_v46  ;;  %3081 = vmatprep.subr.bf16.mxu0 %v6245_v33 }
 0x53c   :  { %2996 = vmatpush1.bf16.msra.mxu1 %v6240_v36 }
 0x53d   :  { %2065 = vadd.xlane.f32.xlu1 %v2064_v28  ;;  %2997 = vmatprep.subr.bf16.mxu1 %v6248_v40 }
 0x53e   :  { %3082 = vmatpush1.bf16.msra.mxu0 %v6243_v39 }
 0x53f   :  { %3083 = vmatprep.subr.bf16.mxu0 %v6251_v1 }
 0x540   :  { %2998 = vmatpush1.bf16.msra.mxu1 %v6246_v6 }
 0x541   :  { %2999 = vmatprep.subr.bf16.mxu1 %v6254_v16 }
 0x542   :  { %3084 = vmatpush1.bf16.msra.mxu0 %v6249_v2 }
 0x543   :  { %3085 = vmatprep.subr.bf16.mxu0 %v6257_v49 }
 0x544   :  { %3000 = vmatpush1.bf16.msra.mxu1 %v6252_v43 }
 0x545   :  { %3012 = vmatprep.subr.bf16.mxu1 %v6260_v44 }
 0x546   :  { %3086 = vmatpush1.bf16.msra.mxu0 %v6255_v22 }
 0x547   :  { %3098 = vmatprep.subr.bf16.mxu0 %v6263_v47 }
 0x5c4   :  { %v2041_v13 = vpop.xlane.xlu0 %2040 }
 0x5c5   :  { %v2047_v52 = vmul.f32 0.001953125, %v2041_v13 }
 0x5c6   :  { %v2046_v54 = vpop.xlane.xlu1 %2045 }
 0x5c7   :  { %v2048_v58 = vmul.f32 0.001953125, %v2046_v54  ;;  %v2069_v60 = vmul.f32 %v2047_v52, %v2047_v52  ;;  %v2073_v27 = vsub.f32 %v7412_v26, %v2047_v52  ;;  %v2074_v29 = vsub.f32 %v7417_v20, %v2047_v52 }
 0x5c8   :  { %v2061_v59 = vpop.xlane.xlu0 %2060  ;;  %v2075_v30 = vsub.f32 %v7414_v23, %v2047_v52  ;;  %v2076_v31 = vsub.f32 %v7433_v42, %v2047_v52 }
 0x5c9   :  { %v2067_v46 = vmul.f32 0.001953125, %v2061_v59  ;;  %v2070_v51 = vmul.f32 %v2048_v58, %v2048_v58  ;;  %v2077_v1 = vsub.f32 %v7421_v34, %v2048_v58  ;;  %v2078_v6 = vsub.f32 %v7429_v41, %v2048_v58 }
 0x5ca   :  { %v2066_v62 = vpop.xlane.xlu1 %2065  ;;  %v2079_v2 = vsub.f32 %v7423_v35, %v2048_v58  ;;  %v2080_v16 = vsub.f32 %v7444_v45, %v2048_v58 }
 0x5cb   :  { %v2071_v28 = vsub.f32 %v2067_v46, %v2069_v60  ;;  %v2068_v0 = vmul.f32 0.001953125, %v2066_v62 }
 0x5cd   :  { %v2081_v3 = vadd.f32 1e-05, %v2071_v28  ;;  %v2072_v4 = vsub.f32 %v2068_v0, %v2070_v51 }
 0x5cf   :  { %6714 = vrsqrt.f32 %v2081_v3  ;;  %v2082_v5 = vadd.f32 1e-05, %v2072_v4 }
 0x5d1   :  { %6716 = vrsqrt.f32 %v2082_v5  ;;  %v6258_v5 = vld [vmem:[#allocation10 + $0x200] ss:$16 sps:$4 sm:$0xff]  }
 0x5d9   :  { %v6715_v25 = vpop.eup %6714 }
 0x5da   :  { %v2107_v32 = vmul.f32 %v6715_v25, %v2093_v53  ;;  %v2106_v33 = vmul.f32 %v6715_v25, %v2089_v8  ;;  %v2109_v36 = vmul.f32 %v6715_v25, %v2101_v11  ;;  %v2108_v39 = vmul.f32 %v6715_v25, %v2097_v15 }
 0x5db   :  { %v6717_v40 = vpop.eup %6716 }
 0x5dc   :  { %v2111_v26 = vmul.f32 %v6717_v40, %v2093_v53  ;;  %v2115_v49 = vmul.f32 %v2107_v32, %v2074_v29  ;;  %v2110_v20 = vmul.f32 %v6717_v40, %v2089_v8  ;;  %v2114_v43 = vmul.f32 %v2106_v33, %v2073_v27  ;;  %v6266_v29 = vld [vmem:[#allocation10 + $0x224] ss:$16 sps:$4 sm:$0xff]   ;;  %v6264_v33 = vld [vmem:[#allocation10 + $0x220] ss:$16 sps:$4 sm:$0xff]  }
 0x5dd   :  { %v2113_v23 = vmul.f32 %v6717_v40, %v2101_v11  ;;  %v2117_v22 = vmul.f32 %v2109_v36, %v2076_v31  ;;  %v2112_v42 = vmul.f32 %v6717_v40, %v2097_v15  ;;  %v2116_v44 = vmul.f32 %v2108_v39, %v2075_v30  ;;  %v6261_v11 = vld [vmem:[#allocation10 + $0x208] ss:$16 sps:$4 sm:$0xff]   ;;  %v6269_v30 = vld [vmem:[#allocation10 + $0x22c] ss:$16 sps:$4 sm:$0xff]   ;;  %v6272_v40 = vld [vmem:[#allocation10 + $0x244] ss:$16 sps:$4 sm:$0xff]  }
 0x5de   :  { %v2119_v47 = vmul.f32 %v2111_v26, %v2078_v6  ;;  %v2144_v13 = vadd.f32 %v2130_v18, %v2115_v49  ;;  %v2118_v52 = vmul.f32 %v2110_v20, %v2077_v1  ;;  %v2143_v54 = vadd.f32 %v2126_v17, %v2114_v43  ;;  %v6267_v36 = vld [vmem:[#allocation10 + $0x228] ss:$16 sps:$4 sm:$0xff]   ;;  %v6275_v1 = vld [vmem:[#allocation10 + $0x24c] ss:$16 sps:$4 sm:$0xff]   ;;  %v6270_v6 = vld [vmem:[#allocation10 + $0x240] ss:$16 sps:$4 sm:$0xff]  }
 0x5df   :  { %v2121_v59 = vmul.f32 %v2113_v23, %v2080_v16  ;;  %v2146_v34 = vadd.f32 %v2138_v21, %v2117_v22  ;;  %v2120_v60 = vmul.f32 %v2112_v42, %v2079_v2  ;;  %v2145_v41 = vadd.f32 %v2134_v24, %v2116_v44  ;;  %v6273_v2 = vld [vmem:[#allocation10 + $0x248] ss:$16 sps:$4 sm:$0xff]   ;;  %v6278_v16 = vld [vmem:[#allocation10 + $0x264] ss:$16 sps:$4 sm:$0xff]   ;;  %v6281_v26 = vld [vmem:[#allocation10 + $0x26c] ss:$16 sps:$4 sm:$0xff]  }
 0x5e0   :  { %v2148_v46 = vadd.f32 %v2130_v18, %v2119_v47  ;;  %vm2152_vm13 = vcmp.gt.f32.partialorder %v2144_v13, 0.0  ;;  %v2160_v35 = vmul.f32 0.01, %v2144_v13  ;;  %v2147_v45 = vadd.f32 %v2126_v17, %v2118_v52  ;;  %v6276_v49 = vld [vmem:[#allocation10 + $0x260] ss:$16 sps:$4 sm:$0xff]  }
 0x5e1   :  { %vm2151_vm14 = vcmp.gt.f32.partialorder %v2143_v54, 0.0  ;;  %v2159_v58 = vmul.f32 0.01, %v2143_v54  ;;  %v2150_v62 = vadd.f32 %v2138_v21, %v2121_v59  ;;  %vm2154_vm1 = vcmp.gt.f32.partialorder %v2146_v34, 0.0  ;;  %v6279_v20 = vld [vmem:[#allocation10 + $0x268] ss:$16 sps:$4 sm:$0xff]  }
 0x5e2   :  { %vm2156_vm15 = vcmp.gt.f32.partialorder %v2148_v46, 0.0  ;;  %v2164_v28 = vmul.f32 0.01, %v2148_v46  ;;  %vm2155_vm0 = vcmp.gt.f32.partialorder %v2147_v45, 0.0  ;;  %v2168_v51 = vsel %vm2152_vm13, %v2144_v13, %v2160_v35  ;;  %v6284_v43 = vld [vmem:[#allocation10 + $0x284] ss:$16 sps:$4 sm:$0xff]  }
 0x5e3   :  { %v2163_v0 = vmul.f32 0.01, %v2147_v45  ;;  %vm2158_vm2 = vcmp.gt.f32.partialorder %v2150_v62, 0.0  ;;  %v2162_v3 = vmul.f32 0.01, %v2146_v34  ;;  %v2167_v19 = vsel %vm2151_vm14, %v2143_v54, %v2159_v58 }
 0x5e4   :  { %v2172_v4 = vsel %vm2156_vm15, %v2148_v46, %v2164_v28  ;;  %v2166_v7 = vmul.f32 0.01, %v2150_v62  ;;  %v2149_v53 = vadd.f32 %v2134_v24, %v2120_v60  ;;  %vm2153_vm3 = vcmp.gt.f32.partialorder %v2145_v41, 0.0  ;;  %v6287_v23 = vld [vmem:[#allocation10 + $0x28c] ss:$16 sps:$4 sm:$0xff]  }
 0x5e5   :  { %v2177_v8 = vpack.c.bf16 %v2172_v4, %v2168_v51  ;;  %v2171_v15 = vsel %vm2155_vm0, %v2147_v45, %v2163_v0  ;;  %v2161_v18 = vmul.f32 0.01, %v2145_v41  ;;  %v2170_v27 = vsel %vm2154_vm1, %v2146_v34, %v2162_v3  ;;  %v6282_v22 = vld [vmem:[#allocation10 + $0x280] ss:$16 sps:$4 sm:$0xff]   ;;  %v6285_v42 = vld [vmem:[#allocation10 + $0x288] ss:$16 sps:$4 sm:$0xff]  }
 0x5e6   :  { %v2176_v17 = vpack.c.bf16 %v2171_v15, %v2167_v19  ;;  %v2174_v21 = vsel %vm2158_vm2, %v2150_v62, %v2166_v7  ;;  %vm2157_vm4 = vcmp.gt.f32.partialorder %v2149_v53, 0.0  ;;  %v2165_v25 = vmul.f32 0.01, %v2149_v53  ;;  %v6290_v44 = vld [vmem:[#allocation10 + $0x2a4] ss:$16 sps:$4 sm:$0xff]  }
 0x5e7   :  { %3001 = vmatprep.mubr.bf16.mxu1 %v2177_v8  ;;  %3087 = vmatprep.mubr.bf16.mxu0 %v2177_v8  ;;  %v2179_v31 = vpack.c.bf16 %v2174_v21, %v2170_v27  ;;  %v2169_v32 = vsel %vm2153_vm3, %v2145_v41, %v2161_v18  ;;  %v6293_v47 = vld [vmem:[#allocation10 + $0x2ac] ss:$16 sps:$4 sm:$0xff]   ;;  %v6288_v13 = vld [vmem:[#allocation10 + $0x2a0] ss:$16 sps:$4 sm:$0xff]   ;;  %v6291_v52 = vld [vmem:[#allocation10 + $0x2a8] ss:$16 sps:$4 sm:$0xff]  }
 0x5e8   :  { %3002 = vmatmul.mubr.bf16.vlgmr.msra.gmra.mrb[8].mxu1 %v2176_v17  ;;  %3088 = vmatmul.mubr.bf16.vlgmr.msra.gmra.mrb[12].mxu0 %v2176_v17  ;;  %v2173_v24 = vsel %vm2157_vm4, %v2149_v53, %v2165_v25  ;;  %v6296_v54 = vld [vmem:[#allocation10 + $0x2c4] ss:$16 sps:$4 sm:$0xff]   ;;  %v6299_v59 = vld [vmem:[#allocation10 + $0x2cc] ss:$16 sps:$4 sm:$0xff]   ;;  %v6294_v34 = vld [vmem:[#allocation10 + $0x2c0] ss:$16 sps:$4 sm:$0xff]  }
 0x5e9   :  { %3013 = vmatpush1.bf16.msra.mxu1 %v6258_v5  ;;  %3099 = vmatpush1.bf16.msra.mxu0 %v6261_v11  ;;  %v7470_v39 = vpack.c.bf16 %v2173_v24, %v2169_v32  ;;  %v6297_v60 = vld [vmem:[#allocation10 + $0x2c8] ss:$16 sps:$4 sm:$0xff]   ;;  %v6302_v41 = vld [vmem:[#allocation10 + $0x2e4] ss:$16 sps:$4 sm:$0xff]   ;;  %v6305_v46 = vld [vmem:[#allocation10 + $0x2ec] ss:$16 sps:$4 sm:$0xff]  }
 0x5ea   :  { %3044 = vmatprep.mubr.bf16.mxu1 %v2179_v31  ;;  %3130 = vmatprep.mubr.bf16.mxu0 %v2179_v31  ;;  %v6300_v35 = vld [vmem:[#allocation10 + $0x2e0] ss:$16 sps:$4 sm:$0xff]   ;;  %v6303_v45 = vld [vmem:[#allocation10 + $0x2e8] ss:$16 sps:$4 sm:$0xff]   ;;  %v6308_v58 = vld [vmem:[#allocation10 + $0x304] ss:$16 sps:$4 sm:$0xff]  }
 0x5eb   :  { %3014 = vmatprep.subr.bf16.mxu1 %v6266_v29  ;;  %3100 = vmatprep.subr.bf16.mxu0 %v6269_v30  ;;  %v6311_v62 = vld [vmem:[#allocation10 + $0x30c] ss:$16 sps:$4 sm:$0xff]   ;;  %v6306_v28 = vld [vmem:[#allocation10 + $0x300] ss:$16 sps:$4 sm:$0xff]   ;;  %v6309_v51 = vld [vmem:[#allocation10 + $0x308] ss:$16 sps:$4 sm:$0xff]  }
 0x5ec   :  { %v6314_v0 = vld [vmem:[#allocation10 + $0x324] ss:$16 sps:$4 sm:$0xff]   ;;  %v6317_v3 = vld [vmem:[#allocation10 + $0x32c] ss:$16 sps:$4 sm:$0xff]   ;;  %v6312_v4 = vld [vmem:[#allocation10 + $0x320] ss:$16 sps:$4 sm:$0xff]  }
 0x5ed   :  { %3015 = vmatpush1.bf16.msra.mxu1 %v6264_v33  ;;  %3101 = vmatpush1.bf16.msra.mxu0 %v6267_v36  ;;  %v6315_v5 = vld [vmem:[#allocation10 + $0x328] ss:$16 sps:$4 sm:$0xff]   ;;  %v6320_v19 = vld [vmem:[#allocation10 + $0x344] ss:$16 sps:$4 sm:$0xff]   ;;  %v6323_v7 = vld [vmem:[#allocation10 + $0x34c] ss:$16 sps:$4 sm:$0xff]  }
 0x5ee   :  { %3016 = vmatprep.subr.bf16.mxu1 %v6272_v40  ;;  %3102 = vmatprep.subr.bf16.mxu0 %v6275_v1  ;;  %v6318_v53 = vld [vmem:[#allocation10 + $0x340] ss:$16 sps:$4 sm:$0xff]   ;;  %v6321_v8 = vld [vmem:[#allocation10 + $0x348] ss:$16 sps:$4 sm:$0xff]   ;;  %v6326_v11 = vld [vmem:[#allocation10 + $0x364] ss:$16 sps:$4 sm:$0xff]  }
 0x5ef   :  { %v6329_v15 = vld [vmem:[#allocation10 + $0x36c] ss:$16 sps:$4 sm:$0xff]   ;;  %v6324_v18 = vld [vmem:[#allocation10 + $0x360] ss:$16 sps:$4 sm:$0xff]   ;;  %v6327_v17 = vld [vmem:[#allocation10 + $0x368] ss:$16 sps:$4 sm:$0xff]  }
 0x5f0   :  { %v6332_v21 = vld [vmem:[#allocation10 + $0x384] ss:$16 sps:$4 sm:$0xff]   ;;  %v6335_v25 = vld [vmem:[#allocation10 + $0x38c] ss:$16 sps:$4 sm:$0xff]   ;;  %v6330_v27 = vld [vmem:[#allocation10 + $0x380] ss:$16 sps:$4 sm:$0xff]  }
 0x5f1   :  { %3017 = vmatpush1.bf16.msra.mxu1 %v6270_v6  ;;  %3103 = vmatpush1.bf16.msra.mxu0 %v6273_v2  ;;  %v6333_v29 = vld [vmem:[#allocation10 + $0x388] ss:$16 sps:$4 sm:$0xff]   ;;  %v6338_v30 = vld [vmem:[#allocation10 + $0x3a4] ss:$16 sps:$4 sm:$0xff]   ;;  %v6341_v31 = vld [vmem:[#allocation10 + $0x3ac] ss:$16 sps:$4 sm:$0xff]  }
 0x5f2   :  { %3018 = vmatprep.subr.bf16.mxu1 %v6278_v16  ;;  %3104 = vmatprep.subr.bf16.mxu0 %v6281_v26  ;;  %v6336_v32 = vld [vmem:[#allocation10 + $0x3a0] ss:$16 sps:$4 sm:$0xff]   ;;  %v6339_v24 = vld [vmem:[#allocation10 + $0x3a8] ss:$16 sps:$4 sm:$0xff]   ;;  %v6344_v33 = vld [vmem:[#allocation10 + $0x3c4] ss:$16 sps:$4 sm:$0xff]  }
 0x5f3   :  { %v6347_v36 = vld [vmem:[#allocation10 + $0x3cc] ss:$16 sps:$4 sm:$0xff]   ;;  %v6342_v40 = vld [vmem:[#allocation10 + $0x3c0] ss:$16 sps:$4 sm:$0xff]   ;;  %v6345_v1 = vld [vmem:[#allocation10 + $0x3c8] ss:$16 sps:$4 sm:$0xff]  }
 0x5f4   :  { %v6350_v6 = vld [vmem:[#allocation10 + $0x3e4] ss:$16 sps:$4 sm:$0xff]   ;;  %v6353_v2 = vld [vmem:[#allocation10 + $0x3ec] ss:$16 sps:$4 sm:$0xff]   ;;  %v6348_v16 = vld [vmem:[#allocation10 + $0x3e0] ss:$16 sps:$4 sm:$0xff]  }
 0x5f5   :  { %3019 = vmatpush1.bf16.msra.mxu1 %v6276_v49  ;;  %3105 = vmatpush1.bf16.msra.mxu0 %v6279_v20  ;;  %v6351_v26 = vld [vmem:[#allocation10 + $0x3e8] ss:$16 sps:$4 sm:$0xff]   ;;  %v6356_v20 = vld [vmem:[#allocation11 + $0x4] ss:$8 sps:$4 sm:$0xff]  }
 0x5f6   :  { %3020 = vmatprep.subr.bf16.mxu1 %v6284_v43  ;;  %3106 = vmatprep.subr.bf16.mxu0 %v6287_v23  ;;  %v6354_v49 = vld [vmem:[#allocation11] ss:$8 sps:$4 sm:$0xff]   ;;  %v6359_v43 = vld [vmem:[#allocation11 + $0x14] ss:$8 sps:$4 sm:$0xff]   ;;  %v6357_v23 = vld [vmem:[#allocation11 + $0x10] ss:$8 sps:$4 sm:$0xff]  }
 0x5f9   :  { %3021 = vmatpush1.bf16.msra.mxu1 %v6282_v22  ;;  %3107 = vmatpush1.bf16.msra.mxu0 %v6285_v42  ;;  %v6362_v22 = vld [vmem:[#allocation11 + $0x24] ss:$8 sps:$4 sm:$0xff]   ;;  %v6360_v42 = vld [vmem:[#allocation11 + $0x20] ss:$8 sps:$4 sm:$0xff]  }
 0x5fa   :  { %3022 = vmatprep.subr.bf16.mxu1 %v6290_v44  ;;  %3108 = vmatprep.subr.bf16.mxu0 %v6293_v47  ;;  %v6365_v44 = vld [vmem:[#allocation11 + $0x34] ss:$8 sps:$4 sm:$0xff]   ;;  %v6363_v47 = vld [vmem:[#allocation11 + $0x30] ss:$8 sps:$4 sm:$0xff]  }
 0x5fd   :  { %3023 = vmatpush1.bf16.msra.mxu1 %v6288_v13  ;;  %3109 = vmatpush1.bf16.msra.mxu0 %v6291_v52  ;;  %v6368_v13 = vld [vmem:[#allocation11 + $0x44] ss:$8 sps:$4 sm:$0xff]   ;;  %v6366_v52 = vld [vmem:[#allocation11 + $0x40] ss:$8 sps:$4 sm:$0xff]  }
 0x5fe   :  { %3024 = vmatprep.subr.bf16.mxu1 %v6296_v54  ;;  %3110 = vmatprep.subr.bf16.mxu0 %v6299_v59  ;;  %v6369_v54 = vld [vmem:[#allocation11 + $0x50] ss:$8 sps:$4 sm:$0xff]   ;;  %v6374_v59 = vld [vmem:[#allocation11 + $0x64] ss:$8 sps:$4 sm:$0xff]  }
 0x601   :  { %3025 = vmatpush1.bf16.msra.mxu1 %v6294_v34  ;;  %3111 = vmatpush1.bf16.msra.mxu0 %v6297_v60  ;;  %v6372_v34 = vld [vmem:[#allocation11 + $0x60] ss:$8 sps:$4 sm:$0xff]   ;;  %v6377_v60 = vld [vmem:[#allocation11 + $0x74] ss:$8 sps:$4 sm:$0xff]  }
 0x602   :  { %3026 = vmatprep.subr.bf16.mxu1 %v6302_v41  ;;  %3112 = vmatprep.subr.bf16.mxu0 %v6305_v46  ;;  %v6375_v41 = vld [vmem:[#allocation11 + $0x70] ss:$8 sps:$4 sm:$0xff]   ;;  %v2175_v46 = vld [vmem:[#allocation17 + $0x1e] sm:$0xf] }
 0x605   :  { %3027 = vmatpush1.bf16.msra.mxu1 %v6300_v35  ;;  %3113 = vmatpush1.bf16.msra.mxu0 %v6303_v45  ;;  %v2312_v35 = vrot.slane %v2175_v46, %v7244_v10  ;;  %v2320_v45 = vrot.slane %v2175_v46, %v7280_v57 }
 0x606   :  { %3028 = vmatprep.subr.bf16.mxu1 %v6308_v58  ;;  %3114 = vmatprep.subr.bf16.mxu0 %v6311_v62  ;;  %v2316_v58 = vrot.slane %v2175_v46, %v7247_v12 }
 0x609   :  { %3029 = vmatpush1.bf16.msra.mxu1 %v6306_v28  ;;  %3115 = vmatpush1.bf16.msra.mxu0 %v6309_v51 }
 0x60a   :  { %3030 = vmatprep.subr.bf16.mxu1 %v6314_v0  ;;  %3116 = vmatprep.subr.bf16.mxu0 %v6317_v3 }
 0x60d   :  { %3031 = vmatpush1.bf16.msra.mxu1 %v6312_v4  ;;  %3117 = vmatpush1.bf16.msra.mxu0 %v6315_v5  ;;  %v2324_v4 = vrot.slane %v2175_v46, %v7285_v61  ;;  %v6395_v46 = vld [vmem:[#allocation11 + $0xd4] ss:$8 sps:$4 sm:$0xff]  }
 0x60e   :  { %3032 = vmatprep.subr.bf16.mxu1 %v6320_v19  ;;  %3118 = vmatprep.subr.bf16.mxu0 %v6323_v7 }
 0x611   :  { %3033 = vmatpush1.bf16.msra.mxu1 %v6318_v53  ;;  %3119 = vmatpush1.bf16.msra.mxu0 %v6321_v8 }
 0x612   :  { %3034 = vmatprep.subr.bf16.mxu1 %v6326_v11  ;;  %3120 = vmatprep.subr.bf16.mxu0 %v6329_v15 }
 0x615   :  { %3035 = vmatpush1.bf16.msra.mxu1 %v6324_v18  ;;  %3121 = vmatpush1.bf16.msra.mxu0 %v6327_v17 }
 0x616   :  { %3036 = vmatprep.subr.bf16.mxu1 %v6332_v21  ;;  %3122 = vmatprep.subr.bf16.mxu0 %v6335_v25 }
 0x619   :  { %3037 = vmatpush1.bf16.msra.mxu1 %v6330_v27  ;;  %3123 = vmatpush1.bf16.msra.mxu0 %v6333_v29 }
 0x61a   :  { %3038 = vmatprep.subr.bf16.mxu1 %v6338_v30  ;;  %3124 = vmatprep.subr.bf16.mxu0 %v6341_v31 }
 0x61d   :  { %3039 = vmatpush1.bf16.msra.mxu1 %v6336_v32  ;;  %3125 = vmatpush1.bf16.msra.mxu0 %v6339_v24 }
 0x61e   :  { %3040 = vmatprep.subr.bf16.mxu1 %v6344_v33  ;;  %3126 = vmatprep.subr.bf16.mxu0 %v6347_v36 }
 0x621   :  { %3041 = vmatpush1.bf16.msra.mxu1 %v6342_v40  ;;  %3127 = vmatpush1.bf16.msra.mxu0 %v6345_v1 }
 0x622   :  { %3042 = vmatprep.subr.bf16.mxu1 %v6350_v6  ;;  %3128 = vmatprep.subr.bf16.mxu0 %v6353_v2 }
 0x625   :  { %3043 = vmatpush1.bf16.msra.mxu1 %v6348_v16  ;;  %3129 = vmatpush1.bf16.msra.mxu0 %v6351_v26 }
 0x626   :  { %3665 = vmatprep.subr.bf16.mxu1 %v6356_v20 }
 0x628   :  { %3045 = vmatmul.mubr.bf16.vlgmr.msra.gmra.mrb[8].mxu1 %v7470_v39  ;;  %3131 = vmatmul.mubr.bf16.vlgmr.msra.gmra.mrb[12].mxu0 %v7470_v39  ;;  %v6371_v39 = vld [vmem:[#allocation11 + $0x54] ss:$8 sps:$4 sm:$0xff]  }
 0x629   :  { %3666 = vmatpush1.bf16.msra.mxu1 %v6354_v49 }
 0x62a   :  { %3667 = vmatprep.subr.bf16.mxu1 %v6359_v43 }
 0x62d   :  { %3668 = vmatpush1.bf16.msra.mxu1 %v6357_v23 }
 0x62e   :  { %3669 = vmatprep.subr.bf16.mxu1 %v6362_v22 }
 0x631   :  { %3670 = vmatpush1.bf16.msra.mxu1 %v6360_v42 }
 0x632   :  { %3671 = vmatprep.subr.bf16.mxu1 %v6365_v44  ;;  %v6378_v44 = vld [vmem:[#allocation11 + $0x80] ss:$8 sps:$4 sm:$0xff]  }
 0x635   :  { %3672 = vmatpush1.bf16.msra.mxu1 %v6363_v47  ;;  %v6380_v47 = vld [vmem:[#allocation11 + $0x84] ss:$8 sps:$4 sm:$0xff]  }
 0x636   :  { %3673 = vmatprep.subr.bf16.mxu1 %v6368_v13  ;;  %v6383_v13 = vld [vmem:[#allocation11 + $0x94] ss:$8 sps:$4 sm:$0xff]  }
 0x639   :  { %3674 = vmatpush1.bf16.msra.mxu1 %v6366_v52  ;;  %v6381_v52 = vld [vmem:[#allocation11 + $0x90] ss:$8 sps:$4 sm:$0xff]  }
 0x63a   :  { %3675 = vmatprep.subr.bf16.mxu1 %v6371_v39  ;;  %v6384_v39 = vld [vmem:[#allocation11 + $0xa0] ss:$8 sps:$4 sm:$0xff]  }
 0x63d   :  { %3676 = vmatpush1.bf16.msra.mxu1 %v6369_v54  ;;  %v6386_v54 = vld [vmem:[#allocation11 + $0xa4] ss:$8 sps:$4 sm:$0xff]  }
 0x63e   :  { %3677 = vmatprep.subr.bf16.mxu1 %v6374_v59  ;;  %v6389_v59 = vld [vmem:[#allocation11 + $0xb4] ss:$8 sps:$4 sm:$0xff]  }
 0x641   :  { %3678 = vmatpush1.bf16.msra.mxu1 %v6372_v34  ;;  %v6387_v34 = vld [vmem:[#allocation11 + $0xb0] ss:$8 sps:$4 sm:$0xff]  }
 0x642   :  { %3679 = vmatprep.subr.bf16.mxu1 %v6377_v60  ;;  %v6392_v60 = vld [vmem:[#allocation11 + $0xc4] ss:$8 sps:$4 sm:$0xff]  }
 0x645   :  { %3680 = vmatpush1.bf16.msra.mxu1 %v6375_v41  ;;  %v6390_v41 = vld [vmem:[#allocation11 + $0xc0] ss:$8 sps:$4 sm:$0xff]  }
 0x646   :  { %3681 = vmatprep.subr.bf16.mxu1 %v6380_v47 }
 0x649   :  { %3682 = vmatpush1.bf16.msra.mxu1 %v6378_v44 }
 0x64a   :  { %3683 = vmatprep.subr.bf16.mxu1 %v6383_v13 }
 0x64d   :  { %3684 = vmatpush1.bf16.msra.mxu1 %v6381_v52 }
 0x64e   :  { %3685 = vmatprep.subr.bf16.mxu1 %v6386_v54 }
 0x651   :  { %3686 = vmatpush1.bf16.msra.mxu1 %v6384_v39 }
 0x652   :  { %3687 = vmatprep.subr.bf16.mxu1 %v6389_v59 }
 0x655   :  { %3688 = vmatpush1.bf16.msra.mxu1 %v6387_v34 }
 0x656   :  { %3689 = vmatprep.subr.bf16.mxu1 %v6392_v60 }
 0x659   :  { %3690 = vmatpush1.bf16.msra.mxu1 %v6390_v41 }
 0x65a   :  { %3691 = vmatprep.subr.bf16.mxu1 %v6395_v46 }
 0x6fb   :  { %v3046_v62 = vpop.f32.mrb[8].mxu1  ;;  %v3132_v28 = vpop.f32.mrb[12].mxu0 }
 0x6fc   :  { %v7477_v51 = vadd.f32 %v3046_v62, %v2312_v35  ;;  %v7479_v0 = vadd.f32 %v3132_v28, %v2320_v45  ;;  %v3048_v3 = vpop.f32.mrb[9].mxu1  ;;  %v3134_v5 = vpop.f32.mrb[13].mxu0  ;;  %v6401_v62 = vld [vmem:[#allocation11 + $0xf4] ss:$8 sps:$4 sm:$0xff]   ;;  %v6399_v28 = vld [vmem:[#allocation11 + $0xf0] ss:$8 sps:$4 sm:$0xff]  }
 0x6fd   :  { %v7482_v19 = vadd.f32 %v3048_v3, %v2316_v58  ;;  %v3050_v7 = vpop.f32.mrb[10].mxu1  ;;  %v3136_v53 = vpop.f32.mrb[14].mxu0  ;;  %v7498_v30 = vadd.f32 %v3134_v5, %v2324_v4  ;;  %v6404_v3 = vld [vmem:[#allocation11 + $0x104] ss:$8 sps:$4 sm:$0xff]  }
 0x6fe   :  { %v3155_v8 = vmul.f32 %v7477_v51, %v7477_v51  ;;  %v7486_v11 = vadd.f32 %v3050_v7, %v2312_v35  ;;  %v7488_v15 = vadd.f32 %v3136_v53, %v2320_v45  ;;  %v3052_v18 = vpop.f32.mrb[11].mxu1  ;;  %v3138_v17 = vpop.f32.mrb[15].mxu0  ;;  %v3157_v29 = vmul.f32 %v7479_v0, %v7479_v0  ;;  %v6393_v35 = vld [vmem:[#allocation11 + $0xd0] ss:$8 sps:$4 sm:$0xff]   ;;  %v6398_v45 = vld [vmem:[#allocation11 + $0xe4] ss:$8 sps:$4 sm:$0xff]  }
 0x6ff   :  { %v3143_v21 = vadd.f32 %v7482_v19, %v7477_v51  ;;  %v3156_v25 = vmul.f32 %v7482_v19, %v7482_v19  ;;  %v7494_v27 = vadd.f32 %v3052_v18, %v2316_v58  ;;  %v7509_v1 = vadd.f32 %v3138_v17, %v2324_v4  ;;  %3692 = vmatpush1.bf16.msra.mxu1 %v6393_v35  ;;  %v6396_v58 = vld [vmem:[#allocation11 + $0xe0] ss:$8 sps:$4 sm:$0xff]  }
 0x700   :  { %v3159_v31 = vmul.f32 %v7486_v11, %v7486_v11  ;;  %v3161_v40 = vmul.f32 %v7488_v15, %v7488_v15  ;;  %v3158_v20 = vmul.f32 %v7498_v30, %v7498_v30  ;;  %3693 = vmatprep.subr.bf16.mxu1 %v6398_v45 }
 0x701   :  { %v3148_v32 = vadd.f32 %v7494_v27, %v7486_v11  ;;  %v3160_v24 = vmul.f32 %v7494_v27, %v7494_v27  ;;  %v3144_v33 = vadd.f32 %v7479_v0, %v3143_v21  ;;  %v3163_v36 = vadd.f32 %v3156_v25, %v3155_v8 }
 0x702   :  { %v3162_v22 = vmul.f32 %v7509_v1, %v7509_v1 }
 0x703   :  { %v3145_v6 = vadd.f32 %v7498_v30, %v3144_v33  ;;  %v3149_v2 = vadd.f32 %v7488_v15, %v3148_v32  ;;  %v3164_v16 = vadd.f32 %v3163_v36, %v3157_v29  ;;  %v3168_v26 = vadd.f32 %v3160_v24, %v3159_v31  ;;  %3694 = vmatpush1.bf16.msra.mxu1 %v6396_v58  ;;  %v3141_v36 = vld [vmem:[#allocation17 + $0x22] sm:$0xf] }
 0x704   :  { %3695 = vmatprep.subr.bf16.mxu1 %v6401_v62 }
 0x705   :  { %3146 = vadd.xlane.f32.xlu0 %v3145_v6  ;;  %v3150_v49 = vadd.f32 %v7509_v1, %v3149_v2  ;;  %v3169_v43 = vadd.f32 %v3168_v26, %v3161_v40  ;;  %v3165_v23 = vadd.f32 %v3164_v16, %v3158_v20  ;;  %v3142_v40 = vld [vmem:[#allocation17 + $0x26] sm:$0xf]  ;;  %v3199_v6 = vrot.slane %v3141_v36, %v7247_v12 }
 0x706   :  { %v3195_v2 = vrot.slane %v3141_v36, %v7244_v10  ;;  %v3207_v16 = vrot.slane %v3141_v36, %v7285_v61  ;;  %v3203_v26 = vrot.slane %v3141_v36, %v7280_v57  ;;  %v3232_v20 = vrot.slane %v3142_v40, %v7244_v10 }
 0x707   :  { %3151 = vadd.xlane.f32.xlu1 %v3150_v49  ;;  %v3170_v42 = vadd.f32 %v3169_v43, %v3162_v22  ;;  %3696 = vmatpush1.bf16.msra.mxu1 %v6399_v28  ;;  %v3236_v49 = vrot.slane %v3142_v40, %v7247_v12  ;;  %v3244_v43 = vrot.slane %v3142_v40, %v7285_v61 }
 0x708   :  { %3708 = vmatprep.subr.bf16.mxu1 %v6404_v3 }
 0x709   :  { %3166 = vadd.xlane.f32.xlu0 %v3165_v23  ;;  %v3240_v23 = vrot.slane %v3142_v40, %v7280_v57  ;;  %v6402_v40 = vld [vmem:[#allocation11 + $0x100] ss:$8 sps:$4 sm:$0xff]  }
 0x70b   :  { %3171 = vadd.xlane.f32.xlu1 %v3170_v42 }
 0x792   :  { %v3147_v4 = vpop.xlane.xlu0 %3146 }
 0x793   :  { %v3153_v5 = vmul.f32 0.001953125, %v3147_v4 }
 0x794   :  { %v3152_v7 = vpop.xlane.xlu1 %3151 }
 0x795   :  { %v3154_v53 = vmul.f32 0.001953125, %v3152_v7  ;;  %v3175_v18 = vmul.f32 %v3153_v5, %v3153_v5  ;;  %v3179_v42 = vsub.f32 %v7477_v51, %v3153_v5  ;;  %v3181_v44 = vsub.f32 %v7479_v0, %v3153_v5 }
 0x796   :  { %v3167_v8 = vpop.xlane.xlu0 %3166  ;;  %v3180_v47 = vsub.f32 %v7482_v19, %v3153_v5  ;;  %v3182_v13 = vsub.f32 %v7498_v30, %v3153_v5 }
 0x797   :  { %v3173_v17 = vmul.f32 0.001953125, %v3167_v8  ;;  %v3176_v29 = vmul.f32 %v3154_v53, %v3154_v53  ;;  %v3183_v60 = vsub.f32 %v7486_v11, %v3154_v53  ;;  %v3185_v41 = vsub.f32 %v7488_v15, %v3154_v53 }
 0x798   :  { %v3172_v21 = vpop.xlane.xlu1 %3171  ;;  %v3184_v46 = vsub.f32 %v7494_v27, %v3154_v53  ;;  %v3186_v35 = vsub.f32 %v7509_v1, %v3154_v53 }
 0x799   :  { %v3177_v25 = vsub.f32 %v3173_v17, %v3175_v18  ;;  %v3174_v31 = vmul.f32 0.001953125, %v3172_v21 }
 0x79b   :  { %v3187_v32 = vadd.f32 1e-05, %v3177_v25  ;;  %v3178_v24 = vsub.f32 %v3174_v31, %v3176_v29 }
 0x79d   :  { %6718 = vrsqrt.f32 %v3187_v32  ;;  %v3188_v33 = vadd.f32 1e-05, %v3178_v24 }
 0x79f   :  { %6720 = vrsqrt.f32 %v3188_v33 }
 0x7a7   :  { %v6719_v22 = vpop.eup %6718 }
 0x7a8   :  { %v3213_v52 = vmul.f32 %v6719_v22, %v3199_v6  ;;  %v3212_v39 = vmul.f32 %v6719_v22, %v3195_v2  ;;  %v3215_v54 = vmul.f32 %v6719_v22, %v3207_v16  ;;  %v3214_v59 = vmul.f32 %v6719_v22, %v3203_v26  ;;  %v6425_v22 = vld [vmem:[#allocation11 + $0x174] ss:$8 sps:$4 sm:$0xff]  }
 0x7a9   :  { %v6721_v34 = vpop.eup %6720 }
 0x7aa   :  { %v3217_v51 = vmul.f32 %v6721_v34, %v3199_v6  ;;  %v3221_v45 = vmul.f32 %v3213_v52, %v3180_v47  ;;  %v3216_v0 = vmul.f32 %v6721_v34, %v3195_v2  ;;  %v3220_v58 = vmul.f32 %v3212_v39, %v3179_v42  ;;  %v6423_v42 = vld [vmem:[#allocation11 + $0x170] ss:$8 sps:$4 sm:$0xff]   ;;  %v6426_v47 = vld [vmem:[#allocation11 + $0x180] ss:$8 sps:$4 sm:$0xff]   ;;  %v6434_v39 = vld [vmem:[#allocation11 + $0x1a4] ss:$8 sps:$4 sm:$0xff]  }
 0x7ab   :  { %v3219_v19 = vmul.f32 %v6721_v34, %v3207_v16  ;;  %v3223_v62 = vmul.f32 %v3215_v54, %v3182_v13  ;;  %v3218_v30 = vmul.f32 %v6721_v34, %v3203_v26  ;;  %v3222_v28 = vmul.f32 %v3214_v59, %v3181_v44  ;;  %v6411_v16 = vld [vmem:[#allocation11 + $0x130] ss:$8 sps:$4 sm:$0xff]   ;;  %v6414_v26 = vld [vmem:[#allocation11 + $0x140] ss:$8 sps:$4 sm:$0xff]   ;;  %v6428_v44 = vld [vmem:[#allocation11 + $0x184] ss:$8 sps:$4 sm:$0xff]  }
 0x7ac   :  { %v3225_v3 = vmul.f32 %v3217_v51, %v3184_v46  ;;  %v3250_v4 = vadd.f32 %v3236_v49, %v3221_v45  ;;  %v3224_v5 = vmul.f32 %v3216_v0, %v3183_v60  ;;  %v3249_v7 = vadd.f32 %v3232_v20, %v3220_v58  ;;  %v6431_v13 = vld [vmem:[#allocation11 + $0x194] ss:$8 sps:$4 sm:$0xff]   ;;  %v6429_v52 = vld [vmem:[#allocation11 + $0x190] ss:$8 sps:$4 sm:$0xff]   ;;  %v6432_v54 = vld [vmem:[#allocation11 + $0x1a0] ss:$8 sps:$4 sm:$0xff]  }
 0x7ad   :  { %v3227_v8 = vmul.f32 %v3219_v19, %v3186_v35  ;;  %v3226_v11 = vmul.f32 %v3218_v30, %v3185_v41  ;;  %v3251_v18 = vadd.f32 %v3240_v23, %v3222_v28  ;;  %v3252_v27 = vadd.f32 %v3244_v43, %v3223_v62  ;;  %v6437_v59 = vld [vmem:[#allocation11 + $0x1b4] ss:$8 sps:$4 sm:$0xff]   ;;  %v6435_v34 = vld [vmem:[#allocation11 + $0x1b0] ss:$8 sps:$4 sm:$0xff]   ;;  %v6440_v60 = vld [vmem:[#allocation11 + $0x1c4] ss:$8 sps:$4 sm:$0xff]  }
 0x7ae   :  { %v3254_v15 = vadd.f32 %v3236_v49, %v3225_v3  ;;  %v3253_v17 = vadd.f32 %v3232_v20, %v3224_v5  ;;  %v3258_v53 = vadd.f32 %v3250_v4, %v7373_v14  ;;  %v3257_v29 = vadd.f32 %v3249_v7, %v7379_v55  ;;  %v6407_v14 = vld [vmem:[#allocation11 + $0x114] ss:$8 sps:$4 sm:$0xff]   ;;  %v6417_v20 = vld [vmem:[#allocation11 + $0x150] ss:$8 sps:$4 sm:$0xff]   ;;  %v6438_v41 = vld [vmem:[#allocation11 + $0x1c0] ss:$8 sps:$4 sm:$0xff]  }
 0x7af   :  { %v3256_v21 = vadd.f32 %v3244_v43, %v3227_v8  ;;  %v3255_v1 = vadd.f32 %v3240_v23, %v3226_v11  ;;  %v7540_v24 = vadd.f32 %v3251_v18, %v7405_v38  ;;  %v3260_v2 = vadd.f32 %v3252_v27, %v7390_v63  ;;  %v6413_v38 = vld [vmem:[#allocation11 + $0x134] ss:$8 sps:$4 sm:$0xff]   ;;  %v6416_v63 = vld [vmem:[#allocation11 + $0x144] ss:$8 sps:$4 sm:$0xff]   ;;  %v6420_v23 = vld [vmem:[#allocation11 + $0x160] ss:$8 sps:$4 sm:$0xff]  }
 0x7b0   :  { %v3262_v25 = vadd.f32 %v3254_v15, %v7376_v50  ;;  %v3261_v31 = vadd.f32 %v3253_v17, %v7382_v56  ;;  %v6405_v56 = vld [vmem:[#allocation11 + $0x110] ss:$8 sps:$4 sm:$0xff]   ;;  %v6419_v49 = vld [vmem:[#allocation11 + $0x154] ss:$8 sps:$4 sm:$0xff]   ;;  %v6422_v43 = vld [vmem:[#allocation11 + $0x164] ss:$8 sps:$4 sm:$0xff]  }
 0x7b1   :  { %v3264_v32 = vadd.f32 %v3256_v21, %v7393_v48  ;;  %v7543_v33 = vadd.f32 %v3255_v1, %v7402_v37  ;;  %v6410_v48 = vld [vmem:[#allocation11 + $0x124] ss:$8 sps:$4 sm:$0xff]   ;;  %v6408_v37 = vld [vmem:[#allocation11 + $0x120] ss:$8 sps:$4 sm:$0xff]   ;;  %v6443_v46 = vld [vmem:[#allocation11 + $0x1d4] ss:$8 sps:$4 sm:$0xff]  }
 0x7b2   :  { %v3267_v36 = vpack.c.bf16 %v3262_v25, %v3258_v53  ;;  %v3266_v6 = vpack.c.bf16 %v3261_v31, %v3257_v29  ;;  %v6441_v35 = vld [vmem:[#allocation11 + $0x1d0] ss:$8 sps:$4 sm:$0xff]   ;;  %v6446_v51 = vld [vmem:[#allocation11 + $0x1e4] ss:$8 sps:$4 sm:$0xff]   ;;  %v6444_v45 = vld [vmem:[#allocation11 + $0x1e0] ss:$8 sps:$4 sm:$0xff]  }
 0x7b3   :  { %v3268_v50 = vpack.c.bf16 %v7543_v33, %v7540_v24  ;;  %v3269_v55 = vpack.c.bf16 %v3264_v32, %v3260_v2  ;;  %v6449_v0 = vld [vmem:[#allocation11 + $0x1f4] ss:$8 sps:$4 sm:$0xff]   ;;  %v6447_v58 = vld [vmem:[#allocation11 + $0x1f0] ss:$8 sps:$4 sm:$0xff]   ;;  %v3265_v19 = vld [vmem:[#allocation17 + $0x2a] sm:$0x3] }
 0x7b4   :  { %3697 = vmatprep.mubr.bf16.mxu1 %v3267_v36  ;;  %v3338_v62 = vrot.slane %v3265_v19, %v7244_v10  ;;  %v3342_v30 = vrot.slane %v3265_v19, %v7247_v12  ;;  %v6452_v31 = vld [vmem:[#allocation13 + $0x4] ss:$8 sps:$4 sm:$0xff]   ;;  %v6450_v32 = vld [vmem:[#allocation13] ss:$8 sps:$4 sm:$0xff]   ;;  %v6455_v24 = vld [vmem:[#allocation13 + $0x14] ss:$8 sps:$4 sm:$0xff]  }
 0x7b5   :  { %3698 = vmatmul.mubr.bf16.vlgmr.msra.gmra.mrb[12].mxu1 %v3266_v6  ;;  %4069 = vmatprep.subr.bf16.mxu0 %v6452_v31  ;;  %v6453_v33 = vld [vmem:[#allocation13 + $0x10] ss:$8 sps:$4 sm:$0xff]   ;;  %v6458_v36 = vld [vmem:[#allocation13 + $0x24] ss:$8 sps:$4 sm:$0xff]   ;;  %v6461_v6 = vld [vmem:[#allocation13 + $0x34] ss:$8 sps:$4 sm:$0xff]  }
 0x7b6   :  { %3709 = vmatpush1.bf16.msra.mxu1 %v6402_v40  ;;  %3740 = vmatprep.mubr.bf16.mxu1 %v3269_v55  ;;  %v6456_v40 = vld [vmem:[#allocation13 + $0x20] ss:$8 sps:$4 sm:$0xff]   ;;  %v6459_v2 = vld [vmem:[#allocation13 + $0x30] ss:$8 sps:$4 sm:$0xff]   ;;  %v6467_v55 = vld [vmem:[#allocation13 + $0x54] ss:$8 sps:$4 sm:$0xff]  }
 0x7b7   :  { %3710 = vmatprep.subr.bf16.mxu1 %v6407_v14  ;;  %4070 = vmatpush1.bf16.msra.mxu0 %v6450_v32  ;;  %v6462_v14 = vld [vmem:[#allocation13 + $0x40] ss:$8 sps:$4 sm:$0xff]  }
 0x7b8   :  { %4071 = vmatprep.subr.bf16.mxu0 %v6455_v24 }
 0x7ba   :  { %3711 = vmatpush1.bf16.msra.mxu1 %v6405_v56  ;;  %v6465_v56 = vld [vmem:[#allocation13 + $0x50] ss:$8 sps:$4 sm:$0xff]  }
 0x7bb   :  { %3712 = vmatprep.subr.bf16.mxu1 %v6410_v48  ;;  %4072 = vmatpush1.bf16.msra.mxu0 %v6453_v33  ;;  %v6470_v48 = vld [vmem:[#allocation13 + $0x64] ss:$8 sps:$4 sm:$0xff]  }
 0x7bc   :  { %4073 = vmatprep.subr.bf16.mxu0 %v6458_v36 }
 0x7be   :  { %3713 = vmatpush1.bf16.msra.mxu1 %v6408_v37  ;;  %v6468_v37 = vld [vmem:[#allocation13 + $0x60] ss:$8 sps:$4 sm:$0xff]  }
 0x7bf   :  { %3714 = vmatprep.subr.bf16.mxu1 %v6413_v38  ;;  %4074 = vmatpush1.bf16.msra.mxu0 %v6456_v40  ;;  %v6473_v38 = vld [vmem:[#allocation13 + $0x74] ss:$8 sps:$4 sm:$0xff]  }
 0x7c0   :  { %4075 = vmatprep.subr.bf16.mxu0 %v6461_v6 }
 0x7c2   :  { %3715 = vmatpush1.bf16.msra.mxu1 %v6411_v16  ;;  %v6471_v16 = vld [vmem:[#allocation13 + $0x70] ss:$8 sps:$4 sm:$0xff]  }
 0x7c3   :  { %3716 = vmatprep.subr.bf16.mxu1 %v6416_v63  ;;  %4076 = vmatpush1.bf16.msra.mxu0 %v6459_v2  ;;  %v6476_v63 = vld [vmem:[#allocation13 + $0x84] ss:$8 sps:$4 sm:$0xff]  }
 0x7c6   :  { %3717 = vmatpush1.bf16.msra.mxu1 %v6414_v26  ;;  %v6474_v26 = vld [vmem:[#allocation13 + $0x80] ss:$8 sps:$4 sm:$0xff]  }
 0x7c7   :  { %3718 = vmatprep.subr.bf16.mxu1 %v6419_v49  ;;  %v6479_v49 = vld [vmem:[#allocation13 + $0x94] ss:$8 sps:$4 sm:$0xff]  }
 0x7ca   :  { %3719 = vmatpush1.bf16.msra.mxu1 %v6417_v20  ;;  %v6477_v20 = vld [vmem:[#allocation13 + $0x90] ss:$8 sps:$4 sm:$0xff]  }
 0x7cb   :  { %3720 = vmatprep.subr.bf16.mxu1 %v6422_v43  ;;  %v6482_v43 = vld [vmem:[#allocation13 + $0xa4] ss:$8 sps:$4 sm:$0xff]  }
 0x7ce   :  { %3721 = vmatpush1.bf16.msra.mxu1 %v6420_v23  ;;  %v6480_v23 = vld [vmem:[#allocation13 + $0xa0] ss:$8 sps:$4 sm:$0xff]  }
 0x7cf   :  { %3722 = vmatprep.subr.bf16.mxu1 %v6425_v22  ;;  %v6485_v22 = vld [vmem:[#allocation13 + $0xb4] ss:$8 sps:$4 sm:$0xff]  }
 0x7d2   :  { %3723 = vmatpush1.bf16.msra.mxu1 %v6423_v42  ;;  %v6483_v42 = vld [vmem:[#allocation13 + $0xb0] ss:$8 sps:$4 sm:$0xff]  }
 0x7d3   :  { %3724 = vmatprep.subr.bf16.mxu1 %v6428_v44  ;;  %v6488_v44 = vld [vmem:[#allocation13 + $0xc4] ss:$8 sps:$4 sm:$0xff]  }
 0x7d6   :  { %3725 = vmatpush1.bf16.msra.mxu1 %v6426_v47  ;;  %v6486_v47 = vld [vmem:[#allocation13 + $0xc0] ss:$8 sps:$4 sm:$0xff]  }
 0x7d7   :  { %3726 = vmatprep.subr.bf16.mxu1 %v6431_v13  ;;  %v6491_v13 = vld [vmem:[#allocation13 + $0xd4] ss:$8 sps:$4 sm:$0xff]  }
 0x7da   :  { %3727 = vmatpush1.bf16.msra.mxu1 %v6429_v52  ;;  %v6489_v52 = vld [vmem:[#allocation13 + $0xd0] ss:$8 sps:$4 sm:$0xff]  }
 0x7db   :  { %3728 = vmatprep.subr.bf16.mxu1 %v6434_v39  ;;  %v6494_v39 = vld [vmem:[#allocation13 + $0xe4] ss:$8 sps:$4 sm:$0xff]  }
 0x7de   :  { %3729 = vmatpush1.bf16.msra.mxu1 %v6432_v54  ;;  %v6492_v54 = vld [vmem:[#allocation13 + $0xe0] ss:$8 sps:$4 sm:$0xff]  }
 0x7df   :  { %3730 = vmatprep.subr.bf16.mxu1 %v6437_v59  ;;  %v6497_v59 = vld [vmem:[#allocation13 + $0xf4] ss:$8 sps:$4 sm:$0xff]  }
 0x7e2   :  { %3731 = vmatpush1.bf16.msra.mxu1 %v6435_v34  ;;  %v6495_v34 = vld [vmem:[#allocation13 + $0xf0] ss:$8 sps:$4 sm:$0xff]  }
 0x7e3   :  { %3732 = vmatprep.subr.bf16.mxu1 %v6440_v60 }
 0x7e6   :  { %3733 = vmatpush1.bf16.msra.mxu1 %v6438_v41 }
 0x7e7   :  { %3734 = vmatprep.subr.bf16.mxu1 %v6443_v46 }
 0x7ea   :  { %3735 = vmatpush1.bf16.msra.mxu1 %v6441_v35 }
 0x7eb   :  { %3736 = vmatprep.subr.bf16.mxu1 %v6446_v51 }
 0x7ee   :  { %3737 = vmatpush1.bf16.msra.mxu1 %v6444_v45 }
 0x7ef   :  { %3738 = vmatprep.subr.bf16.mxu1 %v6449_v0 }
 0x7f2   :  { %3739 = vmatpush1.bf16.msra.mxu1 %v6447_v58 }
 0x7f5   :  { %3741 = vmatmul.mubr.bf16.vlgmr.msra.gmra.mrb[12].mxu1 %v3268_v50  ;;  %v6464_v50 = vld [vmem:[#allocation13 + $0x44] ss:$8 sps:$4 sm:$0xff]  }
 0x7f6   :  { %4077 = vmatprep.subr.bf16.mxu0 %v6464_v50 }
 0x7f7   :  { %4078 = vmatpush1.bf16.msra.mxu0 %v6462_v14 }
 0x7f8   :  { %4079 = vmatprep.subr.bf16.mxu0 %v6467_v55 }
 0x7fb   :  { %4080 = vmatpush1.bf16.msra.mxu0 %v6465_v56 }
 0x7fc   :  { %4081 = vmatprep.subr.bf16.mxu0 %v6470_v48 }
 0x7ff   :  { %4082 = vmatpush1.bf16.msra.mxu0 %v6468_v37 }
 0x800   :  { %4083 = vmatprep.subr.bf16.mxu0 %v6473_v38 }
 0x803   :  { %4084 = vmatpush1.bf16.msra.mxu0 %v6471_v16 }
 0x804   :  { %4085 = vmatprep.subr.bf16.mxu0 %v6476_v63 }
 0x807   :  { %4086 = vmatpush1.bf16.msra.mxu0 %v6474_v26 }
 0x808   :  { %4087 = vmatprep.subr.bf16.mxu0 %v6479_v49 }
 0x80b   :  { %4088 = vmatpush1.bf16.msra.mxu0 %v6477_v20 }
 0x80c   :  { %4089 = vmatprep.subr.bf16.mxu0 %v6482_v43 }
 0x80f   :  { %4090 = vmatpush1.bf16.msra.mxu0 %v6480_v23 }
 0x810   :  { %4091 = vmatprep.subr.bf16.mxu0 %v6485_v22 }
 0x813   :  { %4092 = vmatpush1.bf16.msra.mxu0 %v6483_v42 }
 0x814   :  { %4093 = vmatprep.subr.bf16.mxu0 %v6488_v44 }
 0x817   :  { %4094 = vmatpush1.bf16.msra.mxu0 %v6486_v47 }
 0x818   :  { %4095 = vmatprep.subr.bf16.mxu0 %v6491_v13 }
 0x81b   :  { %4096 = vmatpush1.bf16.msra.mxu0 %v6489_v52 }
 0x81c   :  { %4097 = vmatprep.subr.bf16.mxu0 %v6494_v39 }
 0x81f   :  { %4098 = vmatpush1.bf16.msra.mxu0 %v6492_v54 }
 0x820   :  { %4099 = vmatprep.subr.bf16.mxu0 %v6497_v59 }
 0x823   :  { %4100 = vmatpush1.bf16.msra.mxu0 %v6495_v34 }
 0x8c8   :  { %v3742_v28 = vpop.f32.mrb[12].mxu1 }
 0x8c9   :  { %v7553_v3 = vadd.f32 %v3742_v28, %v3338_v62  ;;  %v3744_v4 = vpop.f32.mrb[13].mxu1 }
 0x8ca   :  { %v7555_v5 = vadd.f32 %v3744_v4, %v3342_v30  ;;  %v3746_v7 = vpop.f32.mrb[14].mxu1 }
 0x8cb   :  { %v7557_v8 = vadd.f32 %v3746_v7, %v3338_v62  ;;  %v3748_v11 = vpop.f32.mrb[15].mxu1  ;;  %v3761_v17 = vmul.f32 %v7553_v3, %v7553_v3 }
 0x8cc   :  { %v7559_v18 = vadd.f32 %v3748_v11, %v3342_v30  ;;  %v3753_v15 = vadd.f32 %v7555_v5, %v7553_v3  ;;  %v3762_v27 = vmul.f32 %v7555_v5, %v7555_v5  ;;  %v3751_v11 = vld [vmem:[#allocation17 + $0x2c] sm:$0x3] }
 0x8cd   :  { %v3763_v1 = vmul.f32 %v7557_v8, %v7557_v8 }
 0x8ce   :  { %3754 = vadd.xlane.f32.xlu0 %v3753_v15  ;;  %v3756_v21 = vadd.f32 %v7559_v18, %v7557_v8  ;;  %v3764_v53 = vmul.f32 %v7559_v18, %v7559_v18  ;;  %v3765_v25 = vadd.f32 %v3762_v27, %v3761_v17  ;;  %v3789_v15 = vrot.slane %v3751_v11, %v7244_v10  ;;  %v3752_v17 = vld [vmem:[#allocation17 + $0x2e] sm:$0x3] }
 0x8cf   :  { %v3793_v27 = vrot.slane %v3751_v11, %v7247_v12 }
 0x8d0   :  { %3757 = vadd.xlane.f32.xlu1 %v3756_v21  ;;  %v3768_v29 = vadd.f32 %v3764_v53, %v3763_v1  ;;  %v3808_v1 = vrot.slane %v3752_v17, %v7244_v10  ;;  %v3812_v53 = vrot.slane %v3752_v17, %v7247_v12 }
 0x8d2   :  { %3766 = vadd.xlane.f32.xlu0 %v3765_v25 }
 0x8d4   :  { %3769 = vadd.xlane.f32.xlu1 %v3768_v29 }
 0x95b   :  { %v3755_v60 = vpop.xlane.xlu0 %3754 }
 0x95c   :  { %v3759_v41 = vmul.f32 0.00390625, %v3755_v60 }
 0x95d   :  { %v3758_v46 = vpop.xlane.xlu1 %3757 }
 0x95e   :  { %v3760_v35 = vmul.f32 0.00390625, %v3758_v46  ;;  %v3773_v45 = vmul.f32 %v3759_v41, %v3759_v41  ;;  %v3777_v25 = vsub.f32 %v7553_v3, %v3759_v41  ;;  %v3778_v29 = vsub.f32 %v7555_v5, %v3759_v41 }
 0x95f   :  { %v3767_v51 = vpop.xlane.xlu0 %3766 }
 0x960   :  { %v3771_v0 = vmul.f32 0.00390625, %v3767_v51  ;;  %v3774_v62 = vmul.f32 %v3760_v35, %v3760_v35  ;;  %v3779_v33 = vsub.f32 %v7557_v8, %v3760_v35  ;;  %v3780_v36 = vsub.f32 %v7559_v18, %v3760_v35 }
 0x961   :  { %v3770_v58 = vpop.xlane.xlu1 %3769 }
 0x962   :  { %v3775_v19 = vsub.f32 %v3771_v0, %v3773_v45  ;;  %v3772_v30 = vmul.f32 0.00390625, %v3770_v58 }
 0x964   :  { %v3781_v28 = vadd.f32 1e-05, %v3775_v19  ;;  %v3776_v4 = vsub.f32 %v3772_v30, %v3774_v62 }
 0x966   :  { %6722 = vrsqrt.f32 %v3781_v28  ;;  %v3782_v7 = vadd.f32 1e-05, %v3776_v4 }
 0x968   :  { %6724 = vrsqrt.f32 %v3782_v7 }
 0x970   :  { %v6723_v21 = vpop.eup %6722 }
 0x971   :  { %v3796_v31 = vmul.f32 %v6723_v21, %v3789_v15  ;;  %v3797_v32 = vmul.f32 %v6723_v21, %v3793_v27 }
 0x972   :  { %v6725_v24 = vpop.eup %6724 }
 0x973   :  { %v3798_v40 = vmul.f32 %v6725_v24, %v3789_v15  ;;  %v3799_v6 = vmul.f32 %v6725_v24, %v3793_v27  ;;  %v3801_v2 = vmul.f32 %v3797_v32, %v3778_v29  ;;  %v3800_v14 = vmul.f32 %v3796_v31, %v3777_v25  ;;  %v6498_v25 = vld [vmem:[#allocation14] ss:$8 sps:$4 sm:$0xff]   ;;  %v6500_v29 = vld [vmem:[#allocation14 + $0x4] ss:$8 sps:$4 sm:$0xff]   ;;  %v6503_v31 = vld [vmem:[#allocation14 + $0x14] ss:$8 sps:$4 sm:$0xff]  }
 0x974   :  { %4398 = vmatprep.subr.bf16.mxu0 %v6500_v29  ;;  %v6501_v32 = vld [vmem:[#allocation14 + $0x10] ss:$8 sps:$4 sm:$0xff]   ;;  %v6506_v24 = vld [vmem:[#allocation14 + $0x24] ss:$8 sps:$4 sm:$0xff]  }
 0x975   :  { %v3803_v50 = vmul.f32 %v3799_v6, %v3780_v36  ;;  %v3816_v55 = vadd.f32 %v3812_v53, %v3801_v2  ;;  %v3802_v56 = vmul.f32 %v3798_v40, %v3779_v33  ;;  %v3815_v48 = vadd.f32 %v3808_v1, %v3800_v14  ;;  %v6504_v33 = vld [vmem:[#allocation14 + $0x20] ss:$8 sps:$4 sm:$0xff]   ;;  %v6509_v36 = vld [vmem:[#allocation14 + $0x34] ss:$8 sps:$4 sm:$0xff]   ;;  %v6507_v40 = vld [vmem:[#allocation14 + $0x30] ss:$8 sps:$4 sm:$0xff]  }
 0x976   :  { %v6512_v6 = vld [vmem:[#allocation14 + $0x44] ss:$8 sps:$4 sm:$0xff]   ;;  %v6510_v2 = vld [vmem:[#allocation14 + $0x40] ss:$8 sps:$4 sm:$0xff]   ;;  %v6515_v14 = vld [vmem:[#allocation14 + $0x54] ss:$8 sps:$4 sm:$0xff]  }
 0x977   :  { %v3818_v37 = vadd.f32 %v3812_v53, %v3803_v50  ;;  %v3820_v38 = vand.u32 2147483647, %v3816_v55  ;;  %v3817_v3 = vadd.f32 %v3808_v1, %v3802_v56  ;;  %v3819_v16 = vand.u32 2147483647, %v3815_v48  ;;  %v6513_v50 = vld [vmem:[#allocation14 + $0x50] ss:$8 sps:$4 sm:$0xff]  }
 0x978   :  { %vm3848_vm5 = vcmp.ge.f32.partialorder %v3816_v55, 0.0  ;;  %vm3847_vm6 = vcmp.ge.f32.partialorder %v3815_v48, 0.0  ;;  %v6516_v56 = vld [vmem:[#allocation14 + $0x60] ss:$8 sps:$4 sm:$0xff]  }
 0x979   :  { %v3822_v5 = vand.u32 2147483647, %v3818_v37  ;;  %v3824_v63 = vsub.f32 0.0, %v3820_v38  ;;  %v3821_v26 = vand.u32 2147483647, %v3817_v3  ;;  %v3823_v49 = vsub.f32 0.0, %v3819_v16 }
 0x97a   :  { %vm3850_vm7 = vcmp.ge.f32.partialorder %v3818_v37, 0.0  ;;  %vm3849_vm8 = vcmp.ge.f32.partialorder %v3817_v3, 0.0  ;;  %v3863_v38 = vld [vmem:[#allocation17 + $0x30] sm:$0x3] }
 0x97b   :  { %v3826_v20 = vsub.f32 0.0, %v3822_v5  ;;  %v3829_v8 = vmul.f32 1.442695, %v3824_v63  ;;  %v3825_v43 = vsub.f32 0.0, %v3821_v26  ;;  %v3827_v18 = vmul.f32 1.442695, %v3823_v49 }
 0x97c   :  { %v3906_v16 = vrot.slane %v3863_v38, %v7247_v12 }
 0x97d   :  { %6726 = vpow2.f32 %v3829_v8  ;;  %v3833_v23 = vmul.f32 1.442695, %v3826_v20  ;;  %v3831_v22 = vmul.f32 1.442695, %v3825_v43 }
 0x97e   :  { %6728 = vpow2.f32 %v3827_v18 }
 0x97f   :  { %6730 = vpow2.f32 %v3833_v23 }
 0x980   :  { %6732 = vpow2.f32 %v3831_v22 }
 0x987   :  { %v6727_v42 = vpop.eup %6726 }
 0x988   :  { %v6729_v44 = vpop.eup %6728  ;;  %v3836_v47 = vadd.f32 1.0, %v6727_v42 }
 0x989   :  { %v6731_v13 = vpop.eup %6730  ;;  %v3835_v52 = vadd.f32 1.0, %v6729_v44 }
 0x98a   :  { %v6733_v39 = vpop.eup %6732  ;;  %v3838_v54 = vadd.f32 1.0, %v6731_v13  ;;  %6734 = vrcp.f32 %v3836_v47 }
 0x98b   :  { %v3837_v59 = vadd.f32 1.0, %v6733_v39  ;;  %6736 = vrcp.f32 %v3835_v52 }
 0x98c   :  { %6738 = vrcp.f32 %v3838_v54  ;;  %v6522_v54 = vld [vmem:[#allocation14 + $0x80] ss:$8 sps:$4 sm:$0xff]  }
 0x98d   :  { %6740 = vrcp.f32 %v3837_v59  ;;  %v6524_v59 = vld [vmem:[#allocation14 + $0x84] ss:$8 sps:$4 sm:$0xff]  }
 0x994   :  { %v6735_v34 = vpop.eup %6734 }
 0x995   :  { %v6737_v60 = vpop.eup %6736  ;;  %v3844_v41 = vmin.f32 %v6735_v34, 1.0  ;;  %v6527_v34 = vld [vmem:[#allocation14 + $0x94] ss:$8 sps:$4 sm:$0xff]  }
 0x996   :  { %v6739_v46 = vpop.eup %6738  ;;  %v3843_v35 = vmin.f32 %v6737_v60, 1.0  ;;  %v6525_v60 = vld [vmem:[#allocation14 + $0x90] ss:$8 sps:$4 sm:$0xff]  }
 0x997   :  { %v6741_v51 = vpop.eup %6740  ;;  %v3846_v45 = vmin.f32 %v6739_v46, 1.0  ;;  %v3852_v0 = vsub.f32 1.0, %v3844_v41  ;;  %v6528_v46 = vld [vmem:[#allocation14 + $0xa0] ss:$8 sps:$4 sm:$0xff]  }
 0x998   :  { %v3845_v58 = vmin.f32 %v6741_v51, 1.0  ;;  %v3851_v19 = vsub.f32 1.0, %v3843_v35  ;;  %v6531_v51 = vld [vmem:[#allocation14 + $0xb0] ss:$8 sps:$4 sm:$0xff]  }
 0x999   :  { %v3854_v62 = vsub.f32 1.0, %v3846_v45  ;;  %v3856_v30 = vsel %vm3848_vm5, %v3844_v41, %v3852_v0  ;;  %v6530_v41 = vld [vmem:[#allocation14 + $0xa4] ss:$8 sps:$4 sm:$0xff]   ;;  %v6534_v0 = vld [vmem:[#allocation14 + $0xc0] ss:$8 sps:$4 sm:$0xff]  }
 0x99a   :  { %v3853_v28 = vsub.f32 1.0, %v3845_v58  ;;  %v3855_v4 = vsel %vm3847_vm6, %v3843_v35, %v3851_v19  ;;  %v7581_v11 = vmul.f32 %v3856_v30, %v3816_v55  ;;  %v6518_v55 = vld [vmem:[#allocation14 + $0x64] ss:$8 sps:$4 sm:$0xff]   ;;  %v6533_v35 = vld [vmem:[#allocation14 + $0xb4] ss:$8 sps:$4 sm:$0xff]  }
 0x99b   :  { %v3858_v7 = vsel %vm3850_vm7, %v3846_v45, %v3854_v62  ;;  %v7585_v27 = vmul.f32 %v3855_v4, %v3815_v48  ;;  %v6521_v48 = vld [vmem:[#allocation14 + $0x74] ss:$8 sps:$4 sm:$0xff]   ;;  %v6536_v45 = vld [vmem:[#allocation14 + $0xc4] ss:$8 sps:$4 sm:$0xff]   ;;  %v6537_v19 = vld [vmem:[#allocation14 + $0xd0] ss:$8 sps:$4 sm:$0xff]  }
 0x99c   :  { %v7583_v15 = vmul.f32 %v3858_v7, %v3818_v37  ;;  %v3857_v17 = vsel %vm3849_vm8, %v3845_v58, %v3853_v28  ;;  %v6519_v37 = vld [vmem:[#allocation14 + $0x70] ss:$8 sps:$4 sm:$0xff]   ;;  %v6539_v58 = vld [vmem:[#allocation14 + $0xd4] ss:$8 sps:$4 sm:$0xff]   ;;  %v6542_v62 = vld [vmem:[#allocation14 + $0xe4] ss:$8 sps:$4 sm:$0xff]  }
 0x99d   :  { %v7587_v21 = vmul.f32 %v3857_v17, %v3817_v3  ;;  %v3902_v3 = vrot.slane %v3863_v38, %v7244_v10  ;;  %v6540_v30 = vld [vmem:[#allocation14 + $0xe0] ss:$8 sps:$4 sm:$0xff]   ;;  %v6545_v28 = vld [vmem:[#allocation14 + $0xf4] ss:$8 sps:$4 sm:$0xff]   ;;  %v6543_v4 = vld [vmem:[#allocation14 + $0xf0] ss:$8 sps:$4 sm:$0xff]  }
 0x99e   :  { %v3865_v1 = vpack.c.bf16 %v7583_v15, %v7581_v11 }
 0x99f   :  { %v3864_v53 = vpack.c.bf16 %v7587_v21, %v7585_v27 }
 0x9a0   :  { %4101 = vmatprep.mubr.bf16.mxu0 %v3865_v1 }
 0x9a1   :  { %4102 = vmatmul.mubr.bf16.vlgmr.msra.gmra.mrb[16].mxu0 %v3864_v53 }
 0x9a2   :  { %4399 = vmatpush1.bf16.msra.mxu0 %v6498_v25 }
 0x9a3   :  { %4400 = vmatprep.subr.bf16.mxu0 %v6503_v31 }
 0x9a6   :  { %4401 = vmatpush1.bf16.msra.mxu0 %v6501_v32 }
 0x9a7   :  { %4402 = vmatprep.subr.bf16.mxu0 %v6506_v24 }
 0x9aa   :  { %4403 = vmatpush1.bf16.msra.mxu0 %v6504_v33 }
 0x9ab   :  { %4404 = vmatprep.subr.bf16.mxu0 %v6509_v36 }
 0x9ae   :  { %4405 = vmatpush1.bf16.msra.mxu0 %v6507_v40 }
 0x9af   :  { %4406 = vmatprep.subr.bf16.mxu0 %v6512_v6 }
 0x9b2   :  { %4407 = vmatpush1.bf16.msra.mxu0 %v6510_v2 }
 0x9b3   :  { %4408 = vmatprep.subr.bf16.mxu0 %v6515_v14  ;;  %v4112_v14 = vld [vmem:[#allocation17 + $0x32] sm:$0x3] }
 0x9b6   :  { %4409 = vmatpush1.bf16.msra.mxu0 %v6513_v50  ;;  %v4150_v50 = vrot.slane %v4112_v14, %v7244_v10 }
 0x9b7   :  { %4410 = vmatprep.subr.bf16.mxu0 %v6518_v55  ;;  %v4113_v55 = vld [vmem:[#allocation17 + $0x34] sm:$0x3] }
 0x9b8   :  { %v4173_v38 = vrot.slane %v4113_v55, %v7247_v12 }
 0x9ba   :  { %4411 = vmatpush1.bf16.msra.mxu0 %v6516_v56  ;;  %v4154_v56 = vrot.slane %v4112_v14, %v7247_v12  ;;  %v6581_v14 = vld [vmem:[#allocation16 + $0xd4] ss:$20 sps:$4 sm:$0xff]  }
 0x9bb   :  { %4412 = vmatprep.subr.bf16.mxu0 %v6521_v48 }
 0x9be   :  { %4413 = vmatpush1.bf16.msra.mxu0 %v6519_v37  ;;  %v4169_v37 = vrot.slane %v4113_v55, %v7244_v10  ;;  %v6579_v55 = vld [vmem:[#allocation16 + $0xd0] ss:$20 sps:$4 sm:$0xff]  }
 0x9bf   :  { %4414 = vmatprep.subr.bf16.mxu0 %v6524_v59 }
 0x9c2   :  { %4415 = vmatpush1.bf16.msra.mxu0 %v6522_v54 }
 0x9c3   :  { %4416 = vmatprep.subr.bf16.mxu0 %v6527_v34 }
 0x9c6   :  { %4417 = vmatpush1.bf16.msra.mxu0 %v6525_v60 }
 0x9c7   :  { %4418 = vmatprep.subr.bf16.mxu0 %v6530_v41 }
 0x9ca   :  { %4419 = vmatpush1.bf16.msra.mxu0 %v6528_v46 }
 0x9cb   :  { %4420 = vmatprep.subr.bf16.mxu0 %v6533_v35 }
 0x9ce   :  { %4421 = vmatpush1.bf16.msra.mxu0 %v6531_v51 }
 0x9cf   :  { %4422 = vmatprep.subr.bf16.mxu0 %v6536_v45 }
 0x9d2   :  { %4423 = vmatpush1.bf16.msra.mxu0 %v6534_v0  ;;  %v6546_v0 = vld [vmem:[#allocation16] ss:$20 sps:$4 sm:$0xff]  }
 0x9d3   :  { %4424 = vmatprep.subr.bf16.mxu0 %v6539_v58  ;;  %v6548_v58 = vld [vmem:[#allocation16 + $0x4] ss:$20 sps:$4 sm:$0xff]  }
 0x9d4   :  { %5054 = vmatprep.subr.bf16.mxu1 %v6548_v58  ;;  %v6600_v58 = vld [vmem:[#allocation16 + $0x168] ss:$20 sps:$4 sm:$0xff]  }
 0x9d5   :  { %5055 = vmatpush1.bf16.msra.mxu1 %v6546_v0  ;;  %v6602_v0 = vld [vmem:[#allocation16 + $0x16c] ss:$20 sps:$4 sm:$0xff]  }
 0x9d6   :  { %4425 = vmatpush1.bf16.msra.mxu0 %v6537_v19  ;;  %v6549_v19 = vld [vmem:[#allocation16 + $0x8] ss:$20 sps:$4 sm:$0xff]  }
 0x9d7   :  { %4426 = vmatprep.subr.bf16.mxu0 %v6542_v62  ;;  %v6551_v62 = vld [vmem:[#allocation16 + $0xc] ss:$20 sps:$4 sm:$0xff]  }
 0x9da   :  { %4427 = vmatpush1.bf16.msra.mxu0 %v6540_v30  ;;  %v6554_v30 = vld [vmem:[#allocation16 + $0x2c] ss:$20 sps:$4 sm:$0xff]  }
 0x9db   :  { %4428 = vmatprep.subr.bf16.mxu0 %v6545_v28  ;;  %v6557_v28 = vld [vmem:[#allocation16 + $0x34] ss:$20 sps:$4 sm:$0xff]   ;;  %5056 = vmatprep.subr.bf16.mxu1 %v6554_v30 }
 0x9dc   :  { %v6608_v30 = vld [vmem:[#allocation16 + $0x194] ss:$20 sps:$4 sm:$0xff]  }
 0x9de   :  { %4429 = vmatpush1.bf16.msra.mxu0 %v6543_v4  ;;  %v6552_v4 = vld [vmem:[#allocation16 + $0x28] ss:$20 sps:$4 sm:$0xff]  }
 0x9df   :  { %5097 = vmatprep.subr.bf16.mxu0 %v6551_v62  ;;  %5057 = vmatpush1.bf16.msra.mxu1 %v6552_v4  ;;  %v6603_v62 = vld [vmem:[#allocation16 + $0x170] ss:$20 sps:$4 sm:$0xff]  }
 0x9e0   :  { %v6611_v4 = vld [vmem:[#allocation16 + $0x19c] ss:$20 sps:$4 sm:$0xff]  }
 0xa74   :  { %v4103_v5 = vpop.f32.mrb[16].mxu0 }
 0xa75   :  { %v7595_v63 = vadd.f32 %v4103_v5, %v3902_v3  ;;  %v4105_v26 = vpop.f32.mrb[17].mxu0 }
 0xa76   :  { %v7597_v49 = vadd.f32 %v4105_v26, %v3906_v16  ;;  %v4107_v20 = vpop.f32.mrb[18].mxu0 }
 0xa77   :  { %v7599_v8 = vadd.f32 %v4107_v20, %v3902_v3  ;;  %v4109_v43 = vpop.f32.mrb[19].mxu0  ;;  %v4122_v22 = vmul.f32 %v7595_v63, %v7595_v63 }
 0xa78   :  { %v7601_v18 = vadd.f32 %v4109_v43, %v3906_v16  ;;  %v4114_v23 = vadd.f32 %v7597_v49, %v7595_v63  ;;  %v4123_v42 = vmul.f32 %v7597_v49, %v7597_v49 }
 0xa79   :  { %v4124_v47 = vmul.f32 %v7599_v8, %v7599_v8 }
 0xa7a   :  { %4115 = vadd.xlane.f32.xlu0 %v4114_v23  ;;  %v4117_v44 = vadd.f32 %v7601_v18, %v7599_v8  ;;  %v4125_v13 = vmul.f32 %v7601_v18, %v7601_v18  ;;  %v4126_v52 = vadd.f32 %v4123_v42, %v4122_v22 }
 0xa7c   :  { %4118 = vadd.xlane.f32.xlu1 %v4117_v44  ;;  %v4129_v39 = vadd.f32 %v4125_v13, %v4124_v47 }
 0xa7e   :  { %4127 = vadd.xlane.f32.xlu0 %v4126_v52 }
 0xa80   :  { %4130 = vadd.xlane.f32.xlu1 %v4129_v39 }
 0xb07   :  { %v4116_v7 = vpop.xlane.xlu0 %4115 }
 0xb08   :  { %v4120_v17 = vmul.f32 0.00390625, %v4116_v7  ;;  %v6555_v7 = vld [vmem:[#allocation16 + $0x30] ss:$20 sps:$4 sm:$0xff]  }
 0xb09   :  { %v4119_v1 = vpop.xlane.xlu1 %4118 }
 0xb0a   :  { %v4121_v53 = vmul.f32 0.00390625, %v4119_v1  ;;  %v4134_v29 = vmul.f32 %v4120_v17, %v4120_v17  ;;  %v4138_v3 = vsub.f32 %v7595_v63, %v4120_v17  ;;  %v4139_v16 = vsub.f32 %v7597_v49, %v4120_v17  ;;  %v6560_v17 = vld [vmem:[#allocation16 + $0x54] ss:$20 sps:$4 sm:$0xff]   ;;  %v6563_v1 = vld [vmem:[#allocation16 + $0x5c] ss:$20 sps:$4 sm:$0xff]  }
 0xb0b   :  { %v4128_v25 = vpop.xlane.xlu0 %4127  ;;  %5058 = vmatprep.subr.bf16.mxu1 %v6560_v17  ;;  %v6614_v17 = vld [vmem:[#allocation16 + $0x1bc] ss:$20 sps:$4 sm:$0xff]  }
 0xb0c   :  { %v4132_v31 = vmul.f32 0.00390625, %v4128_v25  ;;  %v4135_v33 = vmul.f32 %v4121_v53, %v4121_v53  ;;  %v4140_v43 = vsub.f32 %v7599_v8, %v4121_v53  ;;  %v4141_v23 = vsub.f32 %v7601_v18, %v4121_v53  ;;  %v6558_v53 = vld [vmem:[#allocation16 + $0x50] ss:$20 sps:$4 sm:$0xff]   ;;  %v6561_v25 = vld [vmem:[#allocation16 + $0x58] ss:$20 sps:$4 sm:$0xff]  }
 0xb0d   :  { %v4131_v32 = vpop.xlane.xlu1 %4130  ;;  %5059 = vmatpush1.bf16.msra.mxu1 %v6558_v53  ;;  %v6617_v53 = vld [vmem:[#allocation16 + $0x1c4] ss:$20 sps:$4 sm:$0xff]  }
 0xb0e   :  { %v4136_v24 = vsub.f32 %v4132_v31, %v4134_v29  ;;  %v4133_v36 = vmul.f32 0.00390625, %v4131_v32  ;;  %v6566_v29 = vld [vmem:[#allocation16 + $0x7c] ss:$20 sps:$4 sm:$0xff]   ;;  %v6569_v31 = vld [vmem:[#allocation16 + $0x84] ss:$20 sps:$4 sm:$0xff]  }
 0xb0f   :  { %v6564_v32 = vld [vmem:[#allocation16 + $0x78] ss:$20 sps:$4 sm:$0xff]   ;;  %5060 = vmatprep.subr.bf16.mxu1 %v6566_v29 }
 0xb10   :  { %v4142_v40 = vadd.f32 1e-05, %v4136_v24  ;;  %v4137_v6 = vsub.f32 %v4133_v36, %v4135_v33  ;;  %v6567_v24 = vld [vmem:[#allocation16 + $0x80] ss:$20 sps:$4 sm:$0xff]   ;;  %v6572_v33 = vld [vmem:[#allocation16 + $0xa4] ss:$20 sps:$4 sm:$0xff]  }
 0xb11   :  { %v6575_v36 = vld [vmem:[#allocation16 + $0xac] ss:$20 sps:$4 sm:$0xff]   ;;  %5061 = vmatpush1.bf16.msra.mxu1 %v6564_v32  ;;  %v6620_v29 = vld [vmem:[#allocation16 + $0x1e4] ss:$20 sps:$4 sm:$0xff]  }
 0xb12   :  { %6742 = vrsqrt.f32 %v4142_v40  ;;  %v4143_v2 = vadd.f32 1e-05, %v4137_v6  ;;  %v6570_v40 = vld [vmem:[#allocation16 + $0xa0] ss:$20 sps:$4 sm:$0xff]   ;;  %5062 = vmatprep.subr.bf16.mxu1 %v6572_v33  ;;  %v6573_v6 = vld [vmem:[#allocation16 + $0xa8] ss:$20 sps:$4 sm:$0xff]  }
 0xb13   :  { %v6623_v32 = vld [vmem:[#allocation16 + $0x1ec] ss:$20 sps:$4 sm:$0xff]   ;;  %v6624_v33 = vld [vmem:[#allocation16 + $0x208] ss:$20 sps:$4 sm:$0xff]  }
 0xb14   :  { %6744 = vrsqrt.f32 %v4143_v2  ;;  %v6578_v2 = vld [vmem:[#allocation16 + $0xcc] ss:$20 sps:$4 sm:$0xff]  }
 0xb15   :  { %5063 = vmatpush1.bf16.msra.mxu1 %v6570_v40  ;;  %v6627_v40 = vld [vmem:[#allocation16 + $0x210] ss:$20 sps:$4 sm:$0xff]  }
 0xb16   :  { %5064 = vmatprep.subr.bf16.mxu1 %v6578_v2  ;;  %v6632_v2 = vld [vmem:[#allocation16 + $0x234] ss:$20 sps:$4 sm:$0xff]  }
 0xb1c   :  { %v6743_v48 = vpop.eup %6742 }
 0xb1d   :  { %v4157_v5 = vmul.f32 %v6743_v48, %v4150_v50  ;;  %v4158_v26 = vmul.f32 %v6743_v48, %v4154_v56  ;;  %v6587_v48 = vld [vmem:[#allocation16 + $0xfc] ss:$20 sps:$4 sm:$0xff]  }
 0xb1e   :  { %v6745_v20 = vpop.eup %6744 }
 0xb1f   :  { %v4159_v22 = vmul.f32 %v6745_v20, %v4150_v50  ;;  %v4160_v42 = vmul.f32 %v6745_v20, %v4154_v56  ;;  %v4162_v44 = vmul.f32 %v4158_v26, %v4139_v16  ;;  %v4161_v47 = vmul.f32 %v4157_v5, %v4138_v3  ;;  %v6576_v50 = vld [vmem:[#allocation16 + $0xc8] ss:$20 sps:$4 sm:$0xff]   ;;  %v6593_v16 = vld [vmem:[#allocation16 + $0x124] ss:$20 sps:$4 sm:$0xff]   ;;  %v6591_v26 = vld [vmem:[#allocation16 + $0x120] ss:$20 sps:$4 sm:$0xff]  }
 0xb20   :  { %v6584_v56 = vld [vmem:[#allocation16 + $0xf4] ss:$20 sps:$4 sm:$0xff]   ;;  %5065 = vmatpush1.bf16.msra.mxu1 %v6576_v50  ;;  %v6590_v3 = vld [vmem:[#allocation16 + $0x11c] ss:$20 sps:$4 sm:$0xff]   ;;  %v6588_v5 = vld [vmem:[#allocation16 + $0x118] ss:$20 sps:$4 sm:$0xff]  }
 0xb21   :  { %v4164_v13 = vmul.f32 %v4160_v42, %v4141_v23  ;;  %v4177_v52 = vadd.f32 %v4173_v38, %v4162_v44  ;;  %v4163_v39 = vmul.f32 %v4159_v22, %v4140_v43  ;;  %v4176_v54 = vadd.f32 %v4169_v37, %v4161_v47  ;;  %5066 = vmatprep.subr.bf16.mxu1 %v6584_v56  ;;  %v4192_v20 = vld [vmem:[#allocation17 + $0x36] sm:$0x3]  ;;  %v6630_v50 = vld [vmem:[#allocation16 + $0x230] ss:$20 sps:$4 sm:$0xff]  }
 0xb22   :  { %v4231_v43 = vrot.slane %v4192_v20, %v7244_v10  ;;  %v4235_v23 = vrot.slane %v4192_v20, %v7247_v12  ;;  %v6638_v56 = vld [vmem:[#allocation16 + $0x25c] ss:$20 sps:$4 sm:$0xff]  }
 0xb23   :  { %v4179_v59 = vadd.f32 %v4173_v38, %v4164_v13  ;;  %v4185_v34 = vmul.f32 0.01, %v4177_v52  ;;  %v4178_v63 = vadd.f32 %v4169_v37, %v4163_v39  ;;  %vm4181_vm9 = vcmp.gt.f32.partialorder %v4177_v52, 0.0  ;;  %v6582_v37 = vld [vmem:[#allocation16 + $0xf0] ss:$20 sps:$4 sm:$0xff]  }
 0xb24   :  { %v4184_v49 = vmul.f32 0.01, %v4176_v54  ;;  %vm4180_vm11 = vcmp.gt.f32.partialorder %v4176_v54, 0.0  ;;  %v6585_v38 = vld [vmem:[#allocation16 + $0xf8] ss:$20 sps:$4 sm:$0xff]   ;;  %5067 = vmatpush1.bf16.msra.mxu1 %v6582_v37 }
 0xb25   :  { %vm4183_vm10 = vcmp.gt.f32.partialorder %v4179_v59, 0.0  ;;  %v4187_v60 = vmul.f32 0.01, %v4179_v59  ;;  %vm4182_vm12 = vcmp.gt.f32.partialorder %v4178_v63, 0.0  ;;  %v4186_v8 = vmul.f32 0.01, %v4178_v63  ;;  %5068 = vmatprep.subr.bf16.mxu1 %v6590_v3 }
 0xb26   :  { %v4189_v41 = vsel %vm4181_vm9, %v4177_v52, %v4185_v34  ;;  %v4188_v35 = vsel %vm4180_vm11, %v4176_v54, %v4184_v49  ;;  %v6636_v37 = vld [vmem:[#allocation16 + $0x258] ss:$20 sps:$4 sm:$0xff]   ;;  %v6642_v3 = vld [vmem:[#allocation16 + $0x150] ss:$20 sps:$4 sm:$0xff]  }
 0xb27   :  { %v4191_v18 = vsel %vm4183_vm10, %v4179_v59, %v4187_v60  ;;  %v4190_v51 = vsel %vm4182_vm12, %v4178_v63, %v4186_v8 }
 0xb28   :  { %v4194_v46 = vpack.c.bf16 %v4191_v18, %v4189_v41  ;;  %v4193_v45 = vpack.c.bf16 %v4190_v51, %v4188_v35  ;;  %5069 = vmatpush1.bf16.msra.mxu1 %v6588_v5  ;;  %v6596_v35 = vld [vmem:[#allocation16 + $0x144] ss:$20 sps:$4 sm:$0xff]   ;;  %v6597_v51 = vld [vmem:[#allocation16 + $0x148] ss:$20 sps:$4 sm:$0xff]  }
 0xb29   :  { %5070 = vmatprep.subr.bf16.mxu1 %v6596_v35 }
 0xb2a   :  { %4430 = vmatprep.mubr.bf16.mxu0 %v4194_v46  ;;  %v6594_v46 = vld [vmem:[#allocation16 + $0x140] ss:$20 sps:$4 sm:$0xff]  }
 0xb2b   :  { %4431 = vmatmul.mubr.bf16.vlgmr.msra.gmra.mrb[20].mxu0 %v4193_v45  ;;  %v6599_v45 = vld [vmem:[#allocation16 + $0x14c] ss:$20 sps:$4 sm:$0xff]  }
 0xb2c   :  { %5098 = vmatpush1.bf16.msra.mxu0 %v6549_v19  ;;  %5071 = vmatpush1.bf16.msra.mxu1 %v6594_v46  ;;  %v6605_v19 = vld [vmem:[#allocation16 + $0x174] ss:$20 sps:$4 sm:$0xff]  }
 0xb2d   :  { %5099 = vmatprep.subr.bf16.mxu0 %v6557_v28  ;;  %5072 = vmatprep.subr.bf16.mxu1 %v6602_v0  ;;  %v6606_v28 = vld [vmem:[#allocation16 + $0x190] ss:$20 sps:$4 sm:$0xff]  }
 0xb30   :  { %5100 = vmatpush1.bf16.msra.mxu0 %v6555_v7  ;;  %5073 = vmatpush1.bf16.msra.mxu1 %v6600_v58  ;;  %v6609_v7 = vld [vmem:[#allocation16 + $0x198] ss:$20 sps:$4 sm:$0xff]  }
 0xb31   :  { %5101 = vmatprep.subr.bf16.mxu0 %v6563_v1  ;;  %5074 = vmatprep.subr.bf16.mxu1 %v6608_v30  ;;  %v6612_v1 = vld [vmem:[#allocation16 + $0x1b8] ss:$20 sps:$4 sm:$0xff]  }
 0xb34   :  { %5102 = vmatpush1.bf16.msra.mxu0 %v6561_v25  ;;  %5075 = vmatpush1.bf16.msra.mxu1 %v6606_v28  ;;  %v6615_v25 = vld [vmem:[#allocation16 + $0x1c0] ss:$20 sps:$4 sm:$0xff]  }
 0xb35   :  { %5103 = vmatprep.subr.bf16.mxu0 %v6569_v31  ;;  %5076 = vmatprep.subr.bf16.mxu1 %v6614_v17  ;;  %v6618_v31 = vld [vmem:[#allocation16 + $0x1e0] ss:$20 sps:$4 sm:$0xff]  }
 0xb38   :  { %5104 = vmatpush1.bf16.msra.mxu0 %v6567_v24  ;;  %5077 = vmatpush1.bf16.msra.mxu1 %v6612_v1  ;;  %v6621_v24 = vld [vmem:[#allocation16 + $0x1e8] ss:$20 sps:$4 sm:$0xff]  }
 0xb39   :  { %5105 = vmatprep.subr.bf16.mxu0 %v6575_v36  ;;  %5078 = vmatprep.subr.bf16.mxu1 %v6620_v29  ;;  %v6626_v36 = vld [vmem:[#allocation16 + $0x20c] ss:$20 sps:$4 sm:$0xff]  }
 0xb3c   :  { %5106 = vmatpush1.bf16.msra.mxu0 %v6573_v6  ;;  %5079 = vmatpush1.bf16.msra.mxu1 %v6618_v31  ;;  %v6629_v6 = vld [vmem:[#allocation16 + $0x214] ss:$20 sps:$4 sm:$0xff]  }
 0xb3d   :  { %5107 = vmatprep.subr.bf16.mxu0 %v6581_v14  ;;  %5080 = vmatprep.subr.bf16.mxu1 %v6626_v36  ;;  %v6635_v14 = vld [vmem:[#allocation16 + $0x23c] ss:$20 sps:$4 sm:$0xff]  }
 0xb40   :  { %5108 = vmatpush1.bf16.msra.mxu0 %v6579_v55  ;;  %5081 = vmatpush1.bf16.msra.mxu1 %v6624_v33  ;;  %v6633_v55 = vld [vmem:[#allocation16 + $0x238] ss:$20 sps:$4 sm:$0xff]  }
 0xb41   :  { %5109 = vmatprep.subr.bf16.mxu0 %v6587_v48  ;;  %5082 = vmatprep.subr.bf16.mxu1 %v6632_v2  ;;  %v6641_v48 = vld [vmem:[#allocation16 + $0x264] ss:$20 sps:$4 sm:$0xff]  }
 0xb42   :  { %v6645_v2 = vld [vmem:[#allocation16 + $0x38] ss:$20 sps:$4 sm:$0xff]  }
 0xb44   :  { %5110 = vmatpush1.bf16.msra.mxu0 %v6585_v38  ;;  %5083 = vmatpush1.bf16.msra.mxu1 %v6630_v50  ;;  %v6639_v38 = vld [vmem:[#allocation16 + $0x260] ss:$20 sps:$4 sm:$0xff]   ;;  %v6651_v50 = vld [vmem:[#allocation16 + $0xb0] ss:$20 sps:$4 sm:$0xff]  }
 0xb45   :  { %5111 = vmatprep.subr.bf16.mxu0 %v6593_v16  ;;  %5084 = vmatprep.subr.bf16.mxu1 %v6638_v56  ;;  %v6653_v56 = vld [vmem:[#allocation16 + $0xd8] ss:$20 sps:$4 sm:$0xff]  }
 0xb48   :  { %5112 = vmatpush1.bf16.msra.mxu0 %v6591_v26  ;;  %5085 = vmatpush1.bf16.msra.mxu1 %v6636_v37  ;;  %v6655_v37 = vld [vmem:[#allocation16 + $0x100] ss:$20 sps:$4 sm:$0xff]  }
 0xb49   :  { %5113 = vmatprep.subr.bf16.mxu0 %v6599_v45  ;;  %5786 = vmatprep.subr.bf16.mxu1 %v6642_v3  ;;  %v6657_v3 = vld [vmem:[#allocation16 + $0x128] ss:$20 sps:$4 sm:$0xff]  }
 0xb4c   :  { %5114 = vmatpush1.bf16.msra.mxu0 %v6597_v51 }
 0xb4d   :  { %5115 = vmatprep.subr.bf16.mxu0 %v6605_v19 }
 0xb50   :  { %5116 = vmatpush1.bf16.msra.mxu0 %v6603_v62 }
 0xb51   :  { %5117 = vmatprep.subr.bf16.mxu0 %v6611_v4 }
 0xb54   :  { %5118 = vmatpush1.bf16.msra.mxu0 %v6609_v7 }
 0xb55   :  { %5119 = vmatprep.subr.bf16.mxu0 %v6617_v53 }
 0xb58   :  { %5120 = vmatpush1.bf16.msra.mxu0 %v6615_v25 }
 0xb59   :  { %5121 = vmatprep.subr.bf16.mxu0 %v6623_v32 }
 0xb5c   :  { %5122 = vmatpush1.bf16.msra.mxu0 %v6621_v24 }
 0xb5d   :  { %5123 = vmatprep.subr.bf16.mxu0 %v6629_v6  ;;  %v6644_v6 = vld [vmem:[#allocation16 + $0x178] ss:$20 sps:$4 sm:$0xff]  }
 0xb60   :  { %5124 = vmatpush1.bf16.msra.mxu0 %v6627_v40  ;;  %v6643_v40 = vld [vmem:[#allocation16 + $0x10] ss:$20 sps:$4 sm:$0xff]  }
 0xb61   :  { %5125 = vmatprep.subr.bf16.mxu0 %v6635_v14  ;;  %v6646_v14 = vld [vmem:[#allocation16 + $0x1a0] ss:$20 sps:$4 sm:$0xff]  }
 0xb64   :  { %5126 = vmatpush1.bf16.msra.mxu0 %v6633_v55  ;;  %v6652_v55 = vld [vmem:[#allocation16 + $0x218] ss:$20 sps:$4 sm:$0xff]  }
 0xb65   :  { %5127 = vmatprep.subr.bf16.mxu0 %v6641_v48  ;;  %v6654_v48 = vld [vmem:[#allocation16 + $0x240] ss:$20 sps:$4 sm:$0xff]  }
 0xb68   :  { %5128 = vmatpush1.bf16.msra.mxu0 %v6639_v38  ;;  %v6656_v38 = vld [vmem:[#allocation16 + $0x268] ss:$20 sps:$4 sm:$0xff]  }
 0xbfe   :  { %v4432_v22 = vpop.f32.mrb[20].mxu0 }
 0xbff   :  { %v7625_v42 = vadd.f32 %v4432_v22, %v4231_v43  ;;  %v4434_v44 = vpop.f32.mrb[21].mxu0 }
 0xc00   :  { %v7627_v47 = vadd.f32 %v4434_v44, %v4235_v23  ;;  %v4436_v13 = vpop.f32.mrb[22].mxu0 }
 0xc01   :  { %v7629_v52 = vadd.f32 %v4436_v13, %v4231_v43  ;;  %v4438_v39 = vpop.f32.mrb[23].mxu0  ;;  %v4451_v34 = vmul.f32 %v7625_v42, %v7625_v42 }
 0xc02   :  { %v7631_v54 = vadd.f32 %v4438_v39, %v4235_v23  ;;  %v4443_v59 = vadd.f32 %v7627_v47, %v7625_v42  ;;  %v4452_v63 = vmul.f32 %v7627_v47, %v7627_v47 }
 0xc03   :  { %v4453_v60 = vmul.f32 %v7629_v52, %v7629_v52 }
 0xc04   :  { %4444 = vadd.xlane.f32.xlu0 %v4443_v59  ;;  %v4446_v49 = vadd.f32 %v7631_v54, %v7629_v52  ;;  %v4454_v8 = vmul.f32 %v7631_v54, %v7631_v54  ;;  %v4455_v41 = vadd.f32 %v4452_v63, %v4451_v34 }
 0xc06   :  { %4447 = vadd.xlane.f32.xlu1 %v4446_v49  ;;  %v4458_v18 = vadd.f32 %v4454_v8, %v4453_v60  ;;  %v4441_v60 = vld [vmem:[#allocation17 + $0x38] sm:$0x3] }
 0xc07   :  { %v4479_v8 = vrot.slane %v4441_v60, %v7244_v10 }
 0xc08   :  { %4456 = vadd.xlane.f32.xlu0 %v4455_v41  ;;  %v4442_v41 = vld [vmem:[#allocation17 + $0x3a] sm:$0x3] }
 0xc09   :  { %v4498_v35 = vrot.slane %v4442_v41, %v7244_v10  ;;  %v4502_v51 = vrot.slane %v4442_v41, %v7247_v12 }
 0xc0a   :  { %4459 = vadd.xlane.f32.xlu1 %v4458_v18  ;;  %v4483_v18 = vrot.slane %v4441_v60, %v7247_v12 }
 0xc91   :  { %v4445_v16 = vpop.xlane.xlu0 %4444 }
 0xc92   :  { %v4449_v5 = vmul.f32 0.00390625, %v4445_v16  ;;  %v4513_v16 = vld [vmem:[#allocation17 + $0x3c] sm:$0x1f] }
 0xc93   :  { %v4448_v26 = vpop.xlane.xlu1 %4447 }
 0xc94   :  { %v4450_v20 = vmul.f32 0.00390625, %v4448_v26  ;;  %v4463_v23 = vmul.f32 %v4449_v5, %v4449_v5  ;;  %v4467_v45 = vsub.f32 %v7625_v42, %v4449_v5  ;;  %v4468_v0 = vsub.f32 %v7627_v47, %v4449_v5 }
 0xc95   :  { %v4457_v43 = vpop.xlane.xlu0 %4456  ;;  %v4616_v5 = vrot.slane %v4513_v16, %v7244_v10  ;;  %v4624_v26 = vrot.slane %v4513_v16, %v7280_v57 }
 0xc96   :  { %v4461_v22 = vmul.f32 0.00390625, %v4457_v43  ;;  %v4464_v39 = vmul.f32 %v4450_v20, %v4450_v20  ;;  %v4469_v30 = vsub.f32 %v7629_v52, %v4450_v20  ;;  %v4470_v28 = vsub.f32 %v7631_v54, %v4450_v20 }
 0xc97   :  { %v4460_v44 = vpop.xlane.xlu1 %4459  ;;  %v4620_v20 = vrot.slane %v4513_v16, %v7247_v12  ;;  %v4628_v43 = vrot.slane %v4513_v16, %v7285_v61 }
 0xc98   :  { %v4465_v13 = vsub.f32 %v4461_v22, %v4463_v23  ;;  %v4462_v59 = vmul.f32 0.00390625, %v4460_v44 }
 0xc9a   :  { %v4471_v34 = vadd.f32 1e-05, %v4465_v13  ;;  %v4466_v63 = vsub.f32 %v4462_v59, %v4464_v39 }
 0xc9c   :  { %6746 = vrsqrt.f32 %v4471_v34  ;;  %v4472_v49 = vadd.f32 1e-05, %v4466_v63 }
 0xc9e   :  { %6748 = vrsqrt.f32 %v4472_v49 }
 0xca6   :  { %v6747_v46 = vpop.eup %6746 }
 0xca7   :  { %v4486_v58 = vmul.f32 %v6747_v46, %v4479_v8  ;;  %v4487_v19 = vmul.f32 %v6747_v46, %v4483_v18 }
 0xca8   :  { %v6749_v62 = vpop.eup %6748 }
 0xca9   :  { %v4488_v4 = vmul.f32 %v6749_v62, %v4479_v8  ;;  %v4489_v7 = vmul.f32 %v6749_v62, %v4483_v18  ;;  %v4491_v17 = vmul.f32 %v4487_v19, %v4468_v0  ;;  %v4490_v1 = vmul.f32 %v4486_v58, %v4467_v45 }
 0xcab   :  { %v4493_v53 = vmul.f32 %v4489_v7, %v4470_v28  ;;  %v4506_v25 = vadd.f32 %v4502_v51, %v4491_v17  ;;  %v4492_v29 = vmul.f32 %v4488_v4, %v4469_v30  ;;  %v4505_v31 = vadd.f32 %v4498_v35, %v4490_v1 }
 0xcad   :  { %v4508_v32 = vadd.f32 %v4502_v51, %v4493_v53  ;;  %v4507_v24 = vadd.f32 %v4498_v35, %v4492_v29  ;;  %v4510_v42 = vadd.f32 %v4506_v25, %v7581_v11  ;;  %v4509_v33 = vadd.f32 %v4505_v31, %v7585_v27  ;;  %v6647_v11 = vld [vmem:[#allocation16 + $0x60] ss:$20 sps:$4 sm:$0xff]   ;;  %v6649_v27 = vld [vmem:[#allocation16 + $0x88] ss:$20 sps:$4 sm:$0xff]  }
 0xcaf   :  { %v4512_v47 = vadd.f32 %v4508_v32, %v7583_v15  ;;  %v4511_v52 = vadd.f32 %v4507_v24, %v7587_v21  ;;  %v6648_v15 = vld [vmem:[#allocation16 + $0x1c8] ss:$20 sps:$4 sm:$0xff]   ;;  %v6650_v21 = vld [vmem:[#allocation16 + $0x1f0] ss:$20 sps:$4 sm:$0xff]   ;;  %v4631_v24 = vsub.s32 4, %v7241_v9 }
 0xcb1   :  { %v4515_v36 = vpack.c.bf16 %v4512_v47, %v4510_v42  ;;  %v4514_v54 = vpack.c.bf16 %v4511_v52, %v4509_v33  ;;  %v4632_v33 = vrot.slane %v4513_v16, %v4631_v24 }
 0xcb3   :  { %5086 = vmatprep.mubr.bf16.mxu1 %v4515_v36  ;;  %5129 = vmatprep.mubr.bf16.mxu0 %v4515_v36 }
 0xcb4   :  { %5087 = vmatmul.mubr.bf16.vlgmr.msra.gmra.mrb[16].mxu1 %v4514_v54  ;;  %5130 = vmatmul.mubr.bf16.vlgmr.msra.gmra.mrb[24].mxu0 %v4514_v54 }
 0xcb5   :  { %5787 = vmatpush3.bf16.msra.mxu1 %v6643_v40  ;;  %5172 = vmatprep.mubr.bf16.mxu1 %v4515_v36 }
 0xcb6   :  { %5788 = vmatprep.subr.bf16.mxu1 %v6644_v6 }
 0xcb9   :  { %5789 = vmatpush3.bf16.msra.mxu1 %v6645_v2 }
 0xcba   :  { %5790 = vmatprep.subr.bf16.mxu1 %v6646_v14 }
 0xcbd   :  { %5791 = vmatpush3.bf16.msra.mxu1 %v6647_v11 }
 0xcbe   :  { %5792 = vmatprep.subr.bf16.mxu1 %v6648_v15 }
 0xcc1   :  { %5793 = vmatpush3.bf16.msra.mxu1 %v6649_v27 }
 0xcc2   :  { %5794 = vmatprep.subr.bf16.mxu1 %v6650_v21 }
 0xcc5   :  { %5795 = vmatpush3.bf16.msra.mxu1 %v6651_v50 }
 0xcc6   :  { %5796 = vmatprep.subr.bf16.mxu1 %v6652_v55 }
 0xcc9   :  { %5797 = vmatpush3.bf16.msra.mxu1 %v6653_v56 }
 0xcca   :  { %5798 = vmatprep.subr.bf16.mxu1 %v6654_v48 }
 0xccd   :  { %5799 = vmatpush3.bf16.msra.mxu1 %v6655_v37 }
 0xcce   :  { %5800 = vmatprep.subr.bf16.mxu1 %v6656_v38 }
 0xcd1   :  { %5801 = vmatpush3.bf16.msra.mxu1 %v6657_v3 }
 0xcd4   :  { %5173 = vmatmul.mubr.bf16.vlgmr.msra.gmra.mrb[20].mxu1 %v4514_v54 }
 0xd87   :  { %v5088_v23 = vpop.f32.mrb[16].mxu1  ;;  %v5131_v22 = vpop.f32.mrb[24].mxu0 }
 0xd88   :  { %v7661_v44 = vadd.f32 %v5088_v23, %v4616_v5  ;;  %v5132_v13 = vadd.f32 %v5131_v22, %v4624_v26  ;;  %v5090_v39 = vpop.f32.mrb[17].mxu1  ;;  %v5133_v59 = vpop.f32.mrb[25].mxu0 }
 0xd89   :  { %v7663_v34 = vadd.f32 %v5090_v39, %v4620_v20  ;;  %v5134_v63 = vadd.f32 %v5133_v59, %v4628_v43  ;;  %v5092_v49 = vpop.f32.mrb[18].mxu1  ;;  %v5135_v60 = vpop.f32.mrb[26].mxu0 }
 0xd8a   :  { %v5181_v10 = vand.u32 2147483647, %v7661_v44  ;;  %5225 = vst [vmem:[#allocation19 + $0x10] sm:$0xff] %v5132_v13  ;;  %v7666_v57 = vadd.f32 %v5092_v49, %v4616_v5  ;;  %v5136_v12 = vadd.f32 %v5135_v60, %v4624_v26  ;;  %v5094_v8 = vpop.f32.mrb[19].mxu1  ;;  %v5137_v61 = vpop.f32.mrb[27].mxu0  ;;  %vm5209_vm13 = vcmp.ge.f32.partialorder %v7661_v44, 0.0 }
 0xd8b   :  { %v5182_v41 = vand.u32 2147483647, %v7663_v34  ;;  %5226 = vst [vmem:[#allocation19 + $0x18] sm:$0xff] %v5134_v63  ;;  %v7669_v18 = vadd.f32 %v5094_v8, %v4620_v20  ;;  %v5138_v46 = vadd.f32 %v5137_v61, %v4628_v43  ;;  %vm5210_vm14 = vcmp.ge.f32.partialorder %v7663_v34, 0.0 }
 0xd8c   :  { %v5185_v35 = vsub.f32 0.0, %v5181_v10  ;;  %v5183_v51 = vand.u32 2147483647, %v7666_v57  ;;  %5228 = vst [vmem:[#allocation19 + $0x38] sm:$0xff] %v5136_v12  ;;  %vm5211_vm15 = vcmp.ge.f32.partialorder %v7666_v57, 0.0 }
 0xd8d   :  { %v5186_v45 = vsub.f32 0.0, %v5182_v41  ;;  %v5184_v0 = vand.u32 2147483647, %v7669_v18  ;;  %5229 = vst [vmem:[#allocation19 + $0x40] sm:$0xff] %v5138_v46  ;;  %vm5212_vm0 = vcmp.ge.f32.partialorder %v7669_v18, 0.0 }
 0xd8e   :  { %v5189_v58 = vmul.f32 1.442695, %v5185_v35  ;;  %v5187_v19 = vsub.f32 0.0, %v5183_v51 }
 0xd8f   :  { %v5191_v62 = vmul.f32 1.442695, %v5186_v45  ;;  %v5188_v30 = vsub.f32 0.0, %v5184_v0 }
 0xd90   :  { %6750 = vpow2.f32 %v5189_v58  ;;  %v5193_v28 = vmul.f32 1.442695, %v5187_v19 }
 0xd91   :  { %6752 = vpow2.f32 %v5191_v62  ;;  %v5195_v4 = vmul.f32 1.442695, %v5188_v30 }
 0xd92   :  { %6754 = vpow2.f32 %v5193_v28 }
 0xd93   :  { %6756 = vpow2.f32 %v5195_v4 }
 0xd9a   :  { %v6751_v7 = vpop.eup %6750 }
 0xd9b   :  { %v6753_v17 = vpop.eup %6752  ;;  %v5197_v1 = vadd.f32 1.0, %v6751_v7 }
 0xd9c   :  { %v6755_v53 = vpop.eup %6754  ;;  %v5198_v25 = vadd.f32 1.0, %v6753_v17 }
 0xd9d   :  { %v6757_v29 = vpop.eup %6756  ;;  %6758 = vrcp.f32 %v5197_v1  ;;  %v5199_v31 = vadd.f32 1.0, %v6755_v53 }
 0xd9e   :  { %6760 = vrcp.f32 %v5198_v25  ;;  %v5200_v32 = vadd.f32 1.0, %v6757_v29 }
 0xd9f   :  { %6762 = vrcp.f32 %v5199_v31 }
 0xda0   :  { %6764 = vrcp.f32 %v5200_v32 }
 0xda7   :  { %v6759_v42 = vpop.eup %6758  ;;  %v5802_v47 = vpop.f32.mrb[20].mxu1 }
 0xda8   :  { %v6761_v52 = vpop.eup %6760  ;;  %v5205_v36 = vmin.f32 %v6759_v42, 1.0  ;;  %v5803_v54 = vpop.f32.mrb[21].mxu1 }
 0xda9   :  { %v6763_v40 = vpop.eup %6762  ;;  %v5206_v6 = vmin.f32 %v6761_v52, 1.0  ;;  %v5804_v2 = vadd.f32 %v5803_v54, %v5802_v47  ;;  %v5805_v14 = vpop.f32.mrb[22].mxu1 }
 0xdaa   :  { %v6765_v11 = vpop.eup %6764  ;;  %v5213_v15 = vsub.f32 1.0, %v5205_v36  ;;  %v5207_v27 = vmin.f32 %v6763_v40, 1.0  ;;  %v5806_v21 = vpop.f32.mrb[23].mxu1 }
 0xdab   :  { %v5214_v50 = vsub.f32 1.0, %v5206_v6  ;;  %v5208_v55 = vmin.f32 %v6765_v11, 1.0  ;;  %v5175_v56 = vadd.f32 %v5804_v2, %v4632_v33  ;;  %v5807_v9 = vadd.f32 %v5806_v21, %v5805_v14 }
 0xdac   :  { %v5217_v48 = vsel %vm5209_vm13, %v5205_v36, %v5213_v15  ;;  %v5215_v37 = vsub.f32 1.0, %v5207_v27 }
 0xdad   :  { %5221 = vst [vmem:[#allocation19] sm:$0xff] %v5217_v48  ;;  %v5218_v38 = vsel %vm5210_vm14, %v5206_v6, %v5214_v50  ;;  %v5216_v3 = vsub.f32 1.0, %v5208_v55  ;;  %5227 = vst [vmem:[#allocation19 + $0x20] sm:$0xff] %v5175_v56  ;;  %v5178_v16 = vadd.f32 %v5807_v9, %v4632_v33 }
 0xdae   :  { %5222 = vst [vmem:[#allocation19 + $0x8] sm:$0xff] %v5218_v38  ;;  %v5219_v5 = vsel %vm5211_vm15, %v5207_v27, %v5215_v37 }
 0xdaf   :  { %5223 = vst [vmem:[#allocation19 + $0x28] sm:$0xff] %v5219_v5  ;;  %v5220_v26 = vsel %vm5212_vm0, %v5208_v55, %v5216_v3  ;;  %5230 = vst [vmem:[#allocation19 + $0x48] sm:$0xff] %v5178_v16 }
 0xdb0   :  { %5224 = vst [vmem:[#allocation19 + $0x30] sm:$0xff] %v5220_v26 }
 0xdb1   :  { %6997 = shalt.err (!%p6994_p0)
}
 0xdb2   :  { %s6998_s25 = scalar_lea.hbm %s7700_s10, 1280 }
 0xdb3   :  { %p6999_p1 = scmp.ne.s32.totalorder %s7700_s10, %s6998_s25  ;;  %p7002_p2 = scmp.lt.u32.totalorder %s6998_s25, %s7700_s10 }
 0xdb5   :  { %p7004_p3 = pnand %p7002_p2, %p6999_p1 }
 0xdb7   :  { %7007 = shalt.err (!%p7004_p3)
}
 0xdb8   :  { %s7040_s1 = smov 640   ;;  %s7041_s7 = smov 40  }
 0xdb9   :  { %5242 = dma.vmem_to_hbm [thread:$0]  %s5237_s13, 1280, %s7700_s10, [#allocation4], %s7040_s1, %s7040_s1, %s7041_s7  }
 0xdba   :  { %7020 = dma.done.wait [#allocation4], 1280  }
 0xdbb   :  { %7021 = vsyncadd [#allocation4], 4294966016 }
 0xdbc   :  { %5246 = vsyncpa [#allocation3], 1 }
 0xdbd   :  { %5247 = vsyncpa [#allocation6], 1 }
 0xdbe   :  { %5248 = vsyncpa [#allocation9], 1 }
 0xdbf   :  { %5249 = vsyncpa [#allocation12], 1 }
 0xdc0   :  { %5250 = vsyncpa [#allocation15], 1 }
 0xdc1   :  { %5251 = vsyncpa [#allocation18], 1 }
 0xdc2   :  { %5252 = vsyncpa [#allocation4], 1 }

</bundles_post_ra>
